<compile_context>
chip_gen: v6e
topology: v6e:2x2x1
jax: 0.10.0
libtpu: 0.0.40
codegen_flags: <defaults>
</compile_context>

<pallas_src>
import jax
import jax.numpy as jnp
from jax.experimental import pallas as pl
from jax.experimental.pallas import tpu as pltpu

B = 2              # batch
L = 50             # sequence length (fixed by fc1 = Linear(128 * 50, 64))
CIN = 3
C1 = 64
C2 = 128
HID = 64
NOUT = 3
M_ROWS = L * B     # 100 activation rows, ordered (l, b)
BN_EPS = 1e-5


def cnn_pinn_kernel(
    cols1_ref,            # (M, 9)        f32  im2col of the input (built in wrapper)
    w1_ref, b1_ref,       # (9, 128) f32, (1, 128) f32   [conv1*bn1 | res_conv1]
    w2_ref, b2_ref,       # (192, 256) f32, (1, 256) f32 [conv2*bn2 | res_conv2]
    wfc1_hbm,             # (50, 128, 64) bf16  fc1 weight, left in HBM (ANY)
    bfc1_ref,             # (1, 64)       f32
    wfc2_ref, bfc2_ref,   # (64, 3) f32,  (1, 3) f32
    out_ref,              # (B, 3)        f32
    wfc1_vmem,            # VMEM (50, 128, 64) bf16 scratch (DMA destination)
    x2_scr,               # VMEM (M, 128) bf16 scratch (fc1 operand staging)
    dma_sem,              # DMA semaphore
):
    # Kick off the fc1 weight fetch; it overlaps with both conv blocks.
    fc1_copy = pltpu.make_async_copy(wfc1_hbm, wfc1_vmem, dma_sem)
    fc1_copy.start()

    # ---- block 1: conv1(k=3) + BN1 (folded) + tanh + res_conv1 --------------
    y1 = jnp.dot(cols1_ref[...], w1_ref[...],
                 preferred_element_type=jnp.float32) + b1_ref[...]
    # columns [0:64) = bn1(conv1(x)), columns [64:128) = res_conv1(x)
    # (.detach() on the residual only affects autograd, not the forward value)
    out1 = jnp.tanh(y1[:, :C1]) + y1[:, C1:]                        # (M, 64)

    # ---- block 2: conv2(k=3) + BN2 (folded) + tanh + res_conv2 --------------
    # Neighbour taps via banded shift matrices: row r of `left` is out1[r - B]
    # (same sequence position, previous l) and zero at l == 0; `right` is
    # out1[r + B], zero at l == L-1.  This realises Conv1d's "same" padding
    # exactly and keeps every operand sublane-aligned.
    rows = jax.lax.broadcasted_iota(jnp.int32, (M_ROWS, M_ROWS), 0)
    cols = jax.lax.broadcasted_iota(jnp.int32, (M_ROWS, M_ROWS), 1)
    shift_dn = (cols == rows - B).astype(jnp.float32)
    shift_up = (cols == rows + B).astype(jnp.float32)
    left = jnp.dot(shift_dn, out1, preferred_element_type=jnp.float32)
    right = jnp.dot(shift_up, out1, preferred_element_type=jnp.float32)

    # Fused weight rows: [0:64) = tap k=0, [64:128) = tap k=1 (+ 1x1 residual
    # in the upper 128 output columns), [128:192) = tap k=2.
    y2 = (jnp.dot(left, w2_ref[0:C1, :], preferred_element_type=jnp.float32)
          + jnp.dot(out1, w2_ref[C1:2 * C1, :], preferred_element_type=jnp.float32)
          + jnp.dot(right, w2_ref[2 * C1:3 * C1, :], preferred_element_type=jnp.float32)
          + b2_ref[...])
    # columns [0:128) = bn2(conv2(out1)), columns [128:256) = res_conv2(out1)
    out2 = jnp.tanh(y2[:, :C2]) + y2[:, C2:]                        # (M, 128)

    # ---- head: fc1 -> tanh -> (dropout: eval identity) -> fc2 ---------------
    # Stage out2 once in bf16; rows {B*l, B*l+1} are the two batch rows of
    # sequence position l (contiguous, pair-aligned for bf16 packing).
    x2_scr[...] = out2.astype(jnp.bfloat16)
    fc1_copy.wait()
    acc = jnp.zeros((B, HID), jnp.float32)
    for l in range(L):                          # unrolled; no (B, L*C2) flatten/relayout
        lhs = x2_scr[B * l:B * (l + 1), :]                          # (B, 128) bf16
        acc = acc + jnp.dot(lhs, wfc1_vmem[l],
                            preferred_element_type=jnp.float32)
    h = jnp.tanh(acc + bfc1_ref[...])
    # TODO(synk): Dropout(0.5) is eval-mode identity; training-mode masking omitted.
    # TODO(synk): BatchNorm uses folded running stats (eval mode); batch stats omitted.
    out_ref[...] = jnp.dot(h, wfc2_ref[...],
                           preferred_element_type=jnp.float32) + bfc2_ref[...]


def make_torch_params(key):
    """Deterministic synthetic parameters in PyTorch layouts."""
    ks = jax.random.split(key, 20)

    def rnd(k, shape, scale=0.1):
        return scale * jax.random.normal(k, shape, dtype=jnp.float32)

    conv1_w = rnd(ks[0], (C1, CIN, 3));   conv1_b = rnd(ks[1], (C1,))
    bn1_g = 1.0 + rnd(ks[2], (C1,));      bn1_b = rnd(ks[3], (C1,))
    bn1_m = rnd(ks[4], (C1,));            bn1_v = jnp.abs(1.0 + rnd(ks[5], (C1,)))
    conv2_w = rnd(ks[6], (C2, C1, 3));    conv2_b = rnd(ks[7], (C2,))
    bn2_g = 1.0 + rnd(ks[8], (C2,));      bn2_b = rnd(ks[9], (C2,))
    bn2_m = rnd(ks[10], (C2,));           bn2_v = jnp.abs(1.0 + rnd(ks[11], (C2,)))
    res1_w = rnd(ks[12], (C1, CIN, 1));   res1_b = rnd(ks[13], (C1,))
    res2_w = rnd(ks[14], (C2, C1, 1));    res2_b = rnd(ks[15], (C2,))
    fc1_w = rnd(ks[16], (HID, C2 * L));   fc1_b = rnd(ks[17], (HID,))
    fc2_w = rnd(ks[18], (NOUT, HID));     fc2_b = rnd(ks[19], (NOUT,))
    return (conv1_w, conv1_b, bn1_g, bn1_b, bn1_m, bn1_v,
            conv2_w, conv2_b, bn2_g, bn2_b, bn2_m, bn2_v,
            res1_w, res1_b, res2_w, res2_b, fc1_w, fc1_b, fc2_w, fc2_b)


def fuse_params(raw):
    """Fold eval-mode BN into the convs, fuse the 1x1 residual convs as extra
    output columns, and lay fc1's weight out as (L, C2, HID)."""
    (conv1_w, conv1_b, bn1_g, bn1_b, bn1_m, bn1_v,
     conv2_w, conv2_b, bn2_g, bn2_b, bn2_m, bn2_v,
     res1_w, res1_b, res2_w, res2_b, fc1_w, fc1_b, fc2_w, fc2_b) = raw

    s1 = bn1_g / jnp.sqrt(bn1_v + BN_EPS); t1 = bn1_b - bn1_m * s1
    s2 = bn2_g / jnp.sqrt(bn2_v + BN_EPS); t2 = bn2_b - bn2_m * s2

    # Block 1 fused weight: [im2col(conv1) * s1 | res_conv1], shape (9, 128).
    # im2col row index is k*CIN + ci; the center-tap rows carry the 1x1 residual.
    w1_im2col = jnp.transpose(conv1_w, (2, 1, 0)).reshape(3 * CIN, C1)
    w1 = jnp.zeros((3 * CIN, 2 * C1), jnp.float32)
    w1 = w1.at[:, :C1].set(w1_im2col * s1[None, :])
    w1 = w1.at[CIN:2 * CIN, C1:].set(res1_w[:, :, 0].T)
    b1 = jnp.concatenate([conv1_b * s1 + t1, res1_b]).reshape(1, 2 * C1)

    # Block 2 fused weight: [im2col(conv2) * s2 | res_conv2], shape (192, 256).
    w2_im2col = jnp.transpose(conv2_w, (2, 1, 0)).reshape(3 * C1, C2)
    w2 = jnp.zeros((3 * C1, 2 * C2), jnp.float32)
    w2 = w2.at[:, :C2].set(w2_im2col * s2[None, :])
    w2 = w2.at[C1:2 * C1, C2:].set(res2_w[:, :, 0].T)
    b2 = jnp.concatenate([conv2_b * s2 + t2, res2_b]).reshape(1, 2 * C2)

    # fc1: PyTorch flattens (C2, L) as c*L + l; ship the weight as (l, c, j) so
    # the kernel never has to flatten/relayout the activation.  bf16 halves the
    # HBM->VMEM DMA for the only big tensor in the model.
    wfc1 = fc1_w.reshape(HID, C2, L).transpose(2, 1, 0).astype(jnp.bfloat16)
    bfc1 = fc1_b.reshape(1, HID)
    wfc2 = fc2_w.T                                        # (HID, NOUT)
    bfc2 = fc2_b.reshape(1, NOUT)
    return (w1, b1, w2, b2, wfc1, bfc1, wfc2, bfc2)


@jax.jit
def cnn_pinn_forward(x, params):
    """x: (B, 50, 3) float32 -- the tensor CNNPINN.forward receives (pre-permute)."""
    x = x.astype(jnp.float32)
    # im2col for conv1 (k=3, padding=1): row (l, b) = [x[l-1], x[l], x[l+1]].
    xp = jnp.pad(x, ((0, 0), (1, 1), (0, 0)))                                       # (B, 52, 3)
    cols1 = jnp.concatenate([xp[:, 0:L], xp[:, 1:L + 1], xp[:, 2:L + 2]], axis=-1)  # (B, 50, 9)
    cols1 = jnp.transpose(cols1, (1, 0, 2)).reshape(M_ROWS, 3 * CIN)                # (100, 9)

    (w1, b1, w2, b2, wfc1, bfc1, wfc2, bfc2) = params

    vmem = lambda: pl.BlockSpec(memory_space=pltpu.MemorySpace.VMEM)
    return pl.pallas_call(
        cnn_pinn_kernel,
        out_shape=jax.ShapeDtypeStruct((B, NOUT), jnp.float32),
        in_specs=[
            vmem(),                               # cols1
            vmem(), vmem(),                       # w1, b1
            vmem(), vmem(),                       # w2, b2
            pl.BlockSpec(memory_space=pl.ANY),    # wfc1: stays in HBM, copied manually
            vmem(), vmem(), vmem(),               # bfc1, wfc2, bfc2
        ],
        out_specs=vmem(),
        scratch_shapes=[
            pltpu.VMEM((L, C2, HID), jnp.bfloat16),     # fc1 weight staging
            pltpu.VMEM((M_ROWS, C2), jnp.bfloat16),     # fc1 activation staging
            pltpu.SemaphoreType.DMA,
        ],
    )(cols1, w1, b1, w2, b2, wfc1, bfc1, wfc2, bfc2)


def reference_forward(x, raw):
    """Pure-JAX, PyTorch-faithful eval-mode forward (f32), used only to check
    the kernel.  fc1's weight is rounded through bf16 to match the kernel's
    storage so the comparison isolates kernel/indexing bugs."""
    (conv1_w, conv1_b, bn1_g, bn1_b, bn1_m, bn1_v,
     conv2_w, conv2_b, bn2_g, bn2_b, bn2_m, bn2_v,
     res1_w, res1_b, res2_w, res2_b, fc1_w, fc1_b, fc2_w, fc2_b) = raw

    xc = jnp.transpose(x, (0, 2, 1))                                   # (B, 3, 50)

    def conv1d_same3(inp, w, b):                                       # inp (B,Ci,L), w (Co,Ci,3)
        ip = jnp.pad(inp, ((0, 0), (0, 0), (1, 1)))
        taps = jnp.stack([ip[:, :, k:k + L] for k in range(3)], axis=-1)   # (B,Ci,L,3)
        return jnp.einsum('bilk,oik->bol', taps, w) + b[None, :, None]

    def bn_eval(y, g, bb, m, v):
        inv = 1.0 / jnp.sqrt(v + BN_EPS)
        return (y - m[None, :, None]) * (g * inv)[None, :, None] + bb[None, :, None]

    ident = jnp.einsum('bil,oi->bol', xc, res1_w[:, :, 0]) + res1_b[None, :, None]
    out = jnp.tanh(bn_eval(conv1d_same3(xc, conv1_w, conv1_b),
                           bn1_g, bn1_b, bn1_m, bn1_v)) + ident
    ident = jnp.einsum('bil,oi->bol', out, res2_w[:, :, 0]) + res2_b[None, :, None]
    out = jnp.tanh(bn_eval(conv1d_same3(out, conv2_w, conv2_b),
                           bn2_g, bn2_b, bn2_m, bn2_v)) + ident
    flat = out.reshape(B, -1)                                          # (B, 6400), index c*L + l
    fc1_wq = fc1_w.astype(jnp.bfloat16).astype(jnp.float32)            # match kernel storage
    h = jnp.tanh(flat @ fc1_wq.T + fc1_b)                              # dropout: eval identity
    return h @ fc2_w.T + fc2_b


if __name__ == "__main__":
    key = jax.random.PRNGKey(0)
    kx, kp = jax.random.split(key)
    x = jax.random.normal(kx, (B, L, CIN), dtype=jnp.float32)          # (2, 50, 3)
    raw = make_torch_params(kp)
    params = fuse_params(raw)

    out = cnn_pinn_forward(x, params)
    jax.block_until_ready(out)
    assert out.shape == (B, NOUT) and out.dtype == jnp.float32

    ref = reference_forward(x, raw)
    err = float(jnp.max(jnp.abs(out - ref)))
    assert err < 1e-1, f"kernel/reference mismatch: max abs err {err}"
    print("KERNEL_OK")
</pallas_src>

<mosaic_0001>
module attributes {stable_mosaic.version = 11 : i64} {
  func.func @cnn_pinn_kernel(%arg0: memref<100x9xf32, #tpu.memory_space<vmem>>, %arg1: memref<9x128xf32, #tpu.memory_space<vmem>>, %arg2: memref<1x128xf32, #tpu.memory_space<vmem>>, %arg3: memref<192x256xf32, #tpu.memory_space<vmem>>, %arg4: memref<1x256xf32, #tpu.memory_space<vmem>>, %arg5: memref<50x128x64xbf16, #tpu.memory_space<any>>, %arg6: memref<1x64xf32, #tpu.memory_space<vmem>>, %arg7: memref<64x3xf32, #tpu.memory_space<vmem>>, %arg8: memref<1x3xf32, #tpu.memory_space<vmem>>, %arg9: memref<2x3xf32, #tpu.memory_space<vmem>>, %arg10: memref<50x128x64xbf16, #tpu.memory_space<vmem>>, %arg11: memref<100x128xbf16, #tpu.memory_space<vmem>>, %arg12: memref<!tpu.dma_semaphore, #tpu.memory_space<semaphore_mem>>) attributes {dimension_semantics = [], scalar_prefetch = 0 : i64, scratch_operands = 3 : i64, tpu.core_type = #tpu.core_type<tc>} {
    tpu.enqueue_dma source(%arg5 : memref<50x128x64xbf16, #tpu.memory_space<any>>) target(%arg10 : memref<50x128x64xbf16, #tpu.memory_space<vmem>>) target_semaphore(%arg12 : memref<!tpu.dma_semaphore, #tpu.memory_space<semaphore_mem>>)
    %c0 = arith.constant 0 : index
    %c0_0 = arith.constant 0 : index
    %0 = vector.load %arg0[%c0, %c0_0] : memref<100x9xf32, #tpu.memory_space<vmem>>, vector<100x9xf32>
    %c0_1 = arith.constant 0 : index
    %c0_2 = arith.constant 0 : index
    %1 = vector.load %arg1[%c0_1, %c0_2] : memref<9x128xf32, #tpu.memory_space<vmem>>, vector<9x128xf32>
    %cst = arith.constant dense<0.000000e+00> : vector<100x128xf32>
    %2 = tpu.matmul %0, %1, %cst {dimension_numbers = #tpu.dot_dimension_numbers<[1], [0], [0], [1], [0, 0, 1, 1], [], []>} : vector<100x9xf32>, vector<9x128xf32>, vector<100x128xf32> -> vector<100x128xf32>
    %c0_3 = arith.constant 0 : index
    %c0_4 = arith.constant 0 : index
    %3 = vector.load %arg2[%c0_3, %c0_4] : memref<1x128xf32, #tpu.memory_space<vmem>>, vector<1x128xf32>
    %4 = vector.broadcast %3 : vector<1x128xf32> to vector<100x128xf32>
    %5 = arith.addf %2, %4 : vector<100x128xf32>
    %6 = vector.extract_strided_slice %5 {offsets = [0, 0], sizes = [100, 64], strides = [1, 1]} : vector<100x128xf32> to vector<100x64xf32>
    %7 = math.tanh %6 : vector<100x64xf32>
    %8 = vector.extract_strided_slice %5 {offsets = [0, 64], sizes = [100, 64], strides = [1, 1]} : vector<100x128xf32> to vector<100x64xf32>
    %9 = arith.addf %7, %8 : vector<100x64xf32>
    %10 = tpu.iota {dimensions = array<i32: 0>} : vector<100x100xi32>
    %11 = tpu.iota {dimensions = array<i32: 1>} : vector<100x100xi32>
    %c2_i32 = arith.constant 2 : i32
    %12 = vector.broadcast %c2_i32 : i32 to vector<100x100xi32>
    %13 = arith.subi %10, %12 : vector<100x100xi32>
    %14 = arith.cmpi eq, %11, %13 : vector<100x100xi32>
    %15 = arith.extui %14 : vector<100x100xi1> to vector<100x100xi32>
    %16 = arith.sitofp %15 : vector<100x100xi32> to vector<100x100xf32>
    %c2_i32_5 = arith.constant 2 : i32
    %17 = vector.broadcast %c2_i32_5 : i32 to vector<100x100xi32>
    %18 = arith.addi %10, %17 : vector<100x100xi32>
    %19 = arith.cmpi eq, %11, %18 : vector<100x100xi32>
    %20 = arith.extui %19 : vector<100x100xi1> to vector<100x100xi32>
    %21 = arith.sitofp %20 : vector<100x100xi32> to vector<100x100xf32>
    %cst_6 = arith.constant dense<0.000000e+00> : vector<100x64xf32>
    %22 = tpu.matmul %16, %9, %cst_6 {dimension_numbers = #tpu.dot_dimension_numbers<[1], [0], [0], [1], [0, 0, 1, 1], [], []>} : vector<100x100xf32>, vector<100x64xf32>, vector<100x64xf32> -> vector<100x64xf32>
    %cst_7 = arith.constant dense<0.000000e+00> : vector<100x64xf32>
    %23 = tpu.matmul %21, %9, %cst_7 {dimension_numbers = #tpu.dot_dimension_numbers<[1], [0], [0], [1], [0, 0, 1, 1], [], []>} : vector<100x100xf32>, vector<100x64xf32>, vector<100x64xf32> -> vector<100x64xf32>
    %c0_8 = arith.constant 0 : index
    %c0_9 = arith.constant 0 : index
    %24 = vector.load %arg3[%c0_8, %c0_9] : memref<192x256xf32, #tpu.memory_space<vmem>>, vector<64x256xf32>
    %cst_10 = arith.constant dense<0.000000e+00> : vector<100x256xf32>
    %25 = tpu.matmul %22, %24, %cst_10 {dimension_numbers = #tpu.dot_dimension_numbers<[1], [0], [0], [1], [0, 0, 1, 1], [], []>} : vector<100x64xf32>, vector<64x256xf32>, vector<100x256xf32> -> vector<100x256xf32>
    %c64 = arith.constant 64 : index
    %c0_11 = arith.constant 0 : index
    %26 = vector.load %arg3[%c64, %c0_11] : memref<192x256xf32, #tpu.memory_space<vmem>>, vector<64x256xf32>
    %cst_12 = arith.constant dense<0.000000e+00> : vector<100x256xf32>
    %27 = tpu.matmul %9, %26, %cst_12 {dimension_numbers = #tpu.dot_dimension_numbers<[1], [0], [0], [1], [0, 0, 1, 1], [], []>} : vector<100x64xf32>, vector<64x256xf32>, vector<100x256xf32> -> vector<100x256xf32>
    %28 = arith.addf %25, %27 : vector<100x256xf32>
    %c128 = arith.constant 128 : index
    %c0_13 = arith.constant 0 : index
    %29 = vector.load %arg3[%c128, %c0_13] : memref<192x256xf32, #tpu.memory_space<vmem>>, vector<64x256xf32>
    %cst_14 = arith.constant dense<0.000000e+00> : vector<100x256xf32>
    %30 = tpu.matmul %23, %29, %cst_14 {dimension_numbers = #tpu.dot_dimension_numbers<[1], [0], [0], [1], [0, 0, 1, 1], [], []>} : vector<100x64xf32>, vector<64x256xf32>, vector<100x256xf32> -> vector<100x256xf32>
    %31 = arith.addf %28, %30 : vector<100x256xf32>
    %c0_15 = arith.constant 0 : index
    %c0_16 = arith.constant 0 : index
    %32 = vector.load %arg4[%c0_15, %c0_16] : memref<1x256xf32, #tpu.memory_space<vmem>>, vector<1x256xf32>
    %33 = vector.broadcast %32 : vector<1x256xf32> to vector<100x256xf32>
    %34 = arith.addf %31, %33 : vector<100x256xf32>
    %35 = vector.extract_strided_slice %34 {offsets = [0, 0], sizes = [100, 128], strides = [1, 1]} : vector<100x256xf32> to vector<100x128xf32>
    %36 = math.tanh %35 : vector<100x128xf32>
    %37 = vector.extract_strided_slice %34 {offsets = [0, 128], sizes = [100, 128], strides = [1, 1]} : vector<100x256xf32> to vector<100x128xf32>
    %38 = arith.addf %36, %37 : vector<100x128xf32>
    %39 = arith.truncf %38 : vector<100x128xf32> to vector<100x128xbf16>
    %c0_17 = arith.constant 0 : index
    %c0_18 = arith.constant 0 : index
    %40 = vector.load %arg11[%c0_17, %c0_18] : memref<100x128xbf16, #tpu.memory_space<vmem>>, vector<100x128xbf16>
    tpu.vector_store %arg11[%c0_17, %c0_18], %39 {strides = array<i32>} : memref<100x128xbf16, #tpu.memory_space<vmem>>, vector<100x128xbf16>,
    tpu.wait_dma2 semaphore(%arg12 : memref<!tpu.dma_semaphore, #tpu.memory_space<semaphore_mem>>) src(%arg5 : memref<50x128x64xbf16, #tpu.memory_space<any>>) dst(%arg10 : memref<50x128x64xbf16, #tpu.memory_space<vmem>>)
    %cst_19 = arith.constant 0.000000e+00 : f32
    %41 = vector.broadcast %cst_19 : f32 to vector<2x64xf32>
    %c0_20 = arith.constant 0 : index
    %c0_21 = arith.constant 0 : index
    %42 = vector.load %arg11[%c0_20, %c0_21] : memref<100x128xbf16, #tpu.memory_space<vmem>>, vector<2x128xbf16>
    %c0_22 = arith.constant 0 : index
    %c0_23 = arith.constant 0 : index
    %c0_24 = arith.constant 0 : index
    %43 = vector.load %arg10[%c0_22, %c0_23, %c0_24] : memref<50x128x64xbf16, #tpu.memory_space<vmem>>, vector<1x128x64xbf16>
    %44 = vector.shape_cast %43 : vector<1x128x64xbf16> to vector<128x64xbf16>
    %cst_25 = arith.constant dense<0.000000e+00> : vector<2x64xf32>
    %45 = tpu.matmul %42, %44, %cst_25 {dimension_numbers = #tpu.dot_dimension_numbers<[1], [0], [0], [1], [0, 0, 1, 1], [], []>} : vector<2x128xbf16>, vector<128x64xbf16>, vector<2x64xf32> -> vector<2x64xf32>
    %46 = arith.addf %41, %45 : vector<2x64xf32>
    %c2 = arith.constant 2 : index
    %c0_26 = arith.constant 0 : index
    %47 = vector.load %arg11[%c2, %c0_26] : memref<100x128xbf16, #tpu.memory_space<vmem>>, vector<2x128xbf16>
    %c1 = arith.constant 1 : index
    %c0_27 = arith.constant 0 : index
    %c0_28 = arith.constant 0 : index
    %48 = vector.load %arg10[%c1, %c0_27, %c0_28] : memref<50x128x64xbf16, #tpu.memory_space<vmem>>, vector<1x128x64xbf16>
    %49 = vector.shape_cast %48 : vector<1x128x64xbf16> to vector<128x64xbf16>
    %cst_29 = arith.constant dense<0.000000e+00> : vector<2x64xf32>
    %50 = tpu.matmul %47, %49, %cst_29 {dimension_numbers = #tpu.dot_dimension_numbers<[1], [0], [0], [1], [0, 0, 1, 1], [], []>} : vector<2x128xbf16>, vector<128x64xbf16>, vector<2x64xf32> -> vector<2x64xf32>
    %51 = arith.addf %46, %50 : vector<2x64xf32>
    %c4 = arith.constant 4 : index
    %c0_30 = arith.constant 0 : index
    %52 = vector.load %arg11[%c4, %c0_30] : memref<100x128xbf16, #tpu.memory_space<vmem>>, vector<2x128xbf16>
    %c2_31 = arith.constant 2 : index
    %c0_32 = arith.constant 0 : index
    %c0_33 = arith.constant 0 : index
    %53 = vector.load %arg10[%c2_31, %c0_32, %c0_33] : memref<50x128x64xbf16, #tpu.memory_space<vmem>>, vector<1x128x64xbf16>
    %54 = vector.shape_cast %53 : vector<1x128x64xbf16> to vector<128x64xbf16>
    %cst_34 = arith.constant dense<0.000000e+00> : vector<2x64xf32>
    %55 = tpu.matmul %52, %54, %cst_34 {dimension_numbers = #tpu.dot_dimension_numbers<[1], [0], [0], [1], [0, 0, 1, 1], [], []>} : vector<2x128xbf16>, vector<128x64xbf16>, vector<2x64xf32> -> vector<2x64xf32>
    %56 = arith.addf %51, %55 : vector<2x64xf32>
    %c6 = arith.constant 6 : index
    %c0_35 = arith.constant 0 : index
    %57 = vector.load %arg11[%c6, %c0_35] : memref<100x128xbf16, #tpu.memory_space<vmem>>, vector<2x128xbf16>
    %c3 = arith.constant 3 : index
    %c0_36 = arith.constant 0 : index
    %c0_37 = arith.constant 0 : index
    %58 = vector.load %arg10[%c3, %c0_36, %c0_37] : memref<50x128x64xbf16, #tpu.memory_space<vmem>>, vector<1x128x64xbf16>
    %59 = vector.shape_cast %58 : vector<1x128x64xbf16> to vector<128x64xbf16>
    %cst_38 = arith.constant dense<0.000000e+00> : vector<2x64xf32>
    %60 = tpu.matmul %57, %59, %cst_38 {dimension_numbers = #tpu.dot_dimension_numbers<[1], [0], [0], [1], [0, 0, 1, 1], [], []>} : vector<2x128xbf16>, vector<128x64xbf16>, vector<2x64xf32> -> vector<2x64xf32>
    %61 = arith.addf %56, %60 : vector<2x64xf32>
    %c8 = arith.constant 8 : index
    %c0_39 = arith.constant 0 : index
    %62 = vector.load %arg11[%c8, %c0_39] : memref<100x128xbf16, #tpu.memory_space<vmem>>, vector<2x128xbf16>
    %c4_40 = arith.constant 4 : index
    %c0_41 = arith.constant 0 : index
    %c0_42 = arith.constant 0 : index
    %63 = vector.load %arg10[%c4_40, %c0_41, %c0_42] : memref<50x128x64xbf16, #tpu.memory_space<vmem>>, vector<1x128x64xbf16>
    %64 = vector.shape_cast %63 : vector<1x128x64xbf16> to vector<128x64xbf16>
    %cst_43 = arith.constant dense<0.000000e+00> : vector<2x64xf32>
    %65 = tpu.matmul %62, %64, %cst_43 {dimension_numbers = #tpu.dot_dimension_numbers<[1], [0], [0], [1], [0, 0, 1, 1], [], []>} : vector<2x128xbf16>, vector<128x64xbf16>, vector<2x64xf32> -> vector<2x64xf32>
    %66 = arith.addf %61, %65 : vector<2x64xf32>
    %c10 = arith.constant 10 : index
    %c0_44 = arith.constant 0 : index
    %67 = vector.load %arg11[%c10, %c0_44] : memref<100x128xbf16, #tpu.memory_space<vmem>>, vector<2x128xbf16>
    %c5 = arith.constant 5 : index
    %c0_45 = arith.constant 0 : index
    %c0_46 = arith.constant 0 : index
    %68 = vector.load %arg10[%c5, %c0_45, %c0_46] : memref<50x128x64xbf16, #tpu.memory_space<vmem>>, vector<1x128x64xbf16>
    %69 = vector.shape_cast %68 : vector<1x128x64xbf16> to vector<128x64xbf16>
    %cst_47 = arith.constant dense<0.000000e+00> : vector<2x64xf32>
    %70 = tpu.matmul %67, %69, %cst_47 {dimension_numbers = #tpu.dot_dimension_numbers<[1], [0], [0], [1], [0, 0, 1, 1], [], []>} : vector<2x128xbf16>, vector<128x64xbf16>, vector<2x64xf32> -> vector<2x64xf32>
    %71 = arith.addf %66, %70 : vector<2x64xf32>
    %c12 = arith.constant 12 : index
    %c0_48 = arith.constant 0 : index
    %72 = vector.load %arg11[%c12, %c0_48] : memref<100x128xbf16, #tpu.memory_space<vmem>>, vector<2x128xbf16>
    %c6_49 = arith.constant 6 : index
    %c0_50 = arith.constant 0 : index
    %c0_51 = arith.constant 0 : index
    %73 = vector.load %arg10[%c6_49, %c0_50, %c0_51] : memref<50x128x64xbf16, #tpu.memory_space<vmem>>, vector<1x128x64xbf16>
    %74 = vector.shape_cast %73 : vector<1x128x64xbf16> to vector<128x64xbf16>
    %cst_52 = arith.constant dense<0.000000e+00> : vector<2x64xf32>
    %75 = tpu.matmul %72, %74, %cst_52 {dimension_numbers = #tpu.dot_dimension_numbers<[1], [0], [0], [1], [0, 0, 1, 1], [], []>} : vector<2x128xbf16>, vector<128x64xbf16>, vector<2x64xf32> -> vector<2x64xf32>
    %76 = arith.addf %71, %75 : vector<2x64xf32>
    %c14 = arith.constant 14 : index
    %c0_53 = arith.constant 0 : index
    %77 = vector.load %arg11[%c14, %c0_53] : memref<100x128xbf16, #tpu.memory_space<vmem>>, vector<2x128xbf16>
    %c7 = arith.constant 7 : index
    %c0_54 = arith.constant 0 : index
    %c0_55 = arith.constant 0 : index
    %78 = vector.load %arg10[%c7, %c0_54, %c0_55] : memref<50x128x64xbf16, #tpu.memory_space<vmem>>, vector<1x128x64xbf16>
    %79 = vector.shape_cast %78 : vector<1x128x64xbf16> to vector<128x64xbf16>
    %cst_56 = arith.constant dense<0.000000e+00> : vector<2x64xf32>
    %80 = tpu.matmul %77, %79, %cst_56 {dimension_numbers = #tpu.dot_dimension_numbers<[1], [0], [0], [1], [0, 0, 1, 1], [], []>} : vector<2x128xbf16>, vector<128x64xbf16>, vector<2x64xf32> -> vector<2x64xf32>
    %81 = arith.addf %76, %80 : vector<2x64xf32>
    %c16 = arith.constant 16 : index
    %c0_57 = arith.constant 0 : index
    %82 = vector.load %arg11[%c16, %c0_57] : memref<100x128xbf16, #tpu.memory_space<vmem>>, vector<2x128xbf16>
    %c8_58 = arith.constant 8 : index
    %c0_59 = arith.constant 0 : index
    %c0_60 = arith.constant 0 : index
    %83 = vector.load %arg10[%c8_58, %c0_59, %c0_60] : memref<50x128x64xbf16, #tpu.memory_space<vmem>>, vector<1x128x64xbf16>
    %84 = vector.shape_cast %83 : vector<1x128x64xbf16> to vector<128x64xbf16>
    %cst_61 = arith.constant dense<0.000000e+00> : vector<2x64xf32>
    %85 = tpu.matmul %82, %84, %cst_61 {dimension_numbers = #tpu.dot_dimension_numbers<[1], [0], [0], [1], [0, 0, 1, 1], [], []>} : vector<2x128xbf16>, vector<128x64xbf16>, vector<2x64xf32> -> vector<2x64xf32>
    %86 = arith.addf %81, %85 : vector<2x64xf32>
    %c18 = arith.constant 18 : index
    %c0_62 = arith.constant 0 : index
    %87 = vector.load %arg11[%c18, %c0_62] : memref<100x128xbf16, #tpu.memory_space<vmem>>, vector<2x128xbf16>
    %c9 = arith.constant 9 : index
    %c0_63 = arith.constant 0 : index
    %c0_64 = arith.constant 0 : index
    %88 = vector.load %arg10[%c9, %c0_63, %c0_64] : memref<50x128x64xbf16, #tpu.memory_space<vmem>>, vector<1x128x64xbf16>
    %89 = vector.shape_cast %88 : vector<1x128x64xbf16> to vector<128x64xbf16>
    %cst_65 = arith.constant dense<0.000000e+00> : vector<2x64xf32>
    %90 = tpu.matmul %87, %89, %cst_65 {dimension_numbers = #tpu.dot_dimension_numbers<[1], [0], [0], [1], [0, 0, 1, 1], [], []>} : vector<2x128xbf16>, vector<128x64xbf16>, vector<2x64xf32> -> vector<2x64xf32>
    %91 = arith.addf %86, %90 : vector<2x64xf32>
    %c20 = arith.constant 20 : index
    %c0_66 = arith.constant 0 : index
    %92 = vector.load %arg11[%c20, %c0_66] : memref<100x128xbf16, #tpu.memory_space<vmem>>, vector<2x128xbf16>
    %c10_67 = arith.constant 10 : index
    %c0_68 = arith.constant 0 : index
    %c0_69 = arith.constant 0 : index
    %93 = vector.load %arg10[%c10_67, %c0_68, %c0_69] : memref<50x128x64xbf16, #tpu.memory_space<vmem>>, vector<1x128x64xbf16>
    %94 = vector.shape_cast %93 : vector<1x128x64xbf16> to vector<128x64xbf16>
    %cst_70 = arith.constant dense<0.000000e+00> : vector<2x64xf32>
    %95 = tpu.matmul %92, %94, %cst_70 {dimension_numbers = #tpu.dot_dimension_numbers<[1], [0], [0], [1], [0, 0, 1, 1], [], []>} : vector<2x128xbf16>, vector<128x64xbf16>, vector<2x64xf32> -> vector<2x64xf32>
    %96 = arith.addf %91, %95 : vector<2x64xf32>
    %c22 = arith.constant 22 : index
    %c0_71 = arith.constant 0 : index
    %97 = vector.load %arg11[%c22, %c0_71] : memref<100x128xbf16, #tpu.memory_space<vmem>>, vector<2x128xbf16>
    %c11 = arith.constant 11 : index
    %c0_72 = arith.constant 0 : index
    %c0_73 = arith.constant 0 : index
    %98 = vector.load %arg10[%c11, %c0_72, %c0_73] : memref<50x128x64xbf16, #tpu.memory_space<vmem>>, vector<1x128x64xbf16>
    %99 = vector.shape_cast %98 : vector<1x128x64xbf16> to vector<128x64xbf16>
    %cst_74 = arith.constant dense<0.000000e+00> : vector<2x64xf32>
    %100 = tpu.matmul %97, %99, %cst_74 {dimension_numbers = #tpu.dot_dimension_numbers<[1], [0], [0], [1], [0, 0, 1, 1], [], []>} : vector<2x128xbf16>, vector<128x64xbf16>, vector<2x64xf32> -> vector<2x64xf32>
    %101 = arith.addf %96, %100 : vector<2x64xf32>
    %c24 = arith.constant 24 : index
    %c0_75 = arith.constant 0 : index
    %102 = vector.load %arg11[%c24, %c0_75] : memref<100x128xbf16, #tpu.memory_space<vmem>>, vector<2x128xbf16>
    %c12_76 = arith.constant 12 : index
    %c0_77 = arith.constant 0 : index
    %c0_78 = arith.constant 0 : index
    %103 = vector.load %arg10[%c12_76, %c0_77, %c0_78] : memref<50x128x64xbf16, #tpu.memory_space<vmem>>, vector<1x128x64xbf16>
    %104 = vector.shape_cast %103 : vector<1x128x64xbf16> to vector<128x64xbf16>
    %cst_79 = arith.constant dense<0.000000e+00> : vector<2x64xf32>
    %105 = tpu.matmul %102, %104, %cst_79 {dimension_numbers = #tpu.dot_dimension_numbers<[1], [0], [0], [1], [0, 0, 1, 1], [], []>} : vector<2x128xbf16>, vector<128x64xbf16>, vector<2x64xf32> -> vector<2x64xf32>
    %106 = arith.addf %101, %105 : vector<2x64xf32>
    %c26 = arith.constant 26 : index
    %c0_80 = arith.constant 0 : index
    %107 = vector.load %arg11[%c26, %c0_80] : memref<100x128xbf16, #tpu.memory_space<vmem>>, vector<2x128xbf16>
    %c13 = arith.constant 13 : index
    %c0_81 = arith.constant 0 : index
    %c0_82 = arith.constant 0 : index
    %108 = vector.load %arg10[%c13, %c0_81, %c0_82] : memref<50x128x64xbf16, #tpu.memory_space<vmem>>, vector<1x128x64xbf16>
    %109 = vector.shape_cast %108 : vector<1x128x64xbf16> to vector<128x64xbf16>
    %cst_83 = arith.constant dense<0.000000e+00> : vector<2x64xf32>
    %110 = tpu.matmul %107, %109, %cst_83 {dimension_numbers = #tpu.dot_dimension_numbers<[1], [0], [0], [1], [0, 0, 1, 1], [], []>} : vector<2x128xbf16>, vector<128x64xbf16>, vector<2x64xf32> -> vector<2x64xf32>
    %111 = arith.addf %106, %110 : vector<2x64xf32>
    %c28 = arith.constant 28 : index
    %c0_84 = arith.constant 0 : index
    %112 = vector.load %arg11[%c28, %c0_84] : memref<100x128xbf16, #tpu.memory_space<vmem>>, vector<2x128xbf16>
    %c14_85 = arith.constant 14 : index
    %c0_86 = arith.constant 0 : index
    %c0_87 = arith.constant 0 : index
    %113 = vector.load %arg10[%c14_85, %c0_86, %c0_87] : memref<50x128x64xbf16, #tpu.memory_space<vmem>>, vector<1x128x64xbf16>
    %114 = vector.shape_cast %113 : vector<1x128x64xbf16> to vector<128x64xbf16>
    %cst_88 = arith.constant dense<0.000000e+00> : vector<2x64xf32>
    %115 = tpu.matmul %112, %114, %cst_88 {dimension_numbers = #tpu.dot_dimension_numbers<[1], [0], [0], [1], [0, 0, 1, 1], [], []>} : vector<2x128xbf16>, vector<128x64xbf16>, vector<2x64xf32> -> vector<2x64xf32>
    %116 = arith.addf %111, %115 : vector<2x64xf32>
    %c30 = arith.constant 30 : index
    %c0_89 = arith.constant 0 : index
    %117 = vector.load %arg11[%c30, %c0_89] : memref<100x128xbf16, #tpu.memory_space<vmem>>, vector<2x128xbf16>
    %c15 = arith.constant 15 : index
    %c0_90 = arith.constant 0 : index
    %c0_91 = arith.constant 0 : index
    %118 = vector.load %arg10[%c15, %c0_90, %c0_91] : memref<50x128x64xbf16, #tpu.memory_space<vmem>>, vector<1x128x64xbf16>
    %119 = vector.shape_cast %118 : vector<1x128x64xbf16> to vector<128x64xbf16>
    %cst_92 = arith.constant dense<0.000000e+00> : vector<2x64xf32>
    %120 = tpu.matmul %117, %119, %cst_92 {dimension_numbers = #tpu.dot_dimension_numbers<[1], [0], [0], [1], [0, 0, 1, 1], [], []>} : vector<2x128xbf16>, vector<128x64xbf16>, vector<2x64xf32> -> vector<2x64xf32>
    %121 = arith.addf %116, %120 : vector<2x64xf32>
    %c32 = arith.constant 32 : index
    %c0_93 = arith.constant 0 : index
    %122 = vector.load %arg11[%c32, %c0_93] : memref<100x128xbf16, #tpu.memory_space<vmem>>, vector<2x128xbf16>
    %c16_94 = arith.constant 16 : index
    %c0_95 = arith.constant 0 : index
    %c0_96 = arith.constant 0 : index
    %123 = vector.load %arg10[%c16_94, %c0_95, %c0_96] : memref<50x128x64xbf16, #tpu.memory_space<vmem>>, vector<1x128x64xbf16>
    %124 = vector.shape_cast %123 : vector<1x128x64xbf16> to vector<128x64xbf16>
    %cst_97 = arith.constant dense<0.000000e+00> : vector<2x64xf32>
    %125 = tpu.matmul %122, %124, %cst_97 {dimension_numbers = #tpu.dot_dimension_numbers<[1], [0], [0], [1], [0, 0, 1, 1], [], []>} : vector<2x128xbf16>, vector<128x64xbf16>, vector<2x64xf32> -> vector<2x64xf32>
    %126 = arith.addf %121, %125 : vector<2x64xf32>
    %c34 = arith.constant 34 : index
    %c0_98 = arith.constant 0 : index
    %127 = vector.load %arg11[%c34, %c0_98] : memref<100x128xbf16, #tpu.memory_space<vmem>>, vector<2x128xbf16>
    %c17 = arith.constant 17 : index
    %c0_99 = arith.constant 0 : index
    %c0_100 = arith.constant 0 : index
    %128 = vector.load %arg10[%c17, %c0_99, %c0_100] : memref<50x128x64xbf16, #tpu.memory_space<vmem>>, vector<1x128x64xbf16>
    %129 = vector.shape_cast %128 : vector<1x128x64xbf16> to vector<128x64xbf16>
    %cst_101 = arith.constant dense<0.000000e+00> : vector<2x64xf32>
    %130 = tpu.matmul %127, %129, %cst_101 {dimension_numbers = #tpu.dot_dimension_numbers<[1], [0], [0], [1], [0, 0, 1, 1], [], []>} : vector<2x128xbf16>, vector<128x64xbf16>, vector<2x64xf32> -> vector<2x64xf32>
    %131 = arith.addf %126, %130 : vector<2x64xf32>
    %c36 = arith.constant 36 : index
    %c0_102 = arith.constant 0 : index
    %132 = vector.load %arg11[%c36, %c0_102] : memref<100x128xbf16, #tpu.memory_space<vmem>>, vector<2x128xbf16>
    %c18_103 = arith.constant 18 : index
    %c0_104 = arith.constant 0 : index
    %c0_105 = arith.constant 0 : index
    %133 = vector.load %arg10[%c18_103, %c0_104, %c0_105] : memref<50x128x64xbf16, #tpu.memory_space<vmem>>, vector<1x128x64xbf16>
    %134 = vector.shape_cast %133 : vector<1x128x64xbf16> to vector<128x64xbf16>
    %cst_106 = arith.constant dense<0.000000e+00> : vector<2x64xf32>
    %135 = tpu.matmul %132, %134, %cst_106 {dimension_numbers = #tpu.dot_dimension_numbers<[1], [0], [0], [1], [0, 0, 1, 1], [], []>} : vector<2x128xbf16>, vector<128x64xbf16>, vector<2x64xf32> -> vector<2x64xf32>
    %136 = arith.addf %131, %135 : vector<2x64xf32>
    %c38 = arith.constant 38 : index
    %c0_107 = arith.constant 0 : index
    %137 = vector.load %arg11[%c38, %c0_107] : memref<100x128xbf16, #tpu.memory_space<vmem>>, vector<2x128xbf16>
    %c19 = arith.constant 19 : index
    %c0_108 = arith.constant 0 : index
    %c0_109 = arith.constant 0 : index
    %138 = vector.load %arg10[%c19, %c0_108, %c0_109] : memref<50x128x64xbf16, #tpu.memory_space<vmem>>, vector<1x128x64xbf16>
    %139 = vector.shape_cast %138 : vector<1x128x64xbf16> to vector<128x64xbf16>
    %cst_110 = arith.constant dense<0.000000e+00> : vector<2x64xf32>
    %140 = tpu.matmul %137, %139, %cst_110 {dimension_numbers = #tpu.dot_dimension_numbers<[1], [0], [0], [1], [0, 0, 1, 1], [], []>} : vector<2x128xbf16>, vector<128x64xbf16>, vector<2x64xf32> -> vector<2x64xf32>
    %141 = arith.addf %136, %140 : vector<2x64xf32>
    %c40 = arith.constant 40 : index
    %c0_111 = arith.constant 0 : index
    %142 = vector.load %arg11[%c40, %c0_111] : memref<100x128xbf16, #tpu.memory_space<vmem>>, vector<2x128xbf16>
    %c20_112 = arith.constant 20 : index
    %c0_113 = arith.constant 0 : index
    %c0_114 = arith.constant 0 : index
    %143 = vector.load %arg10[%c20_112, %c0_113, %c0_114] : memref<50x128x64xbf16, #tpu.memory_space<vmem>>, vector<1x128x64xbf16>
    %144 = vector.shape_cast %143 : vector<1x128x64xbf16> to vector<128x64xbf16>
    %cst_115 = arith.constant dense<0.000000e+00> : vector<2x64xf32>
    %145 = tpu.matmul %142, %144, %cst_115 {dimension_numbers = #tpu.dot_dimension_numbers<[1], [0], [0], [1], [0, 0, 1, 1], [], []>} : vector<2x128xbf16>, vector<128x64xbf16>, vector<2x64xf32> -> vector<2x64xf32>
    %146 = arith.addf %141, %145 : vector<2x64xf32>
    %c42 = arith.constant 42 : index
    %c0_116 = arith.constant 0 : index
    %147 = vector.load %arg11[%c42, %c0_116] : memref<100x128xbf16, #tpu.memory_space<vmem>>, vector<2x128xbf16>
    %c21 = arith.constant 21 : index
    %c0_117 = arith.constant 0 : index
    %c0_118 = arith.constant 0 : index
    %148 = vector.load %arg10[%c21, %c0_117, %c0_118] : memref<50x128x64xbf16, #tpu.memory_space<vmem>>, vector<1x128x64xbf16>
    %149 = vector.shape_cast %148 : vector<1x128x64xbf16> to vector<128x64xbf16>
    %cst_119 = arith.constant dense<0.000000e+00> : vector<2x64xf32>
    %150 = tpu.matmul %147, %149, %cst_119 {dimension_numbers = #tpu.dot_dimension_numbers<[1], [0], [0], [1], [0, 0, 1, 1], [], []>} : vector<2x128xbf16>, vector<128x64xbf16>, vector<2x64xf32> -> vector<2x64xf32>
    %151 = arith.addf %146, %150 : vector<2x64xf32>
    %c44 = arith.constant 44 : index
    %c0_120 = arith.constant 0 : index
    %152 = vector.load %arg11[%c44, %c0_120] : memref<100x128xbf16, #tpu.memory_space<vmem>>, vector<2x128xbf16>
    %c22_121 = arith.constant 22 : index
    %c0_122 = arith.constant 0 : index
    %c0_123 = arith.constant 0 : index
    %153 = vector.load %arg10[%c22_121, %c0_122, %c0_123] : memref<50x128x64xbf16, #tpu.memory_space<vmem>>, vector<1x128x64xbf16>
    %154 = vector.shape_cast %153 : vector<1x128x64xbf16> to vector<128x64xbf16>
    %cst_124 = arith.constant dense<0.000000e+00> : vector<2x64xf32>
    %155 = tpu.matmul %152, %154, %cst_124 {dimension_numbers = #tpu.dot_dimension_numbers<[1], [0], [0], [1], [0, 0, 1, 1], [], []>} : vector<2x128xbf16>, vector<128x64xbf16>, vector<2x64xf32> -> vector<2x64xf32>
    %156 = arith.addf %151, %155 : vector<2x64xf32>
    %c46 = arith.constant 46 : index
    %c0_125 = arith.constant 0 : index
    %157 = vector.load %arg11[%c46, %c0_125] : memref<100x128xbf16, #tpu.memory_space<vmem>>, vector<2x128xbf16>
    %c23 = arith.constant 23 : index
    %c0_126 = arith.constant 0 : index
    %c0_127 = arith.constant 0 : index
    %158 = vector.load %arg10[%c23, %c0_126, %c0_127] : memref<50x128x64xbf16, #tpu.memory_space<vmem>>, vector<1x128x64xbf16>
    %159 = vector.shape_cast %158 : vector<1x128x64xbf16> to vector<128x64xbf16>
    %cst_128 = arith.constant dense<0.000000e+00> : vector<2x64xf32>
    %160 = tpu.matmul %157, %159, %cst_128 {dimension_numbers = #tpu.dot_dimension_numbers<[1], [0], [0], [1], [0, 0, 1, 1], [], []>} : vector<2x128xbf16>, vector<128x64xbf16>, vector<2x64xf32> -> vector<2x64xf32>
    %161 = arith.addf %156, %160 : vector<2x64xf32>
    %c48 = arith.constant 48 : index
    %c0_129 = arith.constant 0 : index
    %162 = vector.load %arg11[%c48, %c0_129] : memref<100x128xbf16, #tpu.memory_space<vmem>>, vector<2x128xbf16>
    %c24_130 = arith.constant 24 : index
    %c0_131 = arith.constant 0 : index
    %c0_132 = arith.constant 0 : index
    %163 = vector.load %arg10[%c24_130, %c0_131, %c0_132] : memref<50x128x64xbf16, #tpu.memory_space<vmem>>, vector<1x128x64xbf16>
    %164 = vector.shape_cast %163 : vector<1x128x64xbf16> to vector<128x64xbf16>
    %cst_133 = arith.constant dense<0.000000e+00> : vector<2x64xf32>
    %165 = tpu.matmul %162, %164, %cst_133 {dimension_numbers = #tpu.dot_dimension_numbers<[1], [0], [0], [1], [0, 0, 1, 1], [], []>} : vector<2x128xbf16>, vector<128x64xbf16>, vector<2x64xf32> -> vector<2x64xf32>
    %166 = arith.addf %161, %165 : vector<2x64xf32>
    %c50 = arith.constant 50 : index
    %c0_134 = arith.constant 0 : index
    %167 = vector.load %arg11[%c50, %c0_134] : memref<100x128xbf16, #tpu.memory_space<vmem>>, vector<2x128xbf16>
    %c25 = arith.constant 25 : index
    %c0_135 = arith.constant 0 : index
    %c0_136 = arith.constant 0 : index
    %168 = vector.load %arg10[%c25, %c0_135, %c0_136] : memref<50x128x64xbf16, #tpu.memory_space<vmem>>, vector<1x128x64xbf16>
    %169 = vector.shape_cast %168 : vector<1x128x64xbf16> to vector<128x64xbf16>
    %cst_137 = arith.constant dense<0.000000e+00> : vector<2x64xf32>
    %170 = tpu.matmul %167, %169, %cst_137 {dimension_numbers = #tpu.dot_dimension_numbers<[1], [0], [0], [1], [0, 0, 1, 1], [], []>} : vector<2x128xbf16>, vector<128x64xbf16>, vector<2x64xf32> -> vector<2x64xf32>
    %171 = arith.addf %166, %170 : vector<2x64xf32>
    %c52 = arith.constant 52 : index
    %c0_138 = arith.constant 0 : index
    %172 = vector.load %arg11[%c52, %c0_138] : memref<100x128xbf16, #tpu.memory_space<vmem>>, vector<2x128xbf16>
    %c26_139 = arith.constant 26 : index
    %c0_140 = arith.constant 0 : index
    %c0_141 = arith.constant 0 : index
    %173 = vector.load %arg10[%c26_139, %c0_140, %c0_141] : memref<50x128x64xbf16, #tpu.memory_space<vmem>>, vector<1x128x64xbf16>
    %174 = vector.shape_cast %173 : vector<1x128x64xbf16> to vector<128x64xbf16>
    %cst_142 = arith.constant dense<0.000000e+00> : vector<2x64xf32>
    %175 = tpu.matmul %172, %174, %cst_142 {dimension_numbers = #tpu.dot_dimension_numbers<[1], [0], [0], [1], [0, 0, 1, 1], [], []>} : vector<2x128xbf16>, vector<128x64xbf16>, vector<2x64xf32> -> vector<2x64xf32>
    %176 = arith.addf %171, %175 : vector<2x64xf32>
    %c54 = arith.constant 54 : index
    %c0_143 = arith.constant 0 : index
    %177 = vector.load %arg11[%c54, %c0_143] : memref<100x128xbf16, #tpu.memory_space<vmem>>, vector<2x128xbf16>
    %c27 = arith.constant 27 : index
    %c0_144 = arith.constant 0 : index
    %c0_145 = arith.constant 0 : index
    %178 = vector.load %arg10[%c27, %c0_144, %c0_145] : memref<50x128x64xbf16, #tpu.memory_space<vmem>>, vector<1x128x64xbf16>
    %179 = vector.shape_cast %178 : vector<1x128x64xbf16> to vector<128x64xbf16>
    %cst_146 = arith.constant dense<0.000000e+00> : vector<2x64xf32>
    %180 = tpu.matmul %177, %179, %cst_146 {dimension_numbers = #tpu.dot_dimension_numbers<[1], [0], [0], [1], [0, 0, 1, 1], [], []>} : vector<2x128xbf16>, vector<128x64xbf16>, vector<2x64xf32> -> vector<2x64xf32>
    %181 = arith.addf %176, %180 : vector<2x64xf32>
    %c56 = arith.constant 56 : index
    %c0_147 = arith.constant 0 : index
    %182 = vector.load %arg11[%c56, %c0_147] : memref<100x128xbf16, #tpu.memory_space<vmem>>, vector<2x128xbf16>
    %c28_148 = arith.constant 28 : index
    %c0_149 = arith.constant 0 : index
    %c0_150 = arith.constant 0 : index
    %183 = vector.load %arg10[%c28_148, %c0_149, %c0_150] : memref<50x128x64xbf16, #tpu.memory_space<vmem>>, vector<1x128x64xbf16>
    %184 = vector.shape_cast %183 : vector<1x128x64xbf16> to vector<128x64xbf16>
    %cst_151 = arith.constant dense<0.000000e+00> : vector<2x64xf32>
    %185 = tpu.matmul %182, %184, %cst_151 {dimension_numbers = #tpu.dot_dimension_numbers<[1], [0], [0], [1], [0, 0, 1, 1], [], []>} : vector<2x128xbf16>, vector<128x64xbf16>, vector<2x64xf32> -> vector<2x64xf32>
    %186 = arith.addf %181, %185 : vector<2x64xf32>
    %c58 = arith.constant 58 : index
    %c0_152 = arith.constant 0 : index
    %187 = vector.load %arg11[%c58, %c0_152] : memref<100x128xbf16, #tpu.memory_space<vmem>>, vector<2x128xbf16>
    %c29 = arith.constant 29 : index
    %c0_153 = arith.constant 0 : index
    %c0_154 = arith.constant 0 : index
    %188 = vector.load %arg10[%c29, %c0_153, %c0_154] : memref<50x128x64xbf16, #tpu.memory_space<vmem>>, vector<1x128x64xbf16>
    %189 = vector.shape_cast %188 : vector<1x128x64xbf16> to vector<128x64xbf16>
    %cst_155 = arith.constant dense<0.000000e+00> : vector<2x64xf32>
    %190 = tpu.matmul %187, %189, %cst_155 {dimension_numbers = #tpu.dot_dimension_numbers<[1], [0], [0], [1], [0, 0, 1, 1], [], []>} : vector<2x128xbf16>, vector<128x64xbf16>, vector<2x64xf32> -> vector<2x64xf32>
    %191 = arith.addf %186, %190 : vector<2x64xf32>
    %c60 = arith.constant 60 : index
    %c0_156 = arith.constant 0 : index
    %192 = vector.load %arg11[%c60, %c0_156] : memref<100x128xbf16, #tpu.memory_space<vmem>>, vector<2x128xbf16>
    %c30_157 = arith.constant 30 : index
    %c0_158 = arith.constant 0 : index
    %c0_159 = arith.constant 0 : index
    %193 = vector.load %arg10[%c30_157, %c0_158, %c0_159] : memref<50x128x64xbf16, #tpu.memory_space<vmem>>, vector<1x128x64xbf16>
    %194 = vector.shape_cast %193 : vector<1x128x64xbf16> to vector<128x64xbf16>
    %cst_160 = arith.constant dense<0.000000e+00> : vector<2x64xf32>
    %195 = tpu.matmul %192, %194, %cst_160 {dimension_numbers = #tpu.dot_dimension_numbers<[1], [0], [0], [1], [0, 0, 1, 1], [], []>} : vector<2x128xbf16>, vector<128x64xbf16>, vector<2x64xf32> -> vector<2x64xf32>
    %196 = arith.addf %191, %195 : vector<2x64xf32>
    %c62 = arith.constant 62 : index
    %c0_161 = arith.constant 0 : index
    %197 = vector.load %arg11[%c62, %c0_161] : memref<100x128xbf16, #tpu.memory_space<vmem>>, vector<2x128xbf16>
    %c31 = arith.constant 31 : index
    %c0_162 = arith.constant 0 : index
    %c0_163 = arith.constant 0 : index
    %198 = vector.load %arg10[%c31, %c0_162, %c0_163] : memref<50x128x64xbf16, #tpu.memory_space<vmem>>, vector<1x128x64xbf16>
    %199 = vector.shape_cast %198 : vector<1x128x64xbf16> to vector<128x64xbf16>
    %cst_164 = arith.constant dense<0.000000e+00> : vector<2x64xf32>
    %200 = tpu.matmul %197, %199, %cst_164 {dimension_numbers = #tpu.dot_dimension_numbers<[1], [0], [0], [1], [0, 0, 1, 1], [], []>} : vector<2x128xbf16>, vector<128x64xbf16>, vector<2x64xf32> -> vector<2x64xf32>
    %201 = arith.addf %196, %200 : vector<2x64xf32>
    %c64_165 = arith.constant 64 : index
    %c0_166 = arith.constant 0 : index
    %202 = vector.load %arg11[%c64_165, %c0_166] : memref<100x128xbf16, #tpu.memory_space<vmem>>, vector<2x128xbf16>
    %c32_167 = arith.constant 32 : index
    %c0_168 = arith.constant 0 : index
    %c0_169 = arith.constant 0 : index
    %203 = vector.load %arg10[%c32_167, %c0_168, %c0_169] : memref<50x128x64xbf16, #tpu.memory_space<vmem>>, vector<1x128x64xbf16>
    %204 = vector.shape_cast %203 : vector<1x128x64xbf16> to vector<128x64xbf16>
    %cst_170 = arith.constant dense<0.000000e+00> : vector<2x64xf32>
    %205 = tpu.matmul %202, %204, %cst_170 {dimension_numbers = #tpu.dot_dimension_numbers<[1], [0], [0], [1], [0, 0, 1, 1], [], []>} : vector<2x128xbf16>, vector<128x64xbf16>, vector<2x64xf32> -> vector<2x64xf32>
    %206 = arith.addf %201, %205 : vector<2x64xf32>
    %c66 = arith.constant 66 : index
    %c0_171 = arith.constant 0 : index
    %207 = vector.load %arg11[%c66, %c0_171] : memref<100x128xbf16, #tpu.memory_space<vmem>>, vector<2x128xbf16>
    %c33 = arith.constant 33 : index
    %c0_172 = arith.constant 0 : index
    %c0_173 = arith.constant 0 : index
    %208 = vector.load %arg10[%c33, %c0_172, %c0_173] : memref<50x128x64xbf16, #tpu.memory_space<vmem>>, vector<1x128x64xbf16>
    %209 = vector.shape_cast %208 : vector<1x128x64xbf16> to vector<128x64xbf16>
    %cst_174 = arith.constant dense<0.000000e+00> : vector<2x64xf32>
    %210 = tpu.matmul %207, %209, %cst_174 {dimension_numbers = #tpu.dot_dimension_numbers<[1], [0], [0], [1], [0, 0, 1, 1], [], []>} : vector<2x128xbf16>, vector<128x64xbf16>, vector<2x64xf32> -> vector<2x64xf32>
    %211 = arith.addf %206, %210 : vector<2x64xf32>
    %c68 = arith.constant 68 : index
    %c0_175 = arith.constant 0 : index
    %212 = vector.load %arg11[%c68, %c0_175] : memref<100x128xbf16, #tpu.memory_space<vmem>>, vector<2x128xbf16>
    %c34_176 = arith.constant 34 : index
    %c0_177 = arith.constant 0 : index
    %c0_178 = arith.constant 0 : index
    %213 = vector.load %arg10[%c34_176, %c0_177, %c0_178] : memref<50x128x64xbf16, #tpu.memory_space<vmem>>, vector<1x128x64xbf16>
    %214 = vector.shape_cast %213 : vector<1x128x64xbf16> to vector<128x64xbf16>
    %cst_179 = arith.constant dense<0.000000e+00> : vector<2x64xf32>
    %215 = tpu.matmul %212, %214, %cst_179 {dimension_numbers = #tpu.dot_dimension_numbers<[1], [0], [0], [1], [0, 0, 1, 1], [], []>} : vector<2x128xbf16>, vector<128x64xbf16>, vector<2x64xf32> -> vector<2x64xf32>
    %216 = arith.addf %211, %215 : vector<2x64xf32>
    %c70 = arith.constant 70 : index
    %c0_180 = arith.constant 0 : index
    %217 = vector.load %arg11[%c70, %c0_180] : memref<100x128xbf16, #tpu.memory_space<vmem>>, vector<2x128xbf16>
    %c35 = arith.constant 35 : index
    %c0_181 = arith.constant 0 : index
    %c0_182 = arith.constant 0 : index
    %218 = vector.load %arg10[%c35, %c0_181, %c0_182] : memref<50x128x64xbf16, #tpu.memory_space<vmem>>, vector<1x128x64xbf16>
    %219 = vector.shape_cast %218 : vector<1x128x64xbf16> to vector<128x64xbf16>
    %cst_183 = arith.constant dense<0.000000e+00> : vector<2x64xf32>
    %220 = tpu.matmul %217, %219, %cst_183 {dimension_numbers = #tpu.dot_dimension_numbers<[1], [0], [0], [1], [0, 0, 1, 1], [], []>} : vector<2x128xbf16>, vector<128x64xbf16>, vector<2x64xf32> -> vector<2x64xf32>
    %221 = arith.addf %216, %220 : vector<2x64xf32>
    %c72 = arith.constant 72 : index
    %c0_184 = arith.constant 0 : index
    %222 = vector.load %arg11[%c72, %c0_184] : memref<100x128xbf16, #tpu.memory_space<vmem>>, vector<2x128xbf16>
    %c36_185 = arith.constant 36 : index
    %c0_186 = arith.constant 0 : index
    %c0_187 = arith.constant 0 : index
    %223 = vector.load %arg10[%c36_185, %c0_186, %c0_187] : memref<50x128x64xbf16, #tpu.memory_space<vmem>>, vector<1x128x64xbf16>
    %224 = vector.shape_cast %223 : vector<1x128x64xbf16> to vector<128x64xbf16>
    %cst_188 = arith.constant dense<0.000000e+00> : vector<2x64xf32>
    %225 = tpu.matmul %222, %224, %cst_188 {dimension_numbers = #tpu.dot_dimension_numbers<[1], [0], [0], [1], [0, 0, 1, 1], [], []>} : vector<2x128xbf16>, vector<128x64xbf16>, vector<2x64xf32> -> vector<2x64xf32>
    %226 = arith.addf %221, %225 : vector<2x64xf32>
    %c74 = arith.constant 74 : index
    %c0_189 = arith.constant 0 : index
    %227 = vector.load %arg11[%c74, %c0_189] : memref<100x128xbf16, #tpu.memory_space<vmem>>, vector<2x128xbf16>
    %c37 = arith.constant 37 : index
    %c0_190 = arith.constant 0 : index
    %c0_191 = arith.constant 0 : index
    %228 = vector.load %arg10[%c37, %c0_190, %c0_191] : memref<50x128x64xbf16, #tpu.memory_space<vmem>>, vector<1x128x64xbf16>
    %229 = vector.shape_cast %228 : vector<1x128x64xbf16> to vector<128x64xbf16>
    %cst_192 = arith.constant dense<0.000000e+00> : vector<2x64xf32>
    %230 = tpu.matmul %227, %229, %cst_192 {dimension_numbers = #tpu.dot_dimension_numbers<[1], [0], [0], [1], [0, 0, 1, 1], [], []>} : vector<2x128xbf16>, vector<128x64xbf16>, vector<2x64xf32> -> vector<2x64xf32>
    %231 = arith.addf %226, %230 : vector<2x64xf32>
    %c76 = arith.constant 76 : index
    %c0_193 = arith.constant 0 : index
    %232 = vector.load %arg11[%c76, %c0_193] : memref<100x128xbf16, #tpu.memory_space<vmem>>, vector<2x128xbf16>
    %c38_194 = arith.constant 38 : index
    %c0_195 = arith.constant 0 : index
    %c0_196 = arith.constant 0 : index
    %233 = vector.load %arg10[%c38_194, %c0_195, %c0_196] : memref<50x128x64xbf16, #tpu.memory_space<vmem>>, vector<1x128x64xbf16>
    %234 = vector.shape_cast %233 : vector<1x128x64xbf16> to vector<128x64xbf16>
    %cst_197 = arith.constant dense<0.000000e+00> : vector<2x64xf32>
    %235 = tpu.matmul %232, %234, %cst_197 {dimension_numbers = #tpu.dot_dimension_numbers<[1], [0], [0], [1], [0, 0, 1, 1], [], []>} : vector<2x128xbf16>, vector<128x64xbf16>, vector<2x64xf32> -> vector<2x64xf32>
    %236 = arith.addf %231, %235 : vector<2x64xf32>
    %c78 = arith.constant 78 : index
    %c0_198 = arith.constant 0 : index
    %237 = vector.load %arg11[%c78, %c0_198] : memref<100x128xbf16, #tpu.memory_space<vmem>>, vector<2x128xbf16>
    %c39 = arith.constant 39 : index
    %c0_199 = arith.constant 0 : index
    %c0_200 = arith.constant 0 : index
    %238 = vector.load %arg10[%c39, %c0_199, %c0_200] : memref<50x128x64xbf16, #tpu.memory_space<vmem>>, vector<1x128x64xbf16>
    %239 = vector.shape_cast %238 : vector<1x128x64xbf16> to vector<128x64xbf16>
    %cst_201 = arith.constant dense<0.000000e+00> : vector<2x64xf32>
    %240 = tpu.matmul %237, %239, %cst_201 {dimension_numbers = #tpu.dot_dimension_numbers<[1], [0], [0], [1], [0, 0, 1, 1], [], []>} : vector<2x128xbf16>, vector<128x64xbf16>, vector<2x64xf32> -> vector<2x64xf32>
    %241 = arith.addf %236, %240 : vector<2x64xf32>
    %c80 = arith.constant 80 : index
    %c0_202 = arith.constant 0 : index
    %242 = vector.load %arg11[%c80, %c0_202] : memref<100x128xbf16, #tpu.memory_space<vmem>>, vector<2x128xbf16>
    %c40_203 = arith.constant 40 : index
    %c0_204 = arith.constant 0 : index
    %c0_205 = arith.constant 0 : index
    %243 = vector.load %arg10[%c40_203, %c0_204, %c0_205] : memref<50x128x64xbf16, #tpu.memory_space<vmem>>, vector<1x128x64xbf16>
    %244 = vector.shape_cast %243 : vector<1x128x64xbf16> to vector<128x64xbf16>
    %cst_206 = arith.constant dense<0.000000e+00> : vector<2x64xf32>
    %245 = tpu.matmul %242, %244, %cst_206 {dimension_numbers = #tpu.dot_dimension_numbers<[1], [0], [0], [1], [0, 0, 1, 1], [], []>} : vector<2x128xbf16>, vector<128x64xbf16>, vector<2x64xf32> -> vector<2x64xf32>
    %246 = arith.addf %241, %245 : vector<2x64xf32>
    %c82 = arith.constant 82 : index
    %c0_207 = arith.constant 0 : index
    %247 = vector.load %arg11[%c82, %c0_207] : memref<100x128xbf16, #tpu.memory_space<vmem>>, vector<2x128xbf16>
    %c41 = arith.constant 41 : index
    %c0_208 = arith.constant 0 : index
    %c0_209 = arith.constant 0 : index
    %248 = vector.load %arg10[%c41, %c0_208, %c0_209] : memref<50x128x64xbf16, #tpu.memory_space<vmem>>, vector<1x128x64xbf16>
    %249 = vector.shape_cast %248 : vector<1x128x64xbf16> to vector<128x64xbf16>
    %cst_210 = arith.constant dense<0.000000e+00> : vector<2x64xf32>
    %250 = tpu.matmul %247, %249, %cst_210 {dimension_numbers = #tpu.dot_dimension_numbers<[1], [0], [0], [1], [0, 0, 1, 1], [], []>} : vector<2x128xbf16>, vector<128x64xbf16>, vector<2x64xf32> -> vector<2x64xf32>
    %251 = arith.addf %246, %250 : vector<2x64xf32>
    %c84 = arith.constant 84 : index
    %c0_211 = arith.constant 0 : index
    %252 = vector.load %arg11[%c84, %c0_211] : memref<100x128xbf16, #tpu.memory_space<vmem>>, vector<2x128xbf16>
    %c42_212 = arith.constant 42 : index
    %c0_213 = arith.constant 0 : index
    %c0_214 = arith.constant 0 : index
    %253 = vector.load %arg10[%c42_212, %c0_213, %c0_214] : memref<50x128x64xbf16, #tpu.memory_space<vmem>>, vector<1x128x64xbf16>
    %254 = vector.shape_cast %253 : vector<1x128x64xbf16> to vector<128x64xbf16>
    %cst_215 = arith.constant dense<0.000000e+00> : vector<2x64xf32>
    %255 = tpu.matmul %252, %254, %cst_215 {dimension_numbers = #tpu.dot_dimension_numbers<[1], [0], [0], [1], [0, 0, 1, 1], [], []>} : vector<2x128xbf16>, vector<128x64xbf16>, vector<2x64xf32> -> vector<2x64xf32>
    %256 = arith.addf %251, %255 : vector<2x64xf32>
    %c86 = arith.constant 86 : index
    %c0_216 = arith.constant 0 : index
    %257 = vector.load %arg11[%c86, %c0_216] : memref<100x128xbf16, #tpu.memory_space<vmem>>, vector<2x128xbf16>
    %c43 = arith.constant 43 : index
    %c0_217 = arith.constant 0 : index
    %c0_218 = arith.constant 0 : index
    %258 = vector.load %arg10[%c43, %c0_217, %c0_218] : memref<50x128x64xbf16, #tpu.memory_space<vmem>>, vector<1x128x64xbf16>
    %259 = vector.shape_cast %258 : vector<1x128x64xbf16> to vector<128x64xbf16>
    %cst_219 = arith.constant dense<0.000000e+00> : vector<2x64xf32>
    %260 = tpu.matmul %257, %259, %cst_219 {dimension_numbers = #tpu.dot_dimension_numbers<[1], [0], [0], [1], [0, 0, 1, 1], [], []>} : vector<2x128xbf16>, vector<128x64xbf16>, vector<2x64xf32> -> vector<2x64xf32>
    %261 = arith.addf %256, %260 : vector<2x64xf32>
    %c88 = arith.constant 88 : index
    %c0_220 = arith.constant 0 : index
    %262 = vector.load %arg11[%c88, %c0_220] : memref<100x128xbf16, #tpu.memory_space<vmem>>, vector<2x128xbf16>
    %c44_221 = arith.constant 44 : index
    %c0_222 = arith.constant 0 : index
    %c0_223 = arith.constant 0 : index
    %263 = vector.load %arg10[%c44_221, %c0_222, %c0_223] : memref<50x128x64xbf16, #tpu.memory_space<vmem>>, vector<1x128x64xbf16>
    %264 = vector.shape_cast %263 : vector<1x128x64xbf16> to vector<128x64xbf16>
    %cst_224 = arith.constant dense<0.000000e+00> : vector<2x64xf32>
    %265 = tpu.matmul %262, %264, %cst_224 {dimension_numbers = #tpu.dot_dimension_numbers<[1], [0], [0], [1], [0, 0, 1, 1], [], []>} : vector<2x128xbf16>, vector<128x64xbf16>, vector<2x64xf32> -> vector<2x64xf32>
    %266 = arith.addf %261, %265 : vector<2x64xf32>
    %c90 = arith.constant 90 : index
    %c0_225 = arith.constant 0 : index
    %267 = vector.load %arg11[%c90, %c0_225] : memref<100x128xbf16, #tpu.memory_space<vmem>>, vector<2x128xbf16>
    %c45 = arith.constant 45 : index
    %c0_226 = arith.constant 0 : index
    %c0_227 = arith.constant 0 : index
    %268 = vector.load %arg10[%c45, %c0_226, %c0_227] : memref<50x128x64xbf16, #tpu.memory_space<vmem>>, vector<1x128x64xbf16>
    %269 = vector.shape_cast %268 : vector<1x128x64xbf16> to vector<128x64xbf16>
    %cst_228 = arith.constant dense<0.000000e+00> : vector<2x64xf32>
    %270 = tpu.matmul %267, %269, %cst_228 {dimension_numbers = #tpu.dot_dimension_numbers<[1], [0], [0], [1], [0, 0, 1, 1], [], []>} : vector<2x128xbf16>, vector<128x64xbf16>, vector<2x64xf32> -> vector<2x64xf32>
    %271 = arith.addf %266, %270 : vector<2x64xf32>
    %c92 = arith.constant 92 : index
    %c0_229 = arith.constant 0 : index
    %272 = vector.load %arg11[%c92, %c0_229] : memref<100x128xbf16, #tpu.memory_space<vmem>>, vector<2x128xbf16>
    %c46_230 = arith.constant 46 : index
    %c0_231 = arith.constant 0 : index
    %c0_232 = arith.constant 0 : index
    %273 = vector.load %arg10[%c46_230, %c0_231, %c0_232] : memref<50x128x64xbf16, #tpu.memory_space<vmem>>, vector<1x128x64xbf16>
    %274 = vector.shape_cast %273 : vector<1x128x64xbf16> to vector<128x64xbf16>
    %cst_233 = arith.constant dense<0.000000e+00> : vector<2x64xf32>
    %275 = tpu.matmul %272, %274, %cst_233 {dimension_numbers = #tpu.dot_dimension_numbers<[1], [0], [0], [1], [0, 0, 1, 1], [], []>} : vector<2x128xbf16>, vector<128x64xbf16>, vector<2x64xf32> -> vector<2x64xf32>
    %276 = arith.addf %271, %275 : vector<2x64xf32>
    %c94 = arith.constant 94 : index
    %c0_234 = arith.constant 0 : index
    %277 = vector.load %arg11[%c94, %c0_234] : memref<100x128xbf16, #tpu.memory_space<vmem>>, vector<2x128xbf16>
    %c47 = arith.constant 47 : index
    %c0_235 = arith.constant 0 : index
    %c0_236 = arith.constant 0 : index
    %278 = vector.load %arg10[%c47, %c0_235, %c0_236] : memref<50x128x64xbf16, #tpu.memory_space<vmem>>, vector<1x128x64xbf16>
    %279 = vector.shape_cast %278 : vector<1x128x64xbf16> to vector<128x64xbf16>
    %cst_237 = arith.constant dense<0.000000e+00> : vector<2x64xf32>
    %280 = tpu.matmul %277, %279, %cst_237 {dimension_numbers = #tpu.dot_dimension_numbers<[1], [0], [0], [1], [0, 0, 1, 1], [], []>} : vector<2x128xbf16>, vector<128x64xbf16>, vector<2x64xf32> -> vector<2x64xf32>
    %281 = arith.addf %276, %280 : vector<2x64xf32>
    %c96 = arith.constant 96 : index
    %c0_238 = arith.constant 0 : index
    %282 = vector.load %arg11[%c96, %c0_238] : memref<100x128xbf16, #tpu.memory_space<vmem>>, vector<2x128xbf16>
    %c48_239 = arith.constant 48 : index
    %c0_240 = arith.constant 0 : index
    %c0_241 = arith.constant 0 : index
    %283 = vector.load %arg10[%c48_239, %c0_240, %c0_241] : memref<50x128x64xbf16, #tpu.memory_space<vmem>>, vector<1x128x64xbf16>
    %284 = vector.shape_cast %283 : vector<1x128x64xbf16> to vector<128x64xbf16>
    %cst_242 = arith.constant dense<0.000000e+00> : vector<2x64xf32>
    %285 = tpu.matmul %282, %284, %cst_242 {dimension_numbers = #tpu.dot_dimension_numbers<[1], [0], [0], [1], [0, 0, 1, 1], [], []>} : vector<2x128xbf16>, vector<128x64xbf16>, vector<2x64xf32> -> vector<2x64xf32>
    %286 = arith.addf %281, %285 : vector<2x64xf32>
    %c98 = arith.constant 98 : index
    %c0_243 = arith.constant 0 : index
    %287 = vector.load %arg11[%c98, %c0_243] : memref<100x128xbf16, #tpu.memory_space<vmem>>, vector<2x128xbf16>
    %c49 = arith.constant 49 : index
    %c0_244 = arith.constant 0 : index
    %c0_245 = arith.constant 0 : index
    %288 = vector.load %arg10[%c49, %c0_244, %c0_245] : memref<50x128x64xbf16, #tpu.memory_space<vmem>>, vector<1x128x64xbf16>
    %289 = vector.shape_cast %288 : vector<1x128x64xbf16> to vector<128x64xbf16>
    %cst_246 = arith.constant dense<0.000000e+00> : vector<2x64xf32>
    %290 = tpu.matmul %287, %289, %cst_246 {dimension_numbers = #tpu.dot_dimension_numbers<[1], [0], [0], [1], [0, 0, 1, 1], [], []>} : vector<2x128xbf16>, vector<128x64xbf16>, vector<2x64xf32> -> vector<2x64xf32>
    %291 = arith.addf %286, %290 : vector<2x64xf32>
    %c0_247 = arith.constant 0 : index
    %c0_248 = arith.constant 0 : index
    %292 = vector.load %arg6[%c0_247, %c0_248] : memref<1x64xf32, #tpu.memory_space<vmem>>, vector<1x64xf32>
    %293 = vector.broadcast %292 : vector<1x64xf32> to vector<2x64xf32>
    %294 = arith.addf %291, %293 : vector<2x64xf32>
    %295 = math.tanh %294 : vector<2x64xf32>
    %c0_249 = arith.constant 0 : index
    %c0_250 = arith.constant 0 : index
    %296 = vector.load %arg7[%c0_249, %c0_250] : memref<64x3xf32, #tpu.memory_space<vmem>>, vector<64x3xf32>
    %cst_251 = arith.constant dense<0.000000e+00> : vector<2x3xf32>
    %297 = tpu.matmul %295, %296, %cst_251 {dimension_numbers = #tpu.dot_dimension_numbers<[1], [0], [0], [1], [0, 0, 1, 1], [], []>} : vector<2x64xf32>, vector<64x3xf32>, vector<2x3xf32> -> vector<2x3xf32>
    %c0_252 = arith.constant 0 : index
    %c0_253 = arith.constant 0 : index
    %298 = vector.load %arg8[%c0_252, %c0_253] : memref<1x3xf32, #tpu.memory_space<vmem>>, vector<1x3xf32>
    %299 = vector.broadcast %298 : vector<1x3xf32> to vector<2x3xf32>
    %300 = arith.addf %297, %299 : vector<2x3xf32>
    %c0_254 = arith.constant 0 : index
    %c0_255 = arith.constant 0 : index
    %301 = vector.load %arg9[%c0_254, %c0_255] : memref<2x3xf32, #tpu.memory_space<vmem>>, vector<2x3xf32>
    tpu.vector_store %arg9[%c0_254, %c0_255], %300 {strides = array<i32>} : memref<2x3xf32, #tpu.memory_space<vmem>>, vector<2x3xf32>,
    return
  }
}

</mosaic_0001>

<bundles_post_ra>
// kernel: cnn_pinn_forward.1
= control target key start
LH: loop header
LB: loop body
LE: loop exit
PB: predicated region body
PF: predicated region fallthrough
CT: control target
= control target key end

     0   :  { %14 = vsyncpa [#allocation6], 0  ;;  %s13342_s0 = inlined_call_operand.vmem [shape: f32[100,9], index: 0, kind: input, shape index: {}]   ;;  %s13343_s1 = inlined_call_operand.vmem [shape: f32[9,128], index: 1, kind: input, shape index: {}]   ;;  %s13344_s2 = inlined_call_operand.vmem [shape: f32[1,128], index: 2, kind: input, shape index: {}]   ;;  %s13345_s3 = inlined_call_operand.vmem [shape: f32[192,256], index: 3, kind: input, shape index: {}]   ;;  %s13346_s4 = inlined_call_operand.vmem [shape: f32[1,256], index: 4, kind: input, shape index: {}]   ;;  %s13347_s5 = inlined_call_operand.vmem [shape: bf16[50,128,64], index: 5, kind: input, shape index: {}]   ;;  %s13348_s6 = inlined_call_operand.vmem [shape: f32[1,64], index: 6, kind: input, shape index: {}]   ;;  %s13349_s7 = inlined_call_operand.vmem [shape: f32[64,3], index: 7, kind: input, shape index: {}]   ;;  %s13350_s8 = inlined_call_operand.vmem [shape: f32[1,3], index: 8, kind: input, shape index: {}]   ;;  %s13351_s9 = inlined_call_operand.hbm [shape: f32[2,3], index: 9, kind: output, shape index: {}]  }
   0x1   :  { %v65_v0 = vld [vmem:[%s13347_s5] sm:$0xff]  ;;  %v67_v1 = vld [vmem:[%s13347_s5 + $0x8] sm:$0xff]  ;;  %v69_v2 = vld [vmem:[%s13347_s5 + $0x10] sm:$0xff] }
   0x2   :  { %66 = vst [vmem:[#allocation2] sm:$0xff] %v65_v0  ;;  %68 = vst [vmem:[#allocation2 + $0x8] sm:$0xff] %v67_v1  ;;  %v71_v3 = vld [vmem:[%s13347_s5 + $0x18] sm:$0xff]  ;;  %v73_v4 = vld [vmem:[%s13347_s5 + $0x20] sm:$0xff] }
   0x3   :  { %70 = vst [vmem:[#allocation2 + $0x10] sm:$0xff] %v69_v2  ;;  %72 = vst [vmem:[#allocation2 + $0x18] sm:$0xff] %v71_v3  ;;  %v75_v5 = vld [vmem:[%s13347_s5 + $0x28] sm:$0xff]  ;;  %v77_v6 = vld [vmem:[%s13347_s5 + $0x30] sm:$0xff] }
   0x4   :  { %74 = vst [vmem:[#allocation2 + $0x20] sm:$0xff] %v73_v4  ;;  %v79_v7 = vld [vmem:[%s13347_s5 + $0x38] sm:$0xff]  ;;  %76 = vst [vmem:[#allocation2 + $0x28] sm:$0xff] %v75_v5  ;;  %v81_v8 = vld [vmem:[%s13347_s5 + $0x40] sm:$0xff] }
   0x5   :  { %78 = vst [vmem:[#allocation2 + $0x30] sm:$0xff] %v77_v6  ;;  %80 = vst [vmem:[#allocation2 + $0x38] sm:$0xff] %v79_v7  ;;  %v83_v9 = vld [vmem:[%s13347_s5 + $0x48] sm:$0xff]  ;;  %v85_v10 = vld [vmem:[%s13347_s5 + $0x50] sm:$0xff] }
   0x6   :  { %82 = vst [vmem:[#allocation2 + $0x40] sm:$0xff] %v81_v8  ;;  %84 = vst [vmem:[#allocation2 + $0x48] sm:$0xff] %v83_v9  ;;  %v87_v11 = vld [vmem:[%s13347_s5 + $0x58] sm:$0xff]  ;;  %v89_v12 = vld [vmem:[%s13347_s5 + $0x60] sm:$0xff] }
   0x7   :  { %86 = vst [vmem:[#allocation2 + $0x50] sm:$0xff] %v85_v10  ;;  %v91_v13 = vld [vmem:[%s13347_s5 + $0x68] sm:$0xff]  ;;  %88 = vst [vmem:[#allocation2 + $0x58] sm:$0xff] %v87_v11  ;;  %v93_v14 = vld [vmem:[%s13347_s5 + $0x70] sm:$0xff] }
   0x8   :  { %90 = vst [vmem:[#allocation2 + $0x60] sm:$0xff] %v89_v12  ;;  %92 = vst [vmem:[#allocation2 + $0x68] sm:$0xff] %v91_v13  ;;  %v95_v15 = vld [vmem:[%s13347_s5 + $0x78] sm:$0xff]  ;;  %v97_v16 = vld [vmem:[%s13347_s5 + $0x80] sm:$0xff] }
   0x9   :  { %94 = vst [vmem:[#allocation2 + $0x70] sm:$0xff] %v93_v14  ;;  %96 = vst [vmem:[#allocation2 + $0x78] sm:$0xff] %v95_v15  ;;  %v99_v17 = vld [vmem:[%s13347_s5 + $0x88] sm:$0xff]  ;;  %v101_v18 = vld [vmem:[%s13347_s5 + $0x90] sm:$0xff] }
   0xa   :  { %98 = vst [vmem:[#allocation2 + $0x80] sm:$0xff] %v97_v16  ;;  %v103_v19 = vld [vmem:[%s13347_s5 + $0x98] sm:$0xff]  ;;  %100 = vst [vmem:[#allocation2 + $0x88] sm:$0xff] %v99_v17  ;;  %v105_v20 = vld [vmem:[%s13347_s5 + $0xa0] sm:$0xff] }
   0xb   :  { %102 = vst [vmem:[#allocation2 + $0x90] sm:$0xff] %v101_v18  ;;  %104 = vst [vmem:[#allocation2 + $0x98] sm:$0xff] %v103_v19  ;;  %v107_v21 = vld [vmem:[%s13347_s5 + $0xa8] sm:$0xff]  ;;  %v109_v22 = vld [vmem:[%s13347_s5 + $0xb0] sm:$0xff] }
   0xc   :  { %106 = vst [vmem:[#allocation2 + $0xa0] sm:$0xff] %v105_v20  ;;  %108 = vst [vmem:[#allocation2 + $0xa8] sm:$0xff] %v107_v21  ;;  %v111_v23 = vld [vmem:[%s13347_s5 + $0xb8] sm:$0xff]  ;;  %v113_v24 = vld [vmem:[%s13347_s5 + $0xc0] sm:$0xff] }
   0xd   :  { %110 = vst [vmem:[#allocation2 + $0xb0] sm:$0xff] %v109_v22  ;;  %v115_v25 = vld [vmem:[%s13347_s5 + $0xc8] sm:$0xff]  ;;  %112 = vst [vmem:[#allocation2 + $0xb8] sm:$0xff] %v111_v23  ;;  %v117_v26 = vld [vmem:[%s13347_s5 + $0xd0] sm:$0xff] }
   0xe   :  { %114 = vst [vmem:[#allocation2 + $0xc0] sm:$0xff] %v113_v24  ;;  %116 = vst [vmem:[#allocation2 + $0xc8] sm:$0xff] %v115_v25  ;;  %v119_v27 = vld [vmem:[%s13347_s5 + $0xd8] sm:$0xff]  ;;  %v121_v28 = vld [vmem:[%s13347_s5 + $0xe0] sm:$0xff] }
   0xf   :  { %118 = vst [vmem:[#allocation2 + $0xd0] sm:$0xff] %v117_v26  ;;  %120 = vst [vmem:[#allocation2 + $0xd8] sm:$0xff] %v119_v27  ;;  %v123_v29 = vld [vmem:[%s13347_s5 + $0xe8] sm:$0xff]  ;;  %v125_v30 = vld [vmem:[%s13347_s5 + $0xf0] sm:$0xff] }
  0x10   :  { %122 = vst [vmem:[#allocation2 + $0xe0] sm:$0xff] %v121_v28  ;;  %v127_v31 = vld [vmem:[%s13347_s5 + $0xf8] sm:$0xff]  ;;  %124 = vst [vmem:[#allocation2 + $0xe8] sm:$0xff] %v123_v29  ;;  %v129_v32 = vld [vmem:[%s13347_s5 + $0x100] sm:$0xff] }
  0x11   :  { %126 = vst [vmem:[#allocation2 + $0xf0] sm:$0xff] %v125_v30  ;;  %128 = vst [vmem:[#allocation2 + $0xf8] sm:$0xff] %v127_v31  ;;  %v131_v33 = vld [vmem:[%s13347_s5 + $0x108] sm:$0xff]  ;;  %v133_v34 = vld [vmem:[%s13347_s5 + $0x110] sm:$0xff] }
  0x12   :  { %130 = vst [vmem:[#allocation2 + $0x100] sm:$0xff] %v129_v32  ;;  %132 = vst [vmem:[#allocation2 + $0x108] sm:$0xff] %v131_v33  ;;  %v135_v35 = vld [vmem:[%s13347_s5 + $0x118] sm:$0xff]  ;;  %v137_v36 = vld [vmem:[%s13347_s5 + $0x120] sm:$0xff] }
  0x13   :  { %134 = vst [vmem:[#allocation2 + $0x110] sm:$0xff] %v133_v34  ;;  %v139_v37 = vld [vmem:[%s13347_s5 + $0x128] sm:$0xff]  ;;  %136 = vst [vmem:[#allocation2 + $0x118] sm:$0xff] %v135_v35  ;;  %v141_v38 = vld [vmem:[%s13347_s5 + $0x130] sm:$0xff] }
  0x14   :  { %138 = vst [vmem:[#allocation2 + $0x120] sm:$0xff] %v137_v36  ;;  %140 = vst [vmem:[#allocation2 + $0x128] sm:$0xff] %v139_v37  ;;  %v143_v39 = vld [vmem:[%s13347_s5 + $0x138] sm:$0xff]  ;;  %v145_v40 = vld [vmem:[%s13347_s5 + $0x140] sm:$0xff] }
  0x15   :  { %142 = vst [vmem:[#allocation2 + $0x130] sm:$0xff] %v141_v38  ;;  %144 = vst [vmem:[#allocation2 + $0x138] sm:$0xff] %v143_v39  ;;  %v147_v41 = vld [vmem:[%s13347_s5 + $0x148] sm:$0xff]  ;;  %v149_v42 = vld [vmem:[%s13347_s5 + $0x150] sm:$0xff] }
  0x16   :  { %146 = vst [vmem:[#allocation2 + $0x140] sm:$0xff] %v145_v40  ;;  %v151_v43 = vld [vmem:[%s13347_s5 + $0x158] sm:$0xff]  ;;  %148 = vst [vmem:[#allocation2 + $0x148] sm:$0xff] %v147_v41  ;;  %v153_v44 = vld [vmem:[%s13347_s5 + $0x160] sm:$0xff] }
  0x17   :  { %150 = vst [vmem:[#allocation2 + $0x150] sm:$0xff] %v149_v42  ;;  %152 = vst [vmem:[#allocation2 + $0x158] sm:$0xff] %v151_v43  ;;  %v155_v45 = vld [vmem:[%s13347_s5 + $0x168] sm:$0xff]  ;;  %v157_v46 = vld [vmem:[%s13347_s5 + $0x170] sm:$0xff] }
  0x18   :  { %154 = vst [vmem:[#allocation2 + $0x160] sm:$0xff] %v153_v44  ;;  %156 = vst [vmem:[#allocation2 + $0x168] sm:$0xff] %v155_v45  ;;  %v159_v47 = vld [vmem:[%s13347_s5 + $0x178] sm:$0xff]  ;;  %v161_v48 = vld [vmem:[%s13347_s5 + $0x180] sm:$0xff] }
  0x19   :  { %158 = vst [vmem:[#allocation2 + $0x170] sm:$0xff] %v157_v46  ;;  %v163_v49 = vld [vmem:[%s13347_s5 + $0x188] sm:$0xff]  ;;  %160 = vst [vmem:[#allocation2 + $0x178] sm:$0xff] %v159_v47  ;;  %v165_v50 = vld [vmem:[%s13347_s5 + $0x190] sm:$0xff] }
  0x1a   :  { %162 = vst [vmem:[#allocation2 + $0x180] sm:$0xff] %v161_v48  ;;  %164 = vst [vmem:[#allocation2 + $0x188] sm:$0xff] %v163_v49  ;;  %v167_v51 = vld [vmem:[%s13347_s5 + $0x198] sm:$0xff]  ;;  %v169_v52 = vld [vmem:[%s13347_s5 + $0x1a0] sm:$0xff] }
  0x1b   :  { %166 = vst [vmem:[#allocation2 + $0x190] sm:$0xff] %v165_v50  ;;  %168 = vst [vmem:[#allocation2 + $0x198] sm:$0xff] %v167_v51  ;;  %v171_v53 = vld [vmem:[%s13347_s5 + $0x1a8] sm:$0xff]  ;;  %v173_v54 = vld [vmem:[%s13347_s5 + $0x1b0] sm:$0xff] }
  0x1c   :  { %170 = vst [vmem:[#allocation2 + $0x1a0] sm:$0xff] %v169_v52  ;;  %v175_v55 = vld [vmem:[%s13347_s5 + $0x1b8] sm:$0xff]  ;;  %172 = vst [vmem:[#allocation2 + $0x1a8] sm:$0xff] %v171_v53  ;;  %v177_v56 = vld [vmem:[%s13347_s5 + $0x1c0] sm:$0xff] }
  0x1d   :  { %174 = vst [vmem:[#allocation2 + $0x1b0] sm:$0xff] %v173_v54  ;;  %176 = vst [vmem:[#allocation2 + $0x1b8] sm:$0xff] %v175_v55  ;;  %v179_v57 = vld [vmem:[%s13347_s5 + $0x1c8] sm:$0xff]  ;;  %v181_v58 = vld [vmem:[%s13347_s5 + $0x1d0] sm:$0xff] }
  0x1e   :  { %178 = vst [vmem:[#allocation2 + $0x1c0] sm:$0xff] %v177_v56  ;;  %180 = vst [vmem:[#allocation2 + $0x1c8] sm:$0xff] %v179_v57  ;;  %v183_v59 = vld [vmem:[%s13347_s5 + $0x1d8] sm:$0xff]  ;;  %v185_v60 = vld [vmem:[%s13347_s5 + $0x1e0] sm:$0xff] }
  0x1f   :  { %182 = vst [vmem:[#allocation2 + $0x1d0] sm:$0xff] %v181_v58  ;;  %v187_v61 = vld [vmem:[%s13347_s5 + $0x1e8] sm:$0xff]  ;;  %184 = vst [vmem:[#allocation2 + $0x1d8] sm:$0xff] %v183_v59  ;;  %v189_v62 = vld [vmem:[%s13347_s5 + $0x1f0] sm:$0xff] }
  0x20   :  { %186 = vst [vmem:[#allocation2 + $0x1e0] sm:$0xff] %v185_v60  ;;  %188 = vst [vmem:[#allocation2 + $0x1e8] sm:$0xff] %v187_v61  ;;  %v191_v63 = vld [vmem:[%s13347_s5 + $0x1f8] sm:$0xff]  ;;  %v193_v0 = vld [vmem:[%s13347_s5 + $0x200] sm:$0xff] }
  0x21   :  { %190 = vst [vmem:[#allocation2 + $0x1f0] sm:$0xff] %v189_v62  ;;  %192 = vst [vmem:[#allocation2 + $0x1f8] sm:$0xff] %v191_v63  ;;  %v195_v1 = vld [vmem:[%s13347_s5 + $0x208] sm:$0xff]  ;;  %v197_v2 = vld [vmem:[%s13347_s5 + $0x210] sm:$0xff] }
  0x22   :  { %194 = vst [vmem:[#allocation2 + $0x200] sm:$0xff] %v193_v0  ;;  %v199_v3 = vld [vmem:[%s13347_s5 + $0x218] sm:$0xff]  ;;  %196 = vst [vmem:[#allocation2 + $0x208] sm:$0xff] %v195_v1  ;;  %v201_v4 = vld [vmem:[%s13347_s5 + $0x220] sm:$0xff] }
  0x23   :  { %198 = vst [vmem:[#allocation2 + $0x210] sm:$0xff] %v197_v2  ;;  %200 = vst [vmem:[#allocation2 + $0x218] sm:$0xff] %v199_v3  ;;  %v203_v5 = vld [vmem:[%s13347_s5 + $0x228] sm:$0xff]  ;;  %v205_v6 = vld [vmem:[%s13347_s5 + $0x230] sm:$0xff] }
  0x24   :  { %202 = vst [vmem:[#allocation2 + $0x220] sm:$0xff] %v201_v4  ;;  %204 = vst [vmem:[#allocation2 + $0x228] sm:$0xff] %v203_v5  ;;  %v207_v7 = vld [vmem:[%s13347_s5 + $0x238] sm:$0xff]  ;;  %v209_v8 = vld [vmem:[%s13347_s5 + $0x240] sm:$0xff] }
  0x25   :  { %206 = vst [vmem:[#allocation2 + $0x230] sm:$0xff] %v205_v6  ;;  %v211_v9 = vld [vmem:[%s13347_s5 + $0x248] sm:$0xff]  ;;  %208 = vst [vmem:[#allocation2 + $0x238] sm:$0xff] %v207_v7  ;;  %v213_v10 = vld [vmem:[%s13347_s5 + $0x250] sm:$0xff] }
  0x26   :  { %210 = vst [vmem:[#allocation2 + $0x240] sm:$0xff] %v209_v8  ;;  %212 = vst [vmem:[#allocation2 + $0x248] sm:$0xff] %v211_v9  ;;  %v215_v11 = vld [vmem:[%s13347_s5 + $0x258] sm:$0xff]  ;;  %v217_v12 = vld [vmem:[%s13347_s5 + $0x260] sm:$0xff] }
  0x27   :  { %214 = vst [vmem:[#allocation2 + $0x250] sm:$0xff] %v213_v10  ;;  %216 = vst [vmem:[#allocation2 + $0x258] sm:$0xff] %v215_v11  ;;  %v219_v13 = vld [vmem:[%s13347_s5 + $0x268] sm:$0xff]  ;;  %v221_v14 = vld [vmem:[%s13347_s5 + $0x270] sm:$0xff] }
  0x28   :  { %218 = vst [vmem:[#allocation2 + $0x260] sm:$0xff] %v217_v12  ;;  %v223_v15 = vld [vmem:[%s13347_s5 + $0x278] sm:$0xff]  ;;  %220 = vst [vmem:[#allocation2 + $0x268] sm:$0xff] %v219_v13  ;;  %v225_v16 = vld [vmem:[%s13347_s5 + $0x280] sm:$0xff] }
  0x29   :  { %222 = vst [vmem:[#allocation2 + $0x270] sm:$0xff] %v221_v14  ;;  %224 = vst [vmem:[#allocation2 + $0x278] sm:$0xff] %v223_v15  ;;  %v227_v17 = vld [vmem:[%s13347_s5 + $0x288] sm:$0xff]  ;;  %v229_v18 = vld [vmem:[%s13347_s5 + $0x290] sm:$0xff] }
  0x2a   :  { %226 = vst [vmem:[#allocation2 + $0x280] sm:$0xff] %v225_v16  ;;  %228 = vst [vmem:[#allocation2 + $0x288] sm:$0xff] %v227_v17  ;;  %v231_v19 = vld [vmem:[%s13347_s5 + $0x298] sm:$0xff]  ;;  %v233_v20 = vld [vmem:[%s13347_s5 + $0x2a0] sm:$0xff] }
  0x2b   :  { %230 = vst [vmem:[#allocation2 + $0x290] sm:$0xff] %v229_v18  ;;  %v235_v21 = vld [vmem:[%s13347_s5 + $0x2a8] sm:$0xff]  ;;  %232 = vst [vmem:[#allocation2 + $0x298] sm:$0xff] %v231_v19  ;;  %v237_v22 = vld [vmem:[%s13347_s5 + $0x2b0] sm:$0xff] }
  0x2c   :  { %234 = vst [vmem:[#allocation2 + $0x2a0] sm:$0xff] %v233_v20  ;;  %236 = vst [vmem:[#allocation2 + $0x2a8] sm:$0xff] %v235_v21  ;;  %v239_v23 = vld [vmem:[%s13347_s5 + $0x2b8] sm:$0xff]  ;;  %v241_v24 = vld [vmem:[%s13347_s5 + $0x2c0] sm:$0xff] }
  0x2d   :  { %238 = vst [vmem:[#allocation2 + $0x2b0] sm:$0xff] %v237_v22  ;;  %240 = vst [vmem:[#allocation2 + $0x2b8] sm:$0xff] %v239_v23  ;;  %v243_v25 = vld [vmem:[%s13347_s5 + $0x2c8] sm:$0xff]  ;;  %v245_v26 = vld [vmem:[%s13347_s5 + $0x2d0] sm:$0xff] }
  0x2e   :  { %242 = vst [vmem:[#allocation2 + $0x2c0] sm:$0xff] %v241_v24  ;;  %v247_v27 = vld [vmem:[%s13347_s5 + $0x2d8] sm:$0xff]  ;;  %244 = vst [vmem:[#allocation2 + $0x2c8] sm:$0xff] %v243_v25  ;;  %v249_v28 = vld [vmem:[%s13347_s5 + $0x2e0] sm:$0xff] }
  0x2f   :  { %246 = vst [vmem:[#allocation2 + $0x2d0] sm:$0xff] %v245_v26  ;;  %248 = vst [vmem:[#allocation2 + $0x2d8] sm:$0xff] %v247_v27  ;;  %v251_v29 = vld [vmem:[%s13347_s5 + $0x2e8] sm:$0xff]  ;;  %v253_v30 = vld [vmem:[%s13347_s5 + $0x2f0] sm:$0xff] }
  0x30   :  { %250 = vst [vmem:[#allocation2 + $0x2e0] sm:$0xff] %v249_v28  ;;  %252 = vst [vmem:[#allocation2 + $0x2e8] sm:$0xff] %v251_v29  ;;  %v255_v31 = vld [vmem:[%s13347_s5 + $0x2f8] sm:$0xff]  ;;  %v257_v32 = vld [vmem:[%s13347_s5 + $0x300] sm:$0xff] }
  0x31   :  { %254 = vst [vmem:[#allocation2 + $0x2f0] sm:$0xff] %v253_v30  ;;  %v259_v33 = vld [vmem:[%s13347_s5 + $0x308] sm:$0xff]  ;;  %256 = vst [vmem:[#allocation2 + $0x2f8] sm:$0xff] %v255_v31  ;;  %v261_v34 = vld [vmem:[%s13347_s5 + $0x310] sm:$0xff] }
  0x32   :  { %258 = vst [vmem:[#allocation2 + $0x300] sm:$0xff] %v257_v32  ;;  %260 = vst [vmem:[#allocation2 + $0x308] sm:$0xff] %v259_v33  ;;  %v263_v35 = vld [vmem:[%s13347_s5 + $0x318] sm:$0xff]  ;;  %v265_v36 = vld [vmem:[%s13347_s5 + $0x320] sm:$0xff] }
  0x33   :  { %262 = vst [vmem:[#allocation2 + $0x310] sm:$0xff] %v261_v34  ;;  %264 = vst [vmem:[#allocation2 + $0x318] sm:$0xff] %v263_v35  ;;  %v267_v37 = vld [vmem:[%s13347_s5 + $0x328] sm:$0xff]  ;;  %v269_v38 = vld [vmem:[%s13347_s5 + $0x330] sm:$0xff] }
  0x34   :  { %266 = vst [vmem:[#allocation2 + $0x320] sm:$0xff] %v265_v36  ;;  %v271_v39 = vld [vmem:[%s13347_s5 + $0x338] sm:$0xff]  ;;  %268 = vst [vmem:[#allocation2 + $0x328] sm:$0xff] %v267_v37  ;;  %v273_v40 = vld [vmem:[%s13347_s5 + $0x340] sm:$0xff] }
  0x35   :  { %270 = vst [vmem:[#allocation2 + $0x330] sm:$0xff] %v269_v38  ;;  %272 = vst [vmem:[#allocation2 + $0x338] sm:$0xff] %v271_v39  ;;  %v275_v41 = vld [vmem:[%s13347_s5 + $0x348] sm:$0xff]  ;;  %v277_v42 = vld [vmem:[%s13347_s5 + $0x350] sm:$0xff] }
  0x36   :  { %274 = vst [vmem:[#allocation2 + $0x340] sm:$0xff] %v273_v40  ;;  %276 = vst [vmem:[#allocation2 + $0x348] sm:$0xff] %v275_v41  ;;  %v279_v43 = vld [vmem:[%s13347_s5 + $0x358] sm:$0xff]  ;;  %v281_v44 = vld [vmem:[%s13347_s5 + $0x360] sm:$0xff] }
  0x37   :  { %278 = vst [vmem:[#allocation2 + $0x350] sm:$0xff] %v277_v42  ;;  %v283_v45 = vld [vmem:[%s13347_s5 + $0x368] sm:$0xff]  ;;  %280 = vst [vmem:[#allocation2 + $0x358] sm:$0xff] %v279_v43  ;;  %v285_v46 = vld [vmem:[%s13347_s5 + $0x370] sm:$0xff] }
  0x38   :  { %282 = vst [vmem:[#allocation2 + $0x360] sm:$0xff] %v281_v44  ;;  %284 = vst [vmem:[#allocation2 + $0x368] sm:$0xff] %v283_v45  ;;  %v287_v47 = vld [vmem:[%s13347_s5 + $0x378] sm:$0xff]  ;;  %v289_v48 = vld [vmem:[%s13347_s5 + $0x380] sm:$0xff] }
  0x39   :  { %286 = vst [vmem:[#allocation2 + $0x370] sm:$0xff] %v285_v46  ;;  %288 = vst [vmem:[#allocation2 + $0x378] sm:$0xff] %v287_v47  ;;  %v291_v49 = vld [vmem:[%s13347_s5 + $0x388] sm:$0xff]  ;;  %v293_v50 = vld [vmem:[%s13347_s5 + $0x390] sm:$0xff] }
  0x3a   :  { %290 = vst [vmem:[#allocation2 + $0x380] sm:$0xff] %v289_v48  ;;  %v295_v51 = vld [vmem:[%s13347_s5 + $0x398] sm:$0xff]  ;;  %292 = vst [vmem:[#allocation2 + $0x388] sm:$0xff] %v291_v49  ;;  %v297_v52 = vld [vmem:[%s13347_s5 + $0x3a0] sm:$0xff] }
  0x3b   :  { %294 = vst [vmem:[#allocation2 + $0x390] sm:$0xff] %v293_v50  ;;  %296 = vst [vmem:[#allocation2 + $0x398] sm:$0xff] %v295_v51  ;;  %v299_v53 = vld [vmem:[%s13347_s5 + $0x3a8] sm:$0xff]  ;;  %v301_v54 = vld [vmem:[%s13347_s5 + $0x3b0] sm:$0xff] }
  0x3c   :  { %298 = vst [vmem:[#allocation2 + $0x3a0] sm:$0xff] %v297_v52  ;;  %300 = vst [vmem:[#allocation2 + $0x3a8] sm:$0xff] %v299_v53  ;;  %v303_v55 = vld [vmem:[%s13347_s5 + $0x3b8] sm:$0xff]  ;;  %v305_v56 = vld [vmem:[%s13347_s5 + $0x3c0] sm:$0xff] }
  0x3d   :  { %302 = vst [vmem:[#allocation2 + $0x3b0] sm:$0xff] %v301_v54  ;;  %v307_v57 = vld [vmem:[%s13347_s5 + $0x3c8] sm:$0xff]  ;;  %304 = vst [vmem:[#allocation2 + $0x3b8] sm:$0xff] %v303_v55  ;;  %v309_v58 = vld [vmem:[%s13347_s5 + $0x3d0] sm:$0xff] }
  0x3e   :  { %306 = vst [vmem:[#allocation2 + $0x3c0] sm:$0xff] %v305_v56  ;;  %308 = vst [vmem:[#allocation2 + $0x3c8] sm:$0xff] %v307_v57  ;;  %v311_v59 = vld [vmem:[%s13347_s5 + $0x3d8] sm:$0xff]  ;;  %v313_v60 = vld [vmem:[%s13347_s5 + $0x3e0] sm:$0xff] }
  0x3f   :  { %310 = vst [vmem:[#allocation2 + $0x3d0] sm:$0xff] %v309_v58  ;;  %312 = vst [vmem:[#allocation2 + $0x3d8] sm:$0xff] %v311_v59  ;;  %v315_v61 = vld [vmem:[%s13347_s5 + $0x3e8] sm:$0xff]  ;;  %v317_v62 = vld [vmem:[%s13347_s5 + $0x3f0] sm:$0xff] }
  0x40   :  { %314 = vst [vmem:[#allocation2 + $0x3e0] sm:$0xff] %v313_v60  ;;  %v319_v63 = vld [vmem:[%s13347_s5 + $0x3f8] sm:$0xff]  ;;  %316 = vst [vmem:[#allocation2 + $0x3e8] sm:$0xff] %v315_v61  ;;  %v321_v0 = vld [vmem:[%s13347_s5 + $0x400] sm:$0xff] }
  0x41   :  { %318 = vst [vmem:[#allocation2 + $0x3f0] sm:$0xff] %v317_v62  ;;  %320 = vst [vmem:[#allocation2 + $0x3f8] sm:$0xff] %v319_v63  ;;  %v323_v1 = vld [vmem:[%s13347_s5 + $0x408] sm:$0xff]  ;;  %v325_v2 = vld [vmem:[%s13347_s5 + $0x410] sm:$0xff] }
  0x42   :  { %322 = vst [vmem:[#allocation2 + $0x400] sm:$0xff] %v321_v0  ;;  %324 = vst [vmem:[#allocation2 + $0x408] sm:$0xff] %v323_v1  ;;  %v327_v3 = vld [vmem:[%s13347_s5 + $0x418] sm:$0xff]  ;;  %v329_v4 = vld [vmem:[%s13347_s5 + $0x420] sm:$0xff] }
  0x43   :  { %326 = vst [vmem:[#allocation2 + $0x410] sm:$0xff] %v325_v2  ;;  %v331_v5 = vld [vmem:[%s13347_s5 + $0x428] sm:$0xff]  ;;  %328 = vst [vmem:[#allocation2 + $0x418] sm:$0xff] %v327_v3  ;;  %v333_v6 = vld [vmem:[%s13347_s5 + $0x430] sm:$0xff] }
  0x44   :  { %330 = vst [vmem:[#allocation2 + $0x420] sm:$0xff] %v329_v4  ;;  %332 = vst [vmem:[#allocation2 + $0x428] sm:$0xff] %v331_v5  ;;  %v335_v7 = vld [vmem:[%s13347_s5 + $0x438] sm:$0xff]  ;;  %v337_v8 = vld [vmem:[%s13347_s5 + $0x440] sm:$0xff] }
  0x45   :  { %334 = vst [vmem:[#allocation2 + $0x430] sm:$0xff] %v333_v6  ;;  %336 = vst [vmem:[#allocation2 + $0x438] sm:$0xff] %v335_v7  ;;  %v339_v9 = vld [vmem:[%s13347_s5 + $0x448] sm:$0xff]  ;;  %v341_v10 = vld [vmem:[%s13347_s5 + $0x450] sm:$0xff] }
  0x46   :  { %338 = vst [vmem:[#allocation2 + $0x440] sm:$0xff] %v337_v8  ;;  %v343_v11 = vld [vmem:[%s13347_s5 + $0x458] sm:$0xff]  ;;  %340 = vst [vmem:[#allocation2 + $0x448] sm:$0xff] %v339_v9  ;;  %v345_v12 = vld [vmem:[%s13347_s5 + $0x460] sm:$0xff] }
  0x47   :  { %342 = vst [vmem:[#allocation2 + $0x450] sm:$0xff] %v341_v10  ;;  %344 = vst [vmem:[#allocation2 + $0x458] sm:$0xff] %v343_v11  ;;  %v347_v13 = vld [vmem:[%s13347_s5 + $0x468] sm:$0xff]  ;;  %v349_v14 = vld [vmem:[%s13347_s5 + $0x470] sm:$0xff] }
  0x48   :  { %346 = vst [vmem:[#allocation2 + $0x460] sm:$0xff] %v345_v12  ;;  %348 = vst [vmem:[#allocation2 + $0x468] sm:$0xff] %v347_v13  ;;  %v351_v15 = vld [vmem:[%s13347_s5 + $0x478] sm:$0xff]  ;;  %v353_v16 = vld [vmem:[%s13347_s5 + $0x480] sm:$0xff] }
  0x49   :  { %350 = vst [vmem:[#allocation2 + $0x470] sm:$0xff] %v349_v14  ;;  %v355_v17 = vld [vmem:[%s13347_s5 + $0x488] sm:$0xff]  ;;  %352 = vst [vmem:[#allocation2 + $0x478] sm:$0xff] %v351_v15  ;;  %v357_v18 = vld [vmem:[%s13347_s5 + $0x490] sm:$0xff] }
  0x4a   :  { %354 = vst [vmem:[#allocation2 + $0x480] sm:$0xff] %v353_v16  ;;  %356 = vst [vmem:[#allocation2 + $0x488] sm:$0xff] %v355_v17  ;;  %v359_v19 = vld [vmem:[%s13347_s5 + $0x498] sm:$0xff]  ;;  %v361_v20 = vld [vmem:[%s13347_s5 + $0x4a0] sm:$0xff] }
  0x4b   :  { %358 = vst [vmem:[#allocation2 + $0x490] sm:$0xff] %v357_v18  ;;  %360 = vst [vmem:[#allocation2 + $0x498] sm:$0xff] %v359_v19  ;;  %v363_v21 = vld [vmem:[%s13347_s5 + $0x4a8] sm:$0xff]  ;;  %v365_v22 = vld [vmem:[%s13347_s5 + $0x4b0] sm:$0xff] }
  0x4c   :  { %362 = vst [vmem:[#allocation2 + $0x4a0] sm:$0xff] %v361_v20  ;;  %v367_v23 = vld [vmem:[%s13347_s5 + $0x4b8] sm:$0xff]  ;;  %364 = vst [vmem:[#allocation2 + $0x4a8] sm:$0xff] %v363_v21  ;;  %v369_v24 = vld [vmem:[%s13347_s5 + $0x4c0] sm:$0xff] }
  0x4d   :  { %366 = vst [vmem:[#allocation2 + $0x4b0] sm:$0xff] %v365_v22  ;;  %368 = vst [vmem:[#allocation2 + $0x4b8] sm:$0xff] %v367_v23  ;;  %v371_v25 = vld [vmem:[%s13347_s5 + $0x4c8] sm:$0xff]  ;;  %v373_v26 = vld [vmem:[%s13347_s5 + $0x4d0] sm:$0xff] }
  0x4e   :  { %370 = vst [vmem:[#allocation2 + $0x4c0] sm:$0xff] %v369_v24  ;;  %372 = vst [vmem:[#allocation2 + $0x4c8] sm:$0xff] %v371_v25  ;;  %v375_v27 = vld [vmem:[%s13347_s5 + $0x4d8] sm:$0xff]  ;;  %v377_v28 = vld [vmem:[%s13347_s5 + $0x4e0] sm:$0xff] }
  0x4f   :  { %374 = vst [vmem:[#allocation2 + $0x4d0] sm:$0xff] %v373_v26  ;;  %v379_v29 = vld [vmem:[%s13347_s5 + $0x4e8] sm:$0xff]  ;;  %376 = vst [vmem:[#allocation2 + $0x4d8] sm:$0xff] %v375_v27  ;;  %v381_v30 = vld [vmem:[%s13347_s5 + $0x4f0] sm:$0xff] }
  0x50   :  { %378 = vst [vmem:[#allocation2 + $0x4e0] sm:$0xff] %v377_v28  ;;  %380 = vst [vmem:[#allocation2 + $0x4e8] sm:$0xff] %v379_v29  ;;  %v383_v31 = vld [vmem:[%s13347_s5 + $0x4f8] sm:$0xff]  ;;  %v385_v32 = vld [vmem:[%s13347_s5 + $0x500] sm:$0xff] }
  0x51   :  { %382 = vst [vmem:[#allocation2 + $0x4f0] sm:$0xff] %v381_v30  ;;  %384 = vst [vmem:[#allocation2 + $0x4f8] sm:$0xff] %v383_v31  ;;  %v387_v33 = vld [vmem:[%s13347_s5 + $0x508] sm:$0xff]  ;;  %v389_v34 = vld [vmem:[%s13347_s5 + $0x510] sm:$0xff] }
  0x52   :  { %386 = vst [vmem:[#allocation2 + $0x500] sm:$0xff] %v385_v32  ;;  %v391_v35 = vld [vmem:[%s13347_s5 + $0x518] sm:$0xff]  ;;  %388 = vst [vmem:[#allocation2 + $0x508] sm:$0xff] %v387_v33  ;;  %v393_v36 = vld [vmem:[%s13347_s5 + $0x520] sm:$0xff] }
  0x53   :  { %390 = vst [vmem:[#allocation2 + $0x510] sm:$0xff] %v389_v34  ;;  %392 = vst [vmem:[#allocation2 + $0x518] sm:$0xff] %v391_v35  ;;  %v395_v37 = vld [vmem:[%s13347_s5 + $0x528] sm:$0xff]  ;;  %v397_v38 = vld [vmem:[%s13347_s5 + $0x530] sm:$0xff] }
  0x54   :  { %394 = vst [vmem:[#allocation2 + $0x520] sm:$0xff] %v393_v36  ;;  %396 = vst [vmem:[#allocation2 + $0x528] sm:$0xff] %v395_v37  ;;  %v399_v39 = vld [vmem:[%s13347_s5 + $0x538] sm:$0xff]  ;;  %v401_v40 = vld [vmem:[%s13347_s5 + $0x540] sm:$0xff] }
  0x55   :  { %398 = vst [vmem:[#allocation2 + $0x530] sm:$0xff] %v397_v38  ;;  %v403_v41 = vld [vmem:[%s13347_s5 + $0x548] sm:$0xff]  ;;  %400 = vst [vmem:[#allocation2 + $0x538] sm:$0xff] %v399_v39  ;;  %v405_v42 = vld [vmem:[%s13347_s5 + $0x550] sm:$0xff] }
  0x56   :  { %402 = vst [vmem:[#allocation2 + $0x540] sm:$0xff] %v401_v40  ;;  %404 = vst [vmem:[#allocation2 + $0x548] sm:$0xff] %v403_v41  ;;  %v407_v43 = vld [vmem:[%s13347_s5 + $0x558] sm:$0xff]  ;;  %v409_v44 = vld [vmem:[%s13347_s5 + $0x560] sm:$0xff] }
  0x57   :  { %406 = vst [vmem:[#allocation2 + $0x550] sm:$0xff] %v405_v42  ;;  %408 = vst [vmem:[#allocation2 + $0x558] sm:$0xff] %v407_v43  ;;  %v411_v45 = vld [vmem:[%s13347_s5 + $0x568] sm:$0xff]  ;;  %v413_v46 = vld [vmem:[%s13347_s5 + $0x570] sm:$0xff] }
  0x58   :  { %410 = vst [vmem:[#allocation2 + $0x560] sm:$0xff] %v409_v44  ;;  %v415_v47 = vld [vmem:[%s13347_s5 + $0x578] sm:$0xff]  ;;  %412 = vst [vmem:[#allocation2 + $0x568] sm:$0xff] %v411_v45  ;;  %v417_v48 = vld [vmem:[%s13347_s5 + $0x580] sm:$0xff] }
  0x59   :  { %414 = vst [vmem:[#allocation2 + $0x570] sm:$0xff] %v413_v46  ;;  %416 = vst [vmem:[#allocation2 + $0x578] sm:$0xff] %v415_v47  ;;  %v419_v49 = vld [vmem:[%s13347_s5 + $0x588] sm:$0xff]  ;;  %v421_v50 = vld [vmem:[%s13347_s5 + $0x590] sm:$0xff] }
  0x5a   :  { %418 = vst [vmem:[#allocation2 + $0x580] sm:$0xff] %v417_v48  ;;  %420 = vst [vmem:[#allocation2 + $0x588] sm:$0xff] %v419_v49  ;;  %v423_v51 = vld [vmem:[%s13347_s5 + $0x598] sm:$0xff]  ;;  %v425_v52 = vld [vmem:[%s13347_s5 + $0x5a0] sm:$0xff] }
  0x5b   :  { %422 = vst [vmem:[#allocation2 + $0x590] sm:$0xff] %v421_v50  ;;  %v427_v53 = vld [vmem:[%s13347_s5 + $0x5a8] sm:$0xff]  ;;  %424 = vst [vmem:[#allocation2 + $0x598] sm:$0xff] %v423_v51  ;;  %v429_v54 = vld [vmem:[%s13347_s5 + $0x5b0] sm:$0xff] }
  0x5c   :  { %426 = vst [vmem:[#allocation2 + $0x5a0] sm:$0xff] %v425_v52  ;;  %428 = vst [vmem:[#allocation2 + $0x5a8] sm:$0xff] %v427_v53  ;;  %v431_v55 = vld [vmem:[%s13347_s5 + $0x5b8] sm:$0xff]  ;;  %v433_v56 = vld [vmem:[%s13347_s5 + $0x5c0] sm:$0xff] }
  0x5d   :  { %430 = vst [vmem:[#allocation2 + $0x5b0] sm:$0xff] %v429_v54  ;;  %432 = vst [vmem:[#allocation2 + $0x5b8] sm:$0xff] %v431_v55  ;;  %v435_v57 = vld [vmem:[%s13347_s5 + $0x5c8] sm:$0xff]  ;;  %v437_v58 = vld [vmem:[%s13347_s5 + $0x5d0] sm:$0xff] }
  0x5e   :  { %434 = vst [vmem:[#allocation2 + $0x5c0] sm:$0xff] %v433_v56  ;;  %v439_v59 = vld [vmem:[%s13347_s5 + $0x5d8] sm:$0xff]  ;;  %436 = vst [vmem:[#allocation2 + $0x5c8] sm:$0xff] %v435_v57  ;;  %v441_v60 = vld [vmem:[%s13347_s5 + $0x5e0] sm:$0xff] }
  0x5f   :  { %438 = vst [vmem:[#allocation2 + $0x5d0] sm:$0xff] %v437_v58  ;;  %440 = vst [vmem:[#allocation2 + $0x5d8] sm:$0xff] %v439_v59  ;;  %v443_v61 = vld [vmem:[%s13347_s5 + $0x5e8] sm:$0xff]  ;;  %v445_v62 = vld [vmem:[%s13347_s5 + $0x5f0] sm:$0xff] }
  0x60   :  { %442 = vst [vmem:[#allocation2 + $0x5e0] sm:$0xff] %v441_v60  ;;  %444 = vst [vmem:[#allocation2 + $0x5e8] sm:$0xff] %v443_v61  ;;  %v447_v63 = vld [vmem:[%s13347_s5 + $0x5f8] sm:$0xff]  ;;  %v449_v0 = vld [vmem:[%s13347_s5 + $0x600] sm:$0xff] }
  0x61   :  { %446 = vst [vmem:[#allocation2 + $0x5f0] sm:$0xff] %v445_v62  ;;  %v451_v1 = vld [vmem:[%s13347_s5 + $0x608] sm:$0xff]  ;;  %448 = vst [vmem:[#allocation2 + $0x5f8] sm:$0xff] %v447_v63  ;;  %v453_v2 = vld [vmem:[%s13347_s5 + $0x610] sm:$0xff] }
  0x62   :  { %450 = vst [vmem:[#allocation2 + $0x600] sm:$0xff] %v449_v0  ;;  %452 = vst [vmem:[#allocation2 + $0x608] sm:$0xff] %v451_v1  ;;  %v455_v3 = vld [vmem:[%s13347_s5 + $0x618] sm:$0xff]  ;;  %v457_v4 = vld [vmem:[%s13347_s5 + $0x620] sm:$0xff] }
  0x63   :  { %454 = vst [vmem:[#allocation2 + $0x610] sm:$0xff] %v453_v2  ;;  %456 = vst [vmem:[#allocation2 + $0x618] sm:$0xff] %v455_v3  ;;  %v459_v5 = vld [vmem:[%s13347_s5 + $0x628] sm:$0xff]  ;;  %v461_v6 = vld [vmem:[%s13347_s5 + $0x630] sm:$0xff] }
  0x64   :  { %458 = vst [vmem:[#allocation2 + $0x620] sm:$0xff] %v457_v4  ;;  %v463_v7 = vld [vmem:[%s13347_s5 + $0x638] sm:$0xff]  ;;  %460 = vst [vmem:[#allocation2 + $0x628] sm:$0xff] %v459_v5  ;;  %v465_v8 = vld [vmem:[%s13347_s5 + $0x640] sm:$0xff] }
  0x65   :  { %462 = vst [vmem:[#allocation2 + $0x630] sm:$0xff] %v461_v6  ;;  %464 = vst [vmem:[#allocation2 + $0x638] sm:$0xff] %v463_v7  ;;  %v467_v9 = vld [vmem:[%s13347_s5 + $0x648] sm:$0xff]  ;;  %v469_v10 = vld [vmem:[%s13347_s5 + $0x650] sm:$0xff] }
  0x66   :  { %466 = vst [vmem:[#allocation2 + $0x640] sm:$0xff] %v465_v8  ;;  %468 = vst [vmem:[#allocation2 + $0x648] sm:$0xff] %v467_v9  ;;  %v471_v11 = vld [vmem:[%s13347_s5 + $0x658] sm:$0xff]  ;;  %v473_v12 = vld [vmem:[%s13347_s5 + $0x660] sm:$0xff] }
  0x67   :  { %470 = vst [vmem:[#allocation2 + $0x650] sm:$0xff] %v469_v10  ;;  %v475_v13 = vld [vmem:[%s13347_s5 + $0x668] sm:$0xff]  ;;  %472 = vst [vmem:[#allocation2 + $0x658] sm:$0xff] %v471_v11  ;;  %v477_v14 = vld [vmem:[%s13347_s5 + $0x670] sm:$0xff] }
  0x68   :  { %474 = vst [vmem:[#allocation2 + $0x660] sm:$0xff] %v473_v12  ;;  %476 = vst [vmem:[#allocation2 + $0x668] sm:$0xff] %v475_v13  ;;  %v479_v15 = vld [vmem:[%s13347_s5 + $0x678] sm:$0xff]  ;;  %v481_v16 = vld [vmem:[%s13347_s5 + $0x680] sm:$0xff] }
  0x69   :  { %478 = vst [vmem:[#allocation2 + $0x670] sm:$0xff] %v477_v14  ;;  %480 = vst [vmem:[#allocation2 + $0x678] sm:$0xff] %v479_v15  ;;  %v483_v17 = vld [vmem:[%s13347_s5 + $0x688] sm:$0xff]  ;;  %v485_v18 = vld [vmem:[%s13347_s5 + $0x690] sm:$0xff] }
  0x6a   :  { %482 = vst [vmem:[#allocation2 + $0x680] sm:$0xff] %v481_v16  ;;  %v487_v19 = vld [vmem:[%s13347_s5 + $0x698] sm:$0xff]  ;;  %484 = vst [vmem:[#allocation2 + $0x688] sm:$0xff] %v483_v17  ;;  %v489_v20 = vld [vmem:[%s13347_s5 + $0x6a0] sm:$0xff] }
  0x6b   :  { %486 = vst [vmem:[#allocation2 + $0x690] sm:$0xff] %v485_v18  ;;  %488 = vst [vmem:[#allocation2 + $0x698] sm:$0xff] %v487_v19  ;;  %v491_v21 = vld [vmem:[%s13347_s5 + $0x6a8] sm:$0xff]  ;;  %v493_v22 = vld [vmem:[%s13347_s5 + $0x6b0] sm:$0xff] }
  0x6c   :  { %490 = vst [vmem:[#allocation2 + $0x6a0] sm:$0xff] %v489_v20  ;;  %492 = vst [vmem:[#allocation2 + $0x6a8] sm:$0xff] %v491_v21  ;;  %v495_v23 = vld [vmem:[%s13347_s5 + $0x6b8] sm:$0xff]  ;;  %v497_v24 = vld [vmem:[%s13347_s5 + $0x6c0] sm:$0xff] }
  0x6d   :  { %494 = vst [vmem:[#allocation2 + $0x6b0] sm:$0xff] %v493_v22  ;;  %v499_v25 = vld [vmem:[%s13347_s5 + $0x6c8] sm:$0xff]  ;;  %496 = vst [vmem:[#allocation2 + $0x6b8] sm:$0xff] %v495_v23  ;;  %v501_v26 = vld [vmem:[%s13347_s5 + $0x6d0] sm:$0xff] }
  0x6e   :  { %498 = vst [vmem:[#allocation2 + $0x6c0] sm:$0xff] %v497_v24  ;;  %500 = vst [vmem:[#allocation2 + $0x6c8] sm:$0xff] %v499_v25  ;;  %v503_v27 = vld [vmem:[%s13347_s5 + $0x6d8] sm:$0xff]  ;;  %v505_v28 = vld [vmem:[%s13347_s5 + $0x6e0] sm:$0xff] }
  0x6f   :  { %502 = vst [vmem:[#allocation2 + $0x6d0] sm:$0xff] %v501_v26  ;;  %504 = vst [vmem:[#allocation2 + $0x6d8] sm:$0xff] %v503_v27  ;;  %v507_v29 = vld [vmem:[%s13347_s5 + $0x6e8] sm:$0xff]  ;;  %v509_v30 = vld [vmem:[%s13347_s5 + $0x6f0] sm:$0xff] }
  0x70   :  { %506 = vst [vmem:[#allocation2 + $0x6e0] sm:$0xff] %v505_v28  ;;  %v511_v31 = vld [vmem:[%s13347_s5 + $0x6f8] sm:$0xff]  ;;  %508 = vst [vmem:[#allocation2 + $0x6e8] sm:$0xff] %v507_v29  ;;  %v513_v32 = vld [vmem:[%s13347_s5 + $0x700] sm:$0xff] }
  0x71   :  { %510 = vst [vmem:[#allocation2 + $0x6f0] sm:$0xff] %v509_v30  ;;  %512 = vst [vmem:[#allocation2 + $0x6f8] sm:$0xff] %v511_v31  ;;  %v515_v33 = vld [vmem:[%s13347_s5 + $0x708] sm:$0xff]  ;;  %v517_v34 = vld [vmem:[%s13347_s5 + $0x710] sm:$0xff] }
  0x72   :  { %514 = vst [vmem:[#allocation2 + $0x700] sm:$0xff] %v513_v32  ;;  %516 = vst [vmem:[#allocation2 + $0x708] sm:$0xff] %v515_v33  ;;  %v519_v35 = vld [vmem:[%s13347_s5 + $0x718] sm:$0xff]  ;;  %v521_v36 = vld [vmem:[%s13347_s5 + $0x720] sm:$0xff] }
  0x73   :  { %518 = vst [vmem:[#allocation2 + $0x710] sm:$0xff] %v517_v34  ;;  %v523_v37 = vld [vmem:[%s13347_s5 + $0x728] sm:$0xff]  ;;  %520 = vst [vmem:[#allocation2 + $0x718] sm:$0xff] %v519_v35  ;;  %v525_v38 = vld [vmem:[%s13347_s5 + $0x730] sm:$0xff] }
  0x74   :  { %522 = vst [vmem:[#allocation2 + $0x720] sm:$0xff] %v521_v36  ;;  %524 = vst [vmem:[#allocation2 + $0x728] sm:$0xff] %v523_v37  ;;  %v527_v39 = vld [vmem:[%s13347_s5 + $0x738] sm:$0xff]  ;;  %v529_v40 = vld [vmem:[%s13347_s5 + $0x740] sm:$0xff] }
  0x75   :  { %526 = vst [vmem:[#allocation2 + $0x730] sm:$0xff] %v525_v38  ;;  %528 = vst [vmem:[#allocation2 + $0x738] sm:$0xff] %v527_v39  ;;  %v531_v41 = vld [vmem:[%s13347_s5 + $0x748] sm:$0xff]  ;;  %v533_v42 = vld [vmem:[%s13347_s5 + $0x750] sm:$0xff] }
  0x76   :  { %530 = vst [vmem:[#allocation2 + $0x740] sm:$0xff] %v529_v40  ;;  %v535_v43 = vld [vmem:[%s13347_s5 + $0x758] sm:$0xff]  ;;  %532 = vst [vmem:[#allocation2 + $0x748] sm:$0xff] %v531_v41  ;;  %v537_v44 = vld [vmem:[%s13347_s5 + $0x760] sm:$0xff] }
  0x77   :  { %534 = vst [vmem:[#allocation2 + $0x750] sm:$0xff] %v533_v42  ;;  %536 = vst [vmem:[#allocation2 + $0x758] sm:$0xff] %v535_v43  ;;  %v539_v45 = vld [vmem:[%s13347_s5 + $0x768] sm:$0xff]  ;;  %v541_v46 = vld [vmem:[%s13347_s5 + $0x770] sm:$0xff] }
  0x78   :  { %538 = vst [vmem:[#allocation2 + $0x760] sm:$0xff] %v537_v44  ;;  %540 = vst [vmem:[#allocation2 + $0x768] sm:$0xff] %v539_v45  ;;  %v543_v47 = vld [vmem:[%s13347_s5 + $0x778] sm:$0xff]  ;;  %v545_v48 = vld [vmem:[%s13347_s5 + $0x780] sm:$0xff] }
  0x79   :  { %542 = vst [vmem:[#allocation2 + $0x770] sm:$0xff] %v541_v46  ;;  %v547_v49 = vld [vmem:[%s13347_s5 + $0x788] sm:$0xff]  ;;  %544 = vst [vmem:[#allocation2 + $0x778] sm:$0xff] %v543_v47  ;;  %v549_v50 = vld [vmem:[%s13347_s5 + $0x790] sm:$0xff] }
  0x7a   :  { %546 = vst [vmem:[#allocation2 + $0x780] sm:$0xff] %v545_v48  ;;  %548 = vst [vmem:[#allocation2 + $0x788] sm:$0xff] %v547_v49  ;;  %v551_v51 = vld [vmem:[%s13347_s5 + $0x798] sm:$0xff]  ;;  %v553_v52 = vld [vmem:[%s13347_s5 + $0x7a0] sm:$0xff] }
  0x7b   :  { %550 = vst [vmem:[#allocation2 + $0x790] sm:$0xff] %v549_v50  ;;  %552 = vst [vmem:[#allocation2 + $0x798] sm:$0xff] %v551_v51  ;;  %v555_v53 = vld [vmem:[%s13347_s5 + $0x7a8] sm:$0xff]  ;;  %v557_v54 = vld [vmem:[%s13347_s5 + $0x7b0] sm:$0xff] }
  0x7c   :  { %554 = vst [vmem:[#allocation2 + $0x7a0] sm:$0xff] %v553_v52  ;;  %v559_v55 = vld [vmem:[%s13347_s5 + $0x7b8] sm:$0xff]  ;;  %556 = vst [vmem:[#allocation2 + $0x7a8] sm:$0xff] %v555_v53  ;;  %v561_v56 = vld [vmem:[%s13347_s5 + $0x7c0] sm:$0xff] }
  0x7d   :  { %558 = vst [vmem:[#allocation2 + $0x7b0] sm:$0xff] %v557_v54  ;;  %560 = vst [vmem:[#allocation2 + $0x7b8] sm:$0xff] %v559_v55  ;;  %v563_v57 = vld [vmem:[%s13347_s5 + $0x7c8] sm:$0xff]  ;;  %v565_v58 = vld [vmem:[%s13347_s5 + $0x7d0] sm:$0xff] }
  0x7e   :  { %562 = vst [vmem:[#allocation2 + $0x7c0] sm:$0xff] %v561_v56  ;;  %564 = vst [vmem:[#allocation2 + $0x7c8] sm:$0xff] %v563_v57  ;;  %v567_v59 = vld [vmem:[%s13347_s5 + $0x7d8] sm:$0xff]  ;;  %v569_v60 = vld [vmem:[%s13347_s5 + $0x7e0] sm:$0xff] }
  0x7f   :  { %566 = vst [vmem:[#allocation2 + $0x7d0] sm:$0xff] %v565_v58  ;;  %v571_v61 = vld [vmem:[%s13347_s5 + $0x7e8] sm:$0xff]  ;;  %568 = vst [vmem:[#allocation2 + $0x7d8] sm:$0xff] %v567_v59  ;;  %v573_v62 = vld [vmem:[%s13347_s5 + $0x7f0] sm:$0xff] }
  0x80   :  { %570 = vst [vmem:[#allocation2 + $0x7e0] sm:$0xff] %v569_v60  ;;  %572 = vst [vmem:[#allocation2 + $0x7e8] sm:$0xff] %v571_v61  ;;  %v575_v63 = vld [vmem:[%s13347_s5 + $0x7f8] sm:$0xff]  ;;  %v577_v0 = vld [vmem:[%s13347_s5 + $0x800] sm:$0xff] }
  0x81   :  { %574 = vst [vmem:[#allocation2 + $0x7f0] sm:$0xff] %v573_v62  ;;  %576 = vst [vmem:[#allocation2 + $0x7f8] sm:$0xff] %v575_v63  ;;  %v579_v1 = vld [vmem:[%s13347_s5 + $0x808] sm:$0xff]  ;;  %v581_v2 = vld [vmem:[%s13347_s5 + $0x810] sm:$0xff] }
  0x82   :  { %578 = vst [vmem:[#allocation2 + $0x800] sm:$0xff] %v577_v0  ;;  %v583_v3 = vld [vmem:[%s13347_s5 + $0x818] sm:$0xff]  ;;  %580 = vst [vmem:[#allocation2 + $0x808] sm:$0xff] %v579_v1  ;;  %v585_v4 = vld [vmem:[%s13347_s5 + $0x820] sm:$0xff] }
  0x83   :  { %582 = vst [vmem:[#allocation2 + $0x810] sm:$0xff] %v581_v2  ;;  %584 = vst [vmem:[#allocation2 + $0x818] sm:$0xff] %v583_v3  ;;  %v587_v5 = vld [vmem:[%s13347_s5 + $0x828] sm:$0xff]  ;;  %v589_v6 = vld [vmem:[%s13347_s5 + $0x830] sm:$0xff] }
  0x84   :  { %586 = vst [vmem:[#allocation2 + $0x820] sm:$0xff] %v585_v4  ;;  %588 = vst [vmem:[#allocation2 + $0x828] sm:$0xff] %v587_v5  ;;  %v591_v7 = vld [vmem:[%s13347_s5 + $0x838] sm:$0xff]  ;;  %v593_v8 = vld [vmem:[%s13347_s5 + $0x840] sm:$0xff] }
  0x85   :  { %590 = vst [vmem:[#allocation2 + $0x830] sm:$0xff] %v589_v6  ;;  %v595_v9 = vld [vmem:[%s13347_s5 + $0x848] sm:$0xff]  ;;  %592 = vst [vmem:[#allocation2 + $0x838] sm:$0xff] %v591_v7  ;;  %v597_v10 = vld [vmem:[%s13347_s5 + $0x850] sm:$0xff] }
  0x86   :  { %594 = vst [vmem:[#allocation2 + $0x840] sm:$0xff] %v593_v8  ;;  %596 = vst [vmem:[#allocation2 + $0x848] sm:$0xff] %v595_v9  ;;  %v599_v11 = vld [vmem:[%s13347_s5 + $0x858] sm:$0xff]  ;;  %v601_v12 = vld [vmem:[%s13347_s5 + $0x860] sm:$0xff] }
  0x87   :  { %598 = vst [vmem:[#allocation2 + $0x850] sm:$0xff] %v597_v10  ;;  %600 = vst [vmem:[#allocation2 + $0x858] sm:$0xff] %v599_v11  ;;  %v603_v13 = vld [vmem:[%s13347_s5 + $0x868] sm:$0xff]  ;;  %v605_v14 = vld [vmem:[%s13347_s5 + $0x870] sm:$0xff] }
  0x88   :  { %602 = vst [vmem:[#allocation2 + $0x860] sm:$0xff] %v601_v12  ;;  %v607_v15 = vld [vmem:[%s13347_s5 + $0x878] sm:$0xff]  ;;  %604 = vst [vmem:[#allocation2 + $0x868] sm:$0xff] %v603_v13  ;;  %v609_v16 = vld [vmem:[%s13347_s5 + $0x880] sm:$0xff] }
  0x89   :  { %606 = vst [vmem:[#allocation2 + $0x870] sm:$0xff] %v605_v14  ;;  %608 = vst [vmem:[#allocation2 + $0x878] sm:$0xff] %v607_v15  ;;  %v611_v17 = vld [vmem:[%s13347_s5 + $0x888] sm:$0xff]  ;;  %v613_v18 = vld [vmem:[%s13347_s5 + $0x890] sm:$0xff] }
  0x8a   :  { %610 = vst [vmem:[#allocation2 + $0x880] sm:$0xff] %v609_v16  ;;  %612 = vst [vmem:[#allocation2 + $0x888] sm:$0xff] %v611_v17  ;;  %v615_v19 = vld [vmem:[%s13347_s5 + $0x898] sm:$0xff]  ;;  %v617_v20 = vld [vmem:[%s13347_s5 + $0x8a0] sm:$0xff] }
  0x8b   :  { %614 = vst [vmem:[#allocation2 + $0x890] sm:$0xff] %v613_v18  ;;  %v619_v21 = vld [vmem:[%s13347_s5 + $0x8a8] sm:$0xff]  ;;  %616 = vst [vmem:[#allocation2 + $0x898] sm:$0xff] %v615_v19  ;;  %v621_v22 = vld [vmem:[%s13347_s5 + $0x8b0] sm:$0xff] }
  0x8c   :  { %618 = vst [vmem:[#allocation2 + $0x8a0] sm:$0xff] %v617_v20  ;;  %620 = vst [vmem:[#allocation2 + $0x8a8] sm:$0xff] %v619_v21  ;;  %v623_v23 = vld [vmem:[%s13347_s5 + $0x8b8] sm:$0xff]  ;;  %v625_v24 = vld [vmem:[%s13347_s5 + $0x8c0] sm:$0xff] }
  0x8d   :  { %622 = vst [vmem:[#allocation2 + $0x8b0] sm:$0xff] %v621_v22  ;;  %624 = vst [vmem:[#allocation2 + $0x8b8] sm:$0xff] %v623_v23  ;;  %v627_v25 = vld [vmem:[%s13347_s5 + $0x8c8] sm:$0xff]  ;;  %v629_v26 = vld [vmem:[%s13347_s5 + $0x8d0] sm:$0xff] }
  0x8e   :  { %626 = vst [vmem:[#allocation2 + $0x8c0] sm:$0xff] %v625_v24  ;;  %v631_v27 = vld [vmem:[%s13347_s5 + $0x8d8] sm:$0xff]  ;;  %628 = vst [vmem:[#allocation2 + $0x8c8] sm:$0xff] %v627_v25  ;;  %v633_v28 = vld [vmem:[%s13347_s5 + $0x8e0] sm:$0xff] }
  0x8f   :  { %630 = vst [vmem:[#allocation2 + $0x8d0] sm:$0xff] %v629_v26  ;;  %632 = vst [vmem:[#allocation2 + $0x8d8] sm:$0xff] %v631_v27  ;;  %v635_v29 = vld [vmem:[%s13347_s5 + $0x8e8] sm:$0xff]  ;;  %v637_v30 = vld [vmem:[%s13347_s5 + $0x8f0] sm:$0xff] }
  0x90   :  { %634 = vst [vmem:[#allocation2 + $0x8e0] sm:$0xff] %v633_v28  ;;  %636 = vst [vmem:[#allocation2 + $0x8e8] sm:$0xff] %v635_v29  ;;  %v639_v31 = vld [vmem:[%s13347_s5 + $0x8f8] sm:$0xff]  ;;  %v641_v32 = vld [vmem:[%s13347_s5 + $0x900] sm:$0xff] }
  0x91   :  { %638 = vst [vmem:[#allocation2 + $0x8f0] sm:$0xff] %v637_v30  ;;  %v643_v33 = vld [vmem:[%s13347_s5 + $0x908] sm:$0xff]  ;;  %640 = vst [vmem:[#allocation2 + $0x8f8] sm:$0xff] %v639_v31  ;;  %v645_v34 = vld [vmem:[%s13347_s5 + $0x910] sm:$0xff] }
  0x92   :  { %642 = vst [vmem:[#allocation2 + $0x900] sm:$0xff] %v641_v32  ;;  %644 = vst [vmem:[#allocation2 + $0x908] sm:$0xff] %v643_v33  ;;  %v647_v35 = vld [vmem:[%s13347_s5 + $0x918] sm:$0xff]  ;;  %v649_v36 = vld [vmem:[%s13347_s5 + $0x920] sm:$0xff] }
  0x93   :  { %646 = vst [vmem:[#allocation2 + $0x910] sm:$0xff] %v645_v34  ;;  %648 = vst [vmem:[#allocation2 + $0x918] sm:$0xff] %v647_v35  ;;  %v651_v37 = vld [vmem:[%s13347_s5 + $0x928] sm:$0xff]  ;;  %v653_v38 = vld [vmem:[%s13347_s5 + $0x930] sm:$0xff] }
  0x94   :  { %650 = vst [vmem:[#allocation2 + $0x920] sm:$0xff] %v649_v36  ;;  %v655_v39 = vld [vmem:[%s13347_s5 + $0x938] sm:$0xff]  ;;  %652 = vst [vmem:[#allocation2 + $0x928] sm:$0xff] %v651_v37  ;;  %v657_v40 = vld [vmem:[%s13347_s5 + $0x940] sm:$0xff] }
  0x95   :  { %654 = vst [vmem:[#allocation2 + $0x930] sm:$0xff] %v653_v38  ;;  %656 = vst [vmem:[#allocation2 + $0x938] sm:$0xff] %v655_v39  ;;  %v659_v41 = vld [vmem:[%s13347_s5 + $0x948] sm:$0xff]  ;;  %v661_v42 = vld [vmem:[%s13347_s5 + $0x950] sm:$0xff] }
  0x96   :  { %658 = vst [vmem:[#allocation2 + $0x940] sm:$0xff] %v657_v40  ;;  %660 = vst [vmem:[#allocation2 + $0x948] sm:$0xff] %v659_v41  ;;  %v663_v43 = vld [vmem:[%s13347_s5 + $0x958] sm:$0xff]  ;;  %v665_v44 = vld [vmem:[%s13347_s5 + $0x960] sm:$0xff] }
  0x97   :  { %662 = vst [vmem:[#allocation2 + $0x950] sm:$0xff] %v661_v42  ;;  %v667_v45 = vld [vmem:[%s13347_s5 + $0x968] sm:$0xff]  ;;  %664 = vst [vmem:[#allocation2 + $0x958] sm:$0xff] %v663_v43  ;;  %v669_v46 = vld [vmem:[%s13347_s5 + $0x970] sm:$0xff] }
  0x98   :  { %666 = vst [vmem:[#allocation2 + $0x960] sm:$0xff] %v665_v44  ;;  %668 = vst [vmem:[#allocation2 + $0x968] sm:$0xff] %v667_v45  ;;  %v671_v47 = vld [vmem:[%s13347_s5 + $0x978] sm:$0xff]  ;;  %v673_v48 = vld [vmem:[%s13347_s5 + $0x980] sm:$0xff] }
  0x99   :  { %670 = vst [vmem:[#allocation2 + $0x970] sm:$0xff] %v669_v46  ;;  %672 = vst [vmem:[#allocation2 + $0x978] sm:$0xff] %v671_v47  ;;  %v675_v49 = vld [vmem:[%s13347_s5 + $0x988] sm:$0xff]  ;;  %v677_v50 = vld [vmem:[%s13347_s5 + $0x990] sm:$0xff] }
  0x9a   :  { %674 = vst [vmem:[#allocation2 + $0x980] sm:$0xff] %v673_v48  ;;  %v679_v51 = vld [vmem:[%s13347_s5 + $0x998] sm:$0xff]  ;;  %676 = vst [vmem:[#allocation2 + $0x988] sm:$0xff] %v675_v49  ;;  %v681_v52 = vld [vmem:[%s13347_s5 + $0x9a0] sm:$0xff] }
  0x9b   :  { %678 = vst [vmem:[#allocation2 + $0x990] sm:$0xff] %v677_v50  ;;  %680 = vst [vmem:[#allocation2 + $0x998] sm:$0xff] %v679_v51  ;;  %v683_v53 = vld [vmem:[%s13347_s5 + $0x9a8] sm:$0xff]  ;;  %v685_v54 = vld [vmem:[%s13347_s5 + $0x9b0] sm:$0xff] }
  0x9c   :  { %682 = vst [vmem:[#allocation2 + $0x9a0] sm:$0xff] %v681_v52  ;;  %684 = vst [vmem:[#allocation2 + $0x9a8] sm:$0xff] %v683_v53  ;;  %v687_v55 = vld [vmem:[%s13347_s5 + $0x9b8] sm:$0xff]  ;;  %v689_v56 = vld [vmem:[%s13347_s5 + $0x9c0] sm:$0xff] }
  0x9d   :  { %686 = vst [vmem:[#allocation2 + $0x9b0] sm:$0xff] %v685_v54  ;;  %v691_v57 = vld [vmem:[%s13347_s5 + $0x9c8] sm:$0xff]  ;;  %688 = vst [vmem:[#allocation2 + $0x9b8] sm:$0xff] %v687_v55  ;;  %v693_v58 = vld [vmem:[%s13347_s5 + $0x9d0] sm:$0xff] }
  0x9e   :  { %690 = vst [vmem:[#allocation2 + $0x9c0] sm:$0xff] %v689_v56  ;;  %692 = vst [vmem:[#allocation2 + $0x9c8] sm:$0xff] %v691_v57  ;;  %v695_v59 = vld [vmem:[%s13347_s5 + $0x9d8] sm:$0xff]  ;;  %v697_v60 = vld [vmem:[%s13347_s5 + $0x9e0] sm:$0xff] }
  0x9f   :  { %694 = vst [vmem:[#allocation2 + $0x9d0] sm:$0xff] %v693_v58  ;;  %696 = vst [vmem:[#allocation2 + $0x9d8] sm:$0xff] %v695_v59  ;;  %v699_v61 = vld [vmem:[%s13347_s5 + $0x9e8] sm:$0xff]  ;;  %v701_v62 = vld [vmem:[%s13347_s5 + $0x9f0] sm:$0xff] }
  0xa0   :  { %698 = vst [vmem:[#allocation2 + $0x9e0] sm:$0xff] %v697_v60  ;;  %v703_v63 = vld [vmem:[%s13347_s5 + $0x9f8] sm:$0xff]  ;;  %700 = vst [vmem:[#allocation2 + $0x9e8] sm:$0xff] %v699_v61  ;;  %v705_v0 = vld [vmem:[%s13347_s5 + $0xa00] sm:$0xff] }
  0xa1   :  { %702 = vst [vmem:[#allocation2 + $0x9f0] sm:$0xff] %v701_v62  ;;  %704 = vst [vmem:[#allocation2 + $0x9f8] sm:$0xff] %v703_v63  ;;  %v707_v1 = vld [vmem:[%s13347_s5 + $0xa08] sm:$0xff]  ;;  %v709_v2 = vld [vmem:[%s13347_s5 + $0xa10] sm:$0xff] }
  0xa2   :  { %706 = vst [vmem:[#allocation2 + $0xa00] sm:$0xff] %v705_v0  ;;  %708 = vst [vmem:[#allocation2 + $0xa08] sm:$0xff] %v707_v1  ;;  %v711_v3 = vld [vmem:[%s13347_s5 + $0xa18] sm:$0xff]  ;;  %v713_v4 = vld [vmem:[%s13347_s5 + $0xa20] sm:$0xff] }
  0xa3   :  { %710 = vst [vmem:[#allocation2 + $0xa10] sm:$0xff] %v709_v2  ;;  %v715_v5 = vld [vmem:[%s13347_s5 + $0xa28] sm:$0xff]  ;;  %712 = vst [vmem:[#allocation2 + $0xa18] sm:$0xff] %v711_v3  ;;  %v717_v6 = vld [vmem:[%s13347_s5 + $0xa30] sm:$0xff] }
  0xa4   :  { %714 = vst [vmem:[#allocation2 + $0xa20] sm:$0xff] %v713_v4  ;;  %716 = vst [vmem:[#allocation2 + $0xa28] sm:$0xff] %v715_v5  ;;  %v719_v7 = vld [vmem:[%s13347_s5 + $0xa38] sm:$0xff]  ;;  %v721_v8 = vld [vmem:[%s13347_s5 + $0xa40] sm:$0xff] }
  0xa5   :  { %718 = vst [vmem:[#allocation2 + $0xa30] sm:$0xff] %v717_v6  ;;  %720 = vst [vmem:[#allocation2 + $0xa38] sm:$0xff] %v719_v7  ;;  %v723_v9 = vld [vmem:[%s13347_s5 + $0xa48] sm:$0xff]  ;;  %v725_v10 = vld [vmem:[%s13347_s5 + $0xa50] sm:$0xff] }
  0xa6   :  { %722 = vst [vmem:[#allocation2 + $0xa40] sm:$0xff] %v721_v8  ;;  %v727_v11 = vld [vmem:[%s13347_s5 + $0xa58] sm:$0xff]  ;;  %724 = vst [vmem:[#allocation2 + $0xa48] sm:$0xff] %v723_v9  ;;  %v729_v12 = vld [vmem:[%s13347_s5 + $0xa60] sm:$0xff] }
  0xa7   :  { %726 = vst [vmem:[#allocation2 + $0xa50] sm:$0xff] %v725_v10  ;;  %728 = vst [vmem:[#allocation2 + $0xa58] sm:$0xff] %v727_v11  ;;  %v731_v13 = vld [vmem:[%s13347_s5 + $0xa68] sm:$0xff]  ;;  %v733_v14 = vld [vmem:[%s13347_s5 + $0xa70] sm:$0xff] }
  0xa8   :  { %730 = vst [vmem:[#allocation2 + $0xa60] sm:$0xff] %v729_v12  ;;  %732 = vst [vmem:[#allocation2 + $0xa68] sm:$0xff] %v731_v13  ;;  %v735_v15 = vld [vmem:[%s13347_s5 + $0xa78] sm:$0xff]  ;;  %v737_v16 = vld [vmem:[%s13347_s5 + $0xa80] sm:$0xff] }
  0xa9   :  { %734 = vst [vmem:[#allocation2 + $0xa70] sm:$0xff] %v733_v14  ;;  %v739_v17 = vld [vmem:[%s13347_s5 + $0xa88] sm:$0xff]  ;;  %736 = vst [vmem:[#allocation2 + $0xa78] sm:$0xff] %v735_v15  ;;  %v741_v18 = vld [vmem:[%s13347_s5 + $0xa90] sm:$0xff] }
  0xaa   :  { %738 = vst [vmem:[#allocation2 + $0xa80] sm:$0xff] %v737_v16  ;;  %740 = vst [vmem:[#allocation2 + $0xa88] sm:$0xff] %v739_v17  ;;  %v743_v19 = vld [vmem:[%s13347_s5 + $0xa98] sm:$0xff]  ;;  %v745_v20 = vld [vmem:[%s13347_s5 + $0xaa0] sm:$0xff] }
  0xab   :  { %742 = vst [vmem:[#allocation2 + $0xa90] sm:$0xff] %v741_v18  ;;  %744 = vst [vmem:[#allocation2 + $0xa98] sm:$0xff] %v743_v19  ;;  %v747_v21 = vld [vmem:[%s13347_s5 + $0xaa8] sm:$0xff]  ;;  %v749_v22 = vld [vmem:[%s13347_s5 + $0xab0] sm:$0xff] }
  0xac   :  { %746 = vst [vmem:[#allocation2 + $0xaa0] sm:$0xff] %v745_v20  ;;  %v751_v23 = vld [vmem:[%s13347_s5 + $0xab8] sm:$0xff]  ;;  %748 = vst [vmem:[#allocation2 + $0xaa8] sm:$0xff] %v747_v21  ;;  %v753_v24 = vld [vmem:[%s13347_s5 + $0xac0] sm:$0xff] }
  0xad   :  { %750 = vst [vmem:[#allocation2 + $0xab0] sm:$0xff] %v749_v22  ;;  %752 = vst [vmem:[#allocation2 + $0xab8] sm:$0xff] %v751_v23  ;;  %v755_v25 = vld [vmem:[%s13347_s5 + $0xac8] sm:$0xff]  ;;  %v757_v26 = vld [vmem:[%s13347_s5 + $0xad0] sm:$0xff] }
  0xae   :  { %754 = vst [vmem:[#allocation2 + $0xac0] sm:$0xff] %v753_v24  ;;  %756 = vst [vmem:[#allocation2 + $0xac8] sm:$0xff] %v755_v25  ;;  %v759_v27 = vld [vmem:[%s13347_s5 + $0xad8] sm:$0xff]  ;;  %v761_v28 = vld [vmem:[%s13347_s5 + $0xae0] sm:$0xff] }
  0xaf   :  { %758 = vst [vmem:[#allocation2 + $0xad0] sm:$0xff] %v757_v26  ;;  %v763_v29 = vld [vmem:[%s13347_s5 + $0xae8] sm:$0xff]  ;;  %760 = vst [vmem:[#allocation2 + $0xad8] sm:$0xff] %v759_v27  ;;  %v765_v30 = vld [vmem:[%s13347_s5 + $0xaf0] sm:$0xff] }
  0xb0   :  { %762 = vst [vmem:[#allocation2 + $0xae0] sm:$0xff] %v761_v28  ;;  %764 = vst [vmem:[#allocation2 + $0xae8] sm:$0xff] %v763_v29  ;;  %v767_v31 = vld [vmem:[%s13347_s5 + $0xaf8] sm:$0xff]  ;;  %v769_v32 = vld [vmem:[%s13347_s5 + $0xb00] sm:$0xff] }
  0xb1   :  { %766 = vst [vmem:[#allocation2 + $0xaf0] sm:$0xff] %v765_v30  ;;  %768 = vst [vmem:[#allocation2 + $0xaf8] sm:$0xff] %v767_v31  ;;  %v771_v33 = vld [vmem:[%s13347_s5 + $0xb08] sm:$0xff]  ;;  %v773_v34 = vld [vmem:[%s13347_s5 + $0xb10] sm:$0xff] }
  0xb2   :  { %770 = vst [vmem:[#allocation2 + $0xb00] sm:$0xff] %v769_v32  ;;  %v775_v35 = vld [vmem:[%s13347_s5 + $0xb18] sm:$0xff]  ;;  %772 = vst [vmem:[#allocation2 + $0xb08] sm:$0xff] %v771_v33  ;;  %v777_v36 = vld [vmem:[%s13347_s5 + $0xb20] sm:$0xff] }
  0xb3   :  { %774 = vst [vmem:[#allocation2 + $0xb10] sm:$0xff] %v773_v34  ;;  %776 = vst [vmem:[#allocation2 + $0xb18] sm:$0xff] %v775_v35  ;;  %v779_v37 = vld [vmem:[%s13347_s5 + $0xb28] sm:$0xff]  ;;  %v781_v38 = vld [vmem:[%s13347_s5 + $0xb30] sm:$0xff] }
  0xb4   :  { %778 = vst [vmem:[#allocation2 + $0xb20] sm:$0xff] %v777_v36  ;;  %780 = vst [vmem:[#allocation2 + $0xb28] sm:$0xff] %v779_v37  ;;  %v783_v39 = vld [vmem:[%s13347_s5 + $0xb38] sm:$0xff]  ;;  %v785_v40 = vld [vmem:[%s13347_s5 + $0xb40] sm:$0xff] }
  0xb5   :  { %782 = vst [vmem:[#allocation2 + $0xb30] sm:$0xff] %v781_v38  ;;  %v787_v41 = vld [vmem:[%s13347_s5 + $0xb48] sm:$0xff]  ;;  %784 = vst [vmem:[#allocation2 + $0xb38] sm:$0xff] %v783_v39  ;;  %v789_v42 = vld [vmem:[%s13347_s5 + $0xb50] sm:$0xff] }
  0xb6   :  { %786 = vst [vmem:[#allocation2 + $0xb40] sm:$0xff] %v785_v40  ;;  %788 = vst [vmem:[#allocation2 + $0xb48] sm:$0xff] %v787_v41  ;;  %v791_v43 = vld [vmem:[%s13347_s5 + $0xb58] sm:$0xff]  ;;  %v793_v44 = vld [vmem:[%s13347_s5 + $0xb60] sm:$0xff] }
  0xb7   :  { %790 = vst [vmem:[#allocation2 + $0xb50] sm:$0xff] %v789_v42  ;;  %792 = vst [vmem:[#allocation2 + $0xb58] sm:$0xff] %v791_v43  ;;  %v795_v45 = vld [vmem:[%s13347_s5 + $0xb68] sm:$0xff]  ;;  %v797_v46 = vld [vmem:[%s13347_s5 + $0xb70] sm:$0xff] }
  0xb8   :  { %794 = vst [vmem:[#allocation2 + $0xb60] sm:$0xff] %v793_v44  ;;  %v799_v47 = vld [vmem:[%s13347_s5 + $0xb78] sm:$0xff]  ;;  %796 = vst [vmem:[#allocation2 + $0xb68] sm:$0xff] %v795_v45  ;;  %v801_v48 = vld [vmem:[%s13347_s5 + $0xb80] sm:$0xff] }
  0xb9   :  { %798 = vst [vmem:[#allocation2 + $0xb70] sm:$0xff] %v797_v46  ;;  %800 = vst [vmem:[#allocation2 + $0xb78] sm:$0xff] %v799_v47  ;;  %v803_v49 = vld [vmem:[%s13347_s5 + $0xb88] sm:$0xff]  ;;  %v805_v50 = vld [vmem:[%s13347_s5 + $0xb90] sm:$0xff] }
  0xba   :  { %802 = vst [vmem:[#allocation2 + $0xb80] sm:$0xff] %v801_v48  ;;  %804 = vst [vmem:[#allocation2 + $0xb88] sm:$0xff] %v803_v49  ;;  %v807_v51 = vld [vmem:[%s13347_s5 + $0xb98] sm:$0xff]  ;;  %v809_v52 = vld [vmem:[%s13347_s5 + $0xba0] sm:$0xff] }
  0xbb   :  { %806 = vst [vmem:[#allocation2 + $0xb90] sm:$0xff] %v805_v50  ;;  %v811_v53 = vld [vmem:[%s13347_s5 + $0xba8] sm:$0xff]  ;;  %808 = vst [vmem:[#allocation2 + $0xb98] sm:$0xff] %v807_v51  ;;  %v813_v54 = vld [vmem:[%s13347_s5 + $0xbb0] sm:$0xff] }
  0xbc   :  { %810 = vst [vmem:[#allocation2 + $0xba0] sm:$0xff] %v809_v52  ;;  %812 = vst [vmem:[#allocation2 + $0xba8] sm:$0xff] %v811_v53  ;;  %v815_v55 = vld [vmem:[%s13347_s5 + $0xbb8] sm:$0xff]  ;;  %v817_v56 = vld [vmem:[%s13347_s5 + $0xbc0] sm:$0xff] }
  0xbd   :  { %814 = vst [vmem:[#allocation2 + $0xbb0] sm:$0xff] %v813_v54  ;;  %816 = vst [vmem:[#allocation2 + $0xbb8] sm:$0xff] %v815_v55  ;;  %v819_v57 = vld [vmem:[%s13347_s5 + $0xbc8] sm:$0xff]  ;;  %v821_v58 = vld [vmem:[%s13347_s5 + $0xbd0] sm:$0xff] }
  0xbe   :  { %818 = vst [vmem:[#allocation2 + $0xbc0] sm:$0xff] %v817_v56  ;;  %v823_v59 = vld [vmem:[%s13347_s5 + $0xbd8] sm:$0xff]  ;;  %820 = vst [vmem:[#allocation2 + $0xbc8] sm:$0xff] %v819_v57  ;;  %v825_v60 = vld [vmem:[%s13347_s5 + $0xbe0] sm:$0xff] }
  0xbf   :  { %822 = vst [vmem:[#allocation2 + $0xbd0] sm:$0xff] %v821_v58  ;;  %824 = vst [vmem:[#allocation2 + $0xbd8] sm:$0xff] %v823_v59  ;;  %v827_v61 = vld [vmem:[%s13347_s5 + $0xbe8] sm:$0xff]  ;;  %v829_v62 = vld [vmem:[%s13347_s5 + $0xbf0] sm:$0xff] }
  0xc0   :  { %826 = vst [vmem:[#allocation2 + $0xbe0] sm:$0xff] %v825_v60  ;;  %828 = vst [vmem:[#allocation2 + $0xbe8] sm:$0xff] %v827_v61  ;;  %v831_v63 = vld [vmem:[%s13347_s5 + $0xbf8] sm:$0xff]  ;;  %v833_v0 = vld [vmem:[%s13347_s5 + $0xc00] sm:$0xff] }
  0xc1   :  { %830 = vst [vmem:[#allocation2 + $0xbf0] sm:$0xff] %v829_v62  ;;  %v835_v1 = vld [vmem:[%s13347_s5 + $0xc08] sm:$0xff]  ;;  %832 = vst [vmem:[#allocation2 + $0xbf8] sm:$0xff] %v831_v63  ;;  %v837_v2 = vld [vmem:[%s13347_s5 + $0xc10] sm:$0xff] }
  0xc2   :  { %834 = vst [vmem:[#allocation2 + $0xc00] sm:$0xff] %v833_v0  ;;  %836 = vst [vmem:[#allocation2 + $0xc08] sm:$0xff] %v835_v1  ;;  %v839_v3 = vld [vmem:[%s13347_s5 + $0xc18] sm:$0xff]  ;;  %v841_v4 = vld [vmem:[%s13347_s5 + $0xc20] sm:$0xff] }
  0xc3   :  { %838 = vst [vmem:[#allocation2 + $0xc10] sm:$0xff] %v837_v2  ;;  %840 = vst [vmem:[#allocation2 + $0xc18] sm:$0xff] %v839_v3  ;;  %v843_v5 = vld [vmem:[%s13347_s5 + $0xc28] sm:$0xff]  ;;  %v845_v6 = vld [vmem:[%s13347_s5 + $0xc30] sm:$0xff] }
  0xc4   :  { %842 = vst [vmem:[#allocation2 + $0xc20] sm:$0xff] %v841_v4  ;;  %v847_v7 = vld [vmem:[%s13347_s5 + $0xc38] sm:$0xff]  ;;  %844 = vst [vmem:[#allocation2 + $0xc28] sm:$0xff] %v843_v5  ;;  %v849_v8 = vld [vmem:[%s13347_s5 + $0xc40] sm:$0xff] }
  0xc5   :  { %846 = vst [vmem:[#allocation2 + $0xc30] sm:$0xff] %v845_v6  ;;  %848 = vst [vmem:[#allocation2 + $0xc38] sm:$0xff] %v847_v7  ;;  %v851_v9 = vld [vmem:[%s13347_s5 + $0xc48] sm:$0xff]  ;;  %v853_v10 = vld [vmem:[%s13347_s5 + $0xc50] sm:$0xff] }
  0xc6   :  { %850 = vst [vmem:[#allocation2 + $0xc40] sm:$0xff] %v849_v8  ;;  %852 = vst [vmem:[#allocation2 + $0xc48] sm:$0xff] %v851_v9  ;;  %v855_v11 = vld [vmem:[%s13347_s5 + $0xc58] sm:$0xff]  ;;  %v857_v12 = vld [vmem:[%s13347_s5 + $0xc60] sm:$0xff] }
  0xc7   :  { %854 = vst [vmem:[#allocation2 + $0xc50] sm:$0xff] %v853_v10  ;;  %v859_v13 = vld [vmem:[%s13347_s5 + $0xc68] sm:$0xff]  ;;  %856 = vst [vmem:[#allocation2 + $0xc58] sm:$0xff] %v855_v11  ;;  %v861_v14 = vld [vmem:[%s13347_s5 + $0xc70] sm:$0xff] }
  0xc8   :  { %858 = vst [vmem:[#allocation2 + $0xc60] sm:$0xff] %v857_v12  ;;  %860 = vst [vmem:[#allocation2 + $0xc68] sm:$0xff] %v859_v13  ;;  %v863_v15 = vld [vmem:[%s13347_s5 + $0xc78] sm:$0xff] }
  0xc9   :  { %862 = vst [vmem:[#allocation2 + $0xc70] sm:$0xff] %v861_v14  ;;  %864 = vst [vmem:[#allocation2 + $0xc78] sm:$0xff] %v863_v15 }
  0xca   :  { %872 = vsyncadd [#allocation4], 51200  ;;  %v887_v16 = vld [vmem:[%s13343_s1 + $0x8] sm:$0x1]  ;;  %vm935_vm0 = vcmask 1040384   ;;  %v10884_v17 = vmov 0.0  }
  0xcb   :  { %9173 = vmatprep.subr.mxu0 %v10884_v17  ;;  %v886_v18 = vld [vmem:[%s13343_s1] sm:$0xff]  ;;  %9216 = vmatprep.subr.mxu1 %v10884_v17  ;;  %vm10885_vm1 = vmmov 0   ;;  %vm895_vm2 = vcmask 72704   ;;  %v874_v20 = vld [vmem:[%s13342_s0 + $0x8] sm:$0xff]  ;;  %v875_v21 = vld [vmem:[%s13342_s0 + $0x10] sm:$0xff]  ;;  %s10886_s17 = smov 64  }
  0xcc   :  { %9174 = vmatpush3.msk.msra.mxu0 %vm935_vm0, %v887_v16  ;;  %9177 = vmatprep.mubr.msk.f32.mxu0 %vm10885_vm1, %v10884_v17  ;;  %v873_v19 = vld [vmem:[%s13342_s0] sm:$0xff]  ;;  %v876_v22 = vld [vmem:[%s13342_s0 + $0x18] sm:$0xff]  ;;  %v878_v24 = vld [vmem:[%s13342_s0 + $0x28] sm:$0xff]  ;;  %vm1307_vm3 = vcmask 1043456   ;;  %vm1267_vm6 = vcmask 818176  }
  0xcd   :  { %9175 = vmatprep.subr.mxu0 %v10884_v17  ;;  %9242 = vmatprep.mubr.msk.f32.mxu1 %vm10885_vm1, %v10884_v17  ;;  %v877_v23 = vld [vmem:[%s13342_s0 + $0x20] sm:$0xff]  ;;  %v879_v25 = vld [vmem:[%s13342_s0 + $0x30] sm:$0xff]  ;;  %v880_v26 = vld [vmem:[%s13342_s0 + $0x38] sm:$0xff] }
  0xce   :  { %9176 = vmatpush3.msra.mxu0 %v886_v18  ;;  %v881_v27 = vld [vmem:[%s13342_s0 + $0x40] sm:$0xff]  ;;  %v882_v28 = vld [vmem:[%s13342_s0 + $0x48] sm:$0xff]  ;;  %v883_v29 = vld [vmem:[%s13342_s0 + $0x50] sm:$0xff] }
  0xcf   :  { %9178 = vmatmul.mubr.msk.f32.vlgmr.msra.gmra.mxu0 %vm895_vm2, %v873_v19  ;;  %9281 = vmatprep.subr.mxu0 %v10884_v17  ;;  %v884_v30 = vld [vmem:[%s13342_s0 + $0x58] sm:$0xff]  ;;  %v885_v31 = vld [vmem:[%s13342_s0 + $0x60] sm:$0xf] }
  0xd0   :  { %9180 = vmatprep.mubr.msk.f32.mxu0 %vm10885_vm1, %v10884_v17  ;;  %v8024_v52 = vld [vmem:[%s13344_s2] ss:$0 sm:$0xff] }
  0xd3   :  { %9181 = vmatmul.mubr.msk.f32.gmra.mxu0 %vm895_vm2, %v874_v20 }
  0xd4   :  { %9183 = vmatprep.mubr.msk.f32.mxu0 %vm10885_vm1, %v10884_v17 }
  0xd7   :  { %9184 = vmatmul.mubr.msk.f32.gmra.mxu0 %vm895_vm2, %v875_v21 }
  0xd8   :  { %9186 = vmatprep.mubr.msk.f32.mxu0 %vm10885_vm1, %v10884_v17 }
  0xdb   :  { %9187 = vmatmul.mubr.msk.f32.gmra.mxu0 %vm895_vm2, %v876_v22 }
  0xdc   :  { %9189 = vmatprep.mubr.msk.f32.mxu0 %vm10885_vm1, %v10884_v17 }
  0xdf   :  { %9190 = vmatmul.mubr.msk.f32.gmra.mxu0 %vm895_vm2, %v877_v23 }
  0xe0   :  { %9192 = vmatprep.mubr.msk.f32.mxu0 %vm10885_vm1, %v10884_v17 }
  0xe3   :  { %9193 = vmatmul.mubr.msk.f32.gmra.mxu0 %vm895_vm2, %v878_v24 }
  0xe4   :  { %9195 = vmatprep.mubr.msk.f32.mxu0 %vm10885_vm1, %v10884_v17 }
  0xe7   :  { %9196 = vmatmul.mubr.msk.f32.gmra.mxu0 %vm895_vm2, %v879_v25 }
  0xe8   :  { %9198 = vmatprep.mubr.msk.f32.mxu0 %vm10885_vm1, %v10884_v17 }
  0xeb   :  { %9199 = vmatmul.mubr.msk.f32.gmra.mxu0 %vm895_vm2, %v880_v26  ;;  %v1147_v26 = vlaneseq }
  0xec   :  { %9201 = vmatprep.mubr.msk.f32.mxu0 %vm10885_vm1, %v10884_v17 }
  0xef   :  { %9202 = vmatmul.mubr.msk.f32.gmra.mxu0 %vm895_vm2, %v881_v27 }
  0xf0   :  { %9204 = vmatprep.mubr.msk.f32.mxu0 %vm10885_vm1, %v10884_v17 }
  0xf3   :  { %9205 = vmatmul.mubr.msk.f32.gmra.mxu0 %vm895_vm2, %v882_v28 }
  0xf4   :  { %9207 = vmatprep.mubr.msk.f32.mxu0 %vm10885_vm1, %v10884_v17 }
  0xf7   :  { %9208 = vmatmul.mubr.msk.f32.gmra.mxu0 %vm895_vm2, %v883_v29 }
  0xf8   :  { %9210 = vmatprep.mubr.msk.f32.mxu0 %vm10885_vm1, %v10884_v17 }
  0xfb   :  { %9211 = vmatmul.mubr.msk.f32.gmra.mxu0 %vm895_vm2, %v884_v30 }
  0xfc   :  { %9213 = vmatprep.mubr.msk.f32.mxu0 %vm10885_vm1, %v10884_v17 }
  0xff   :  { %9214 = vmatmul.mubr.msk.f32.gmra.mxu0 %vm895_vm2, %v885_v31 }
 0x100   :  { %9307 = vmatprep.mubr.msk.f32.mxu0 %vm10885_vm1, %v10884_v17 }
 0x18f   :  { %v1005_v32 = vpop.f32.mrf.mxu0 }
 0x190   :  { %v1006_v7 = vadd.f32 %v8024_v52, %v1005_v32  ;;  %v12269_v32 = vshrl.u32 %v1147_v26, 7 }
 0x191   :  { %v9179_v33 = vpop.f32.mrf.mxu0 }
 0x193   :  { %v1010_v34 = vpop.f32.mrf.mxu0 }
 0x194   :  { %v1011_v3 = vadd.f32 %v8024_v52, %v1010_v34 }
 0x195   :  { %v9182_v35 = vpop.f32.mrf.mxu0 }
 0x197   :  { %v1015_v36 = vpop.f32.mrf.mxu0 }
 0x198   :  { %v1016_v6 = vadd.f32 %v8024_v52, %v1015_v36 }
 0x199   :  { %v9185_v37 = vpop.f32.mrf.mxu0 }
 0x19b   :  { %v1020_v38 = vpop.f32.mrf.mxu0 }
 0x19c   :  { %v1021_v1 = vadd.f32 %v8024_v52, %v1020_v38 }
 0x19d   :  { %v9188_v39 = vpop.f32.mrf.mxu0 }
 0x19e   :  { %v12283_v39 = vand.u32 127, %v1147_v26 }
 0x19f   :  { %v1025_v40 = vpop.f32.mrf.mxu0 }
 0x1a0   :  { %v1026_v5 = vadd.f32 %v8024_v52, %v1025_v40  ;;  %v8039_v40 = vadd.s32 4294967294, %v12269_v32 }
 0x1a1   :  { %v9191_v41 = vpop.f32.mrf.mxu0 }
 0x1a2   :  { %v1149_v41 = vadd.s32 8, %v12269_v32  ;;  %vm1176_vm4 = vcmp.eq.s32.totalorder %v12283_v39, %v8039_v40  ;;  %v1618_v40 = vld [vmem:[%s13345_s3 + $0x40] sm:$0xff] }
 0x1a3   :  { %v1030_v42 = vpop.f32.mrf.mxu0 }
 0x1a4   :  { %v1031_v63 = vadd.f32 %v8024_v52, %v1030_v42 }
 0x1a5   :  { %v9194_v43 = vpop.f32.mrf.mxu0 }
 0x1a7   :  { %v1035_v44 = vpop.f32.mrf.mxu0 }
 0x1a8   :  { %v1036_v4 = vadd.f32 %v8024_v52, %v1035_v44  ;;  %v1215_v44 = vadd.s32 2, %v12269_v32 }
 0x1a9   :  { %v9197_v45 = vpop.f32.mrf.mxu0 }
 0x1aa   :  { %vm1228_vm5 = vcmp.eq.s32.totalorder %v12283_v39, %v1215_v44 }
 0x1ab   :  { %v1040_v46 = vpop.f32.mrf.mxu0 }
 0x1ac   :  { %v1041_v60 = vadd.f32 %v8024_v52, %v1040_v46 }
 0x1ad   :  { %v9200_v47 = vpop.f32.mrf.mxu0 }
 0x1af   :  { %v1045_v48 = vpop.f32.mrf.mxu0 }
 0x1b0   :  { %v1046_v2 = vadd.f32 %v8024_v52, %v1045_v48 }
 0x1b1   :  { %v9203_v49 = vpop.f32.mrf.mxu0 }
 0x1b2   :  { %v8040_v49 = vadd.s32 4294967294, %v1149_v41 }
 0x1b3   :  { %v1050_v50 = vpop.f32.mrf.mxu0 }
 0x1b4   :  { %v1051_v57 = vadd.f32 %v8024_v52, %v1050_v50  ;;  %vm1177_vm7 = vcmp.eq.s32.totalorder %v12283_v39, %v8040_v49  ;;  %v1617_v49 = vld [vmem:[%s13345_s3 + $0x38] sm:$0xff] }
 0x1b5   :  { %v9206_v51 = vpop.f32.mrf.mxu0 }
 0x1b7   :  { %v1055_v53 = vpop.f32.mrf.mxu0 }
 0x1b8   :  { %v1056_v54 = vadd.f32 %v8024_v52, %v1055_v53  ;;  %v1150_v53 = vadd.s32 16, %v12269_v32 }
 0x1b9   :  { %v9209_v55 = vpop.f32.mrf.mxu0 }
 0x1ba   :  { %1115 = vrot.lane.b32.xlu1 %v1056_v54, %s10886_s17 }
 0x1bb   :  { %v1060_v56 = vpop.f32.mrf.mxu0 }
 0x1bc   :  { %v1061_v0 = vadd.f32 %v8024_v52, %v1060_v56  ;;  %v8052_v56 = vsel %vm1176_vm4, 1.0, %v10884_v17 }
 0x1bd   :  { %v9212_v58 = vpop.f32.mrf.mxu0 }
 0x1be   :  { %1113 = vrot.lane.b32.xlu1 %v1051_v57, %s10886_s17  ;;  %v8065_v58 = vsel %vm1228_vm5, 1.0, %v10884_v17 }
 0x1bf   :  { %v1065_v59 = vpop.f32.mrf.mxu0 }
 0x1c0   :  { %v1066_v61 = vadd.f32 %v8024_v52, %v1065_v59  ;;  %v1216_v52 = vadd.s32 2, %v1149_v41  ;;  %v8041_v59 = vadd.s32 4294967294, %v1150_v53 }
 0x1c1   :  { %v9215_v62 = vpop.f32.mrf.mxu0 }
 0x1c2   :  { %1109 = vrot.lane.b32.xlu1 %v1041_v60, %s10886_s17  ;;  %1119 = vrot.lane.b32.xlu0 %v1066_v61, %s10886_s17  ;;  %10369 = vtanh.f32 %v1066_v61  ;;  %vm1229_vm8 = vcmp.eq.s32.totalorder %v12283_v39, %v1216_v52  ;;  %v1151_v61 = vadd.s32 24, %v12269_v32  ;;  %v1641_v62 = vld [vmem:[%s13345_s3 + $0xf8] sm:$0xff]  ;;  %vm1178_vm9 = vcmp.eq.s32.totalorder %v12283_v39, %v8041_v59  ;;  %v1631_v59 = vld [vmem:[%s13345_s3 + $0xa8] sm:$0xff] }
 0x1c3   :  { %10371 = vtanh.f32 %v1061_v0 }
 0x1c4   :  { %10373 = vtanh.f32 %v1056_v54 }
 0x1c5   :  { %10375 = vtanh.f32 %v1051_v57 }
 0x1c6   :  { %1105 = vrot.lane.b32.xlu1 %v1031_v63, %s10886_s17  ;;  %1117 = vrot.lane.b32.xlu0 %v1061_v0, %s10886_s17  ;;  %10377 = vtanh.f32 %v1046_v2  ;;  %v1640_v0 = vld [vmem:[%s13345_s3 + $0xf0] sm:$0xff] }
 0x1c7   :  { %10379 = vtanh.f32 %v1041_v60  ;;  %v1217_v60 = vadd.s32 2, %v1150_v53 }
 0x1c8   :  { %10381 = vtanh.f32 %v1036_v4 }
 0x1c9   :  { %10383 = vtanh.f32 %v1031_v63  ;;  %v1625_v63 = vld [vmem:[%s13345_s3 + $0x78] sm:$0xff]  ;;  %vm1230_vm10 = vcmp.eq.s32.totalorder %v12283_v39, %v1217_v60  ;;  %v1615_v60 = vld [vmem:[%s13345_s3 + $0x28] sm:$0xff] }
 0x1ca   :  { %1101 = vrot.lane.b32.xlu1 %v1021_v1, %s10886_s17  ;;  %1111 = vrot.lane.b32.xlu0 %v1046_v2, %s10886_s17  ;;  %10385 = vtanh.f32 %v1026_v5  ;;  %v8053_v2 = vsel %vm1177_vm7, 1.0, %v10884_v17 }
 0x1cb   :  { %10387 = vtanh.f32 %v1021_v1  ;;  %v1624_v1 = vld [vmem:[%s13345_s3 + $0x70] sm:$0xff] }
 0x1cc   :  { %10389 = vtanh.f32 %v1016_v6 }
 0x1cd   :  { %10391 = vtanh.f32 %v1011_v3 }
 0x1ce   :  { %1097 = vrot.lane.b32.xlu1 %v1011_v3, %s10886_s17  ;;  %1107 = vrot.lane.b32.xlu0 %v1036_v4, %s10886_s17  ;;  %10393 = vtanh.f32 %v1006_v7  ;;  %v8066_v3 = vsel %vm1229_vm8, 1.0, %v10884_v17  ;;  %v1152_v4 = vadd.s32 32, %v12269_v32 }
 0x1cf   :  { %v10370_v10 = vpop.eup %10369 }
 0x1d0   :  { %v10372_v13 = vpop.eup %10371 }
 0x1d1   :  { %v10374_v18 = vpop.eup %10373 }
 0x1d2   :  { %1103 = vrot.lane.b32.xlu0 %v1026_v5, %s10886_s17  ;;  %v10376_v20 = vpop.eup %10375  ;;  %v8042_v5 = vadd.s32 4294967294, %v1151_v61 }
 0x1d3   :  { %v10378_v23 = vpop.eup %10377 }
 0x1d4   :  { %v10380_v27 = vpop.eup %10379  ;;  %vm1179_vm11 = vcmp.eq.s32.totalorder %v12283_v39, %v8042_v5  ;;  %v1613_v5 = vld [vmem:[%s13345_s3 + $0x18] sm:$0xff] }
 0x1d5   :  { %v10382_v30 = vpop.eup %10381  ;;  %v8055_v26 = vsel %vm1179_vm11, 1.0, %v10884_v17 }
 0x1d6   :  { %1099 = vrot.lane.b32.xlu0 %v1016_v6, %s10886_s17  ;;  %v10384_v33 = vpop.eup %10383  ;;  %v1218_v6 = vadd.s32 2, %v1151_v61  ;;  %v1630_v61 = vld [vmem:[%s13345_s3 + $0xa0] sm:$0xff] }
 0x1d7   :  { %v10386_v37 = vpop.eup %10385 }
 0x1d8   :  { %v10388_v42 = vpop.eup %10387  ;;  %vm1231_vm12 = vcmp.eq.s32.totalorder %v12283_v39, %v1218_v6  ;;  %v1628_v6 = vld [vmem:[%s13345_s3 + $0x90] sm:$0xff] }
 0x1d9   :  { %v10390_v46 = vpop.eup %10389 }
 0x1da   :  { %1095 = vrot.lane.b32.xlu0 %v1006_v7, %s10886_s17  ;;  %v10392_v50 = vpop.eup %10391  ;;  %v1639_v7 = vld [vmem:[%s13345_s3 + $0xe8] sm:$0xff] }
 0x1db   :  { %v10394_v55 = vpop.eup %10393 }
 0x22c   :  { %v1116_v8 = vpop.permute.xlu1 %1115 }
 0x22d   :  { %v12241_v19 = vadd.f32 %v10374_v18, %v1116_v8  ;;  %v1623_v8 = vld [vmem:[%s13345_s3 + $0x68] sm:$0xff]  ;;  %v1153_v18 = vadd.s32 40, %v12269_v32 }
 0x230   :  { %v1114_v9 = vpop.permute.xlu1 %1113 }
 0x231   :  { %v12247_v22 = vadd.f32 %v10376_v20, %v1114_v9  ;;  %v1638_v9 = vld [vmem:[%s13345_s3 + $0xe0] sm:$0xff]  ;;  %v1637_v20 = vld [vmem:[%s13345_s3 + $0xd8] sm:$0xff] }
 0x234   :  { %v1120_v11 = vpop.permute.xlu0 %1119  ;;  %v1110_v14 = vpop.permute.xlu1 %1109 }
 0x235   :  { %v12233_v12 = vadd.f32 %v10370_v10, %v1120_v11  ;;  %v12259_v29 = vadd.f32 %v10380_v27, %v1110_v14  ;;  %v1622_v10 = vld [vmem:[%s13345_s3 + $0x60] sm:$0xff]  ;;  %v8054_v11 = vsel %vm1178_vm9, 1.0, %v10884_v17  ;;  %v8043_v14 = vadd.s32 4294967294, %v1152_v4 }
 0x236   :  { %v8068_v27 = vsel %vm1231_vm12, 1.0, %v10884_v17 }
 0x237   :  { %9217 = vmatpush3.msk.msra.mxu1 %vm1307_vm3, %v12233_v12  ;;  %9282 = vmatpush3.msk.msra.mxu0 %vm1307_vm3, %v12233_v12  ;;  %vm1180_vm13 = vcmp.eq.s32.totalorder %v12283_v39, %v8043_v14  ;;  %v1627_v14 = vld [vmem:[%s13345_s3 + $0x88] sm:$0xff] }
 0x238   :  { %v1118_v15 = vpop.permute.xlu0 %1117  ;;  %9218 = vmatprep.subr.mxu1 %v10884_v17  ;;  %9283 = vmatprep.subr.mxu0 %v10884_v17  ;;  %v1106_v24 = vpop.permute.xlu1 %1105  ;;  %v8056_v41 = vsel %vm1180_vm13, 1.0, %v10884_v17 }
 0x239   :  { %v12239_v16 = vadd.f32 %v10372_v13, %v1118_v15  ;;  %v12273_v36 = vadd.f32 %v10384_v33, %v1106_v24  ;;  %v8067_v13 = vsel %vm1230_vm10, 1.0, %v10884_v17  ;;  %v1219_v15 = vadd.s32 2, %v1152_v4  ;;  %v1620_v24 = vld [vmem:[%s13345_s3 + $0x50] sm:$0xff]  ;;  %v1629_v4 = vld [vmem:[%s13345_s3 + $0x98] sm:$0xff] }
 0x23a   :  { %v1154_v33 = vadd.s32 48, %v12269_v32 }
 0x23b   :  { %9219 = vmatpush3.msra.mxu1 %v12239_v16  ;;  %9284 = vmatpush3.msra.mxu0 %v12239_v16  ;;  %vm1232_vm14 = vcmp.eq.s32.totalorder %v12283_v39, %v1219_v15  ;;  %v1611_v15 = vld [vmem:[%s13345_s3 + $0x8] sm:$0xff] }
 0x23c   :  { %v1112_v21 = vpop.permute.xlu0 %1111  ;;  %9220 = vmatprep.subr.mxu1 %v10884_v17  ;;  %9285 = vmatprep.subr.mxu0 %v10884_v17  ;;  %v1102_v34 = vpop.permute.xlu1 %1101  ;;  %v8045_v44 = vadd.s32 4294967294, %v1154_v33 }
 0x23d   :  { %9221 = vmatpush3.msra.mxu1 %v12241_v19  ;;  %9286 = vmatpush3.msra.mxu0 %v12241_v19  ;;  %v12253_v25 = vadd.f32 %v10378_v23, %v1112_v21  ;;  %v12290_v45 = vadd.f32 %v10388_v42, %v1102_v34  ;;  %v1621_v21 = vld [vmem:[%s13345_s3 + $0x58] sm:$0xff]  ;;  %v1636_v23 = vld [vmem:[%s13345_s3 + $0xd0] sm:$0xff]  ;;  %v1635_v34 = vld [vmem:[%s13345_s3 + $0xc8] sm:$0xff]  ;;  %v8069_v42 = vsel %vm1232_vm14, 1.0, %v10884_v17 }
 0x23e   :  { %9222 = vmatprep.subr.mxu1 %v10884_v17  ;;  %9287 = vmatprep.subr.mxu0 %v10884_v17  ;;  %vm1182_vm2 = vcmp.eq.s32.totalorder %v12283_v39, %v8045_v44 }
 0x23f   :  { %9223 = vmatpush3.msra.mxu1 %v12247_v22  ;;  %9288 = vmatpush3.msra.mxu0 %v12247_v22 }
 0x240   :  { %v1108_v28 = vpop.permute.xlu0 %1107  ;;  %9224 = vmatprep.subr.mxu1 %v10884_v17  ;;  %9289 = vmatprep.subr.mxu0 %v10884_v17  ;;  %v1098_v47 = vpop.permute.xlu1 %1097 }
 0x241   :  { %9225 = vmatpush3.msra.mxu1 %v12253_v25  ;;  %9290 = vmatpush3.msra.mxu0 %v12253_v25  ;;  %v12265_v31 = vadd.f32 %v10382_v30, %v1108_v28  ;;  %v12305_v54 = vadd.f32 %v10392_v50, %v1098_v47  ;;  %v8044_v28 = vadd.s32 4294967294, %v1153_v18  ;;  %v1220_v30 = vadd.s32 2, %v1153_v18  ;;  %v1633_v47 = vld [vmem:[%s13345_s3 + $0xb8] sm:$0xff]  ;;  %v1632_v50 = vld [vmem:[%s13345_s3 + $0xb0] sm:$0xff]  ;;  %v1626_v18 = vld [vmem:[%s13345_s3 + $0x80] sm:$0xff] }
 0x242   :  { %9226 = vmatprep.subr.mxu1 %v10884_v17  ;;  %9291 = vmatprep.subr.mxu0 %v10884_v17 }
 0x243   :  { %9227 = vmatpush3.msra.mxu1 %v12259_v29  ;;  %9292 = vmatpush3.msra.mxu0 %v12259_v29  ;;  %vm1181_vm15 = vcmp.eq.s32.totalorder %v12283_v39, %v8044_v28  ;;  %vm1233_vm0 = vcmp.eq.s32.totalorder %v12283_v39, %v1220_v30 }
 0x244   :  { %v1104_v35 = vpop.permute.xlu0 %1103  ;;  %9228 = vmatprep.subr.mxu1 %v10884_v17  ;;  %9293 = vmatprep.subr.mxu0 %v10884_v17  ;;  %v8057_v52 = vsel %vm1181_vm15, 1.0, %v10884_v17  ;;  %v8070_v53 = vsel %vm1233_vm0, 1.0, %v10884_v17 }
 0x245   :  { %9229 = vmatpush3.msra.mxu1 %v12265_v31  ;;  %9294 = vmatpush3.msra.mxu0 %v12265_v31  ;;  %v12279_v38 = vadd.f32 %v10386_v37, %v1104_v35  ;;  %v1619_v35 = vld [vmem:[%s13345_s3 + $0x48] sm:$0xff]  ;;  %v1634_v37 = vld [vmem:[%s13345_s3 + $0xc0] sm:$0xff] }
 0x246   :  { %9230 = vmatprep.subr.mxu1 %v10884_v17  ;;  %9295 = vmatprep.subr.mxu0 %v10884_v17 }
 0x247   :  { %9231 = vmatpush3.msra.mxu1 %v12273_v36  ;;  %9296 = vmatpush3.msra.mxu0 %v12273_v36 }
 0x248   :  { %v1100_v43 = vpop.permute.xlu0 %1099  ;;  %9232 = vmatprep.subr.mxu1 %v10884_v17  ;;  %9297 = vmatprep.subr.mxu0 %v10884_v17 }
 0x249   :  { %9233 = vmatpush3.msra.mxu1 %v12279_v38  ;;  %9298 = vmatpush3.msra.mxu0 %v12279_v38  ;;  %v12296_v48 = vadd.f32 %v10390_v46, %v1100_v43  ;;  %v1155_v43 = vadd.s32 56, %v12269_v32  ;;  %v1221_v46 = vadd.s32 2, %v1154_v33 }
 0x24a   :  { %9234 = vmatprep.subr.mxu1 %v10884_v17  ;;  %9299 = vmatprep.subr.mxu0 %v10884_v17 }
 0x24b   :  { %9235 = vmatpush3.msra.mxu1 %v12290_v45  ;;  %9300 = vmatpush3.msra.mxu0 %v12290_v45  ;;  %vm1234_vm3 = vcmp.eq.s32.totalorder %v12283_v39, %v1221_v46 }
 0x24c   :  { %v1096_v51 = vpop.permute.xlu0 %1095  ;;  %9236 = vmatprep.subr.mxu1 %v10884_v17  ;;  %9301 = vmatprep.subr.mxu0 %v10884_v17 }
 0x24d   :  { %9237 = vmatpush3.msra.mxu1 %v12296_v48  ;;  %9302 = vmatpush3.msra.mxu0 %v12296_v48  ;;  %v12312_v57 = vadd.f32 %v10394_v55, %v1096_v51  ;;  %v1616_v51 = vld [vmem:[%s13345_s3 + $0x30] sm:$0xff]  ;;  %v8046_v55 = vadd.s32 4294967294, %v1155_v43 }
 0x24e   :  { %9238 = vmatprep.subr.mxu1 %v10884_v17  ;;  %9303 = vmatprep.subr.mxu0 %v10884_v17 }
 0x24f   :  { %9239 = vmatpush3.msra.mxu1 %v12305_v54  ;;  %9304 = vmatpush3.msra.mxu0 %v12305_v54  ;;  %vm1183_vm4 = vcmp.eq.s32.totalorder %v12283_v39, %v8046_v55  ;;  %v2013_v55 = vld [vmem:[%s13345_s3 + $0x138] sm:$0xff] }
 0x250   :  { %9240 = vmatprep.subr.mxu1 %v10884_v17  ;;  %9305 = vmatprep.subr.mxu0 %v10884_v17 }
 0x251   :  { %9241 = vmatpush3.msra.mxu1 %v12312_v57  ;;  %9306 = vmatpush3.msra.mxu0 %v12312_v57 }
 0x252   :  { %9243 = vmatmul.mubr.msk.f32.vlgmr.msra.gmra.mxu1 %vm1267_vm6, %v8052_v56  ;;  %9308 = vmatmul.mubr.msk.f32.vlgmr.msra.gmra.mxu0 %vm1267_vm6, %v8065_v58  ;;  %v1222_v56 = vadd.s32 2, %v1155_v43  ;;  %v1156_v58 = vadd.s32 64, %v12269_v32 }
 0x253   :  { %9245 = vmatprep.mubr.msk.f32.mxu1 %vm10885_vm1, %v10884_v17  ;;  %9310 = vmatprep.mubr.msk.f32.mxu0 %vm10885_vm1, %v10884_v17 }
 0x254   :  { %1697 = vmatprep.subr.mxu1 %v1641_v62  ;;  %1879 = vmatprep.subr.mxu0 %v1625_v63  ;;  %v1614_v62 = vld [vmem:[%s13345_s3 + $0x20] sm:$0xff]  ;;  %v8058_v63 = vsel %vm1182_vm2, 1.0, %v10884_v17  ;;  %vm1235_vm5 = vcmp.eq.s32.totalorder %v12283_v39, %v1222_v56  ;;  %vm1642_vm2 = vcmask 523264   ;;  %v2012_v56 = vld [vmem:[%s13345_s3 + $0x130] sm:$0xff] }
 0x255   :  { %1698 = vmatpush1.msra.mxu1 %v1640_v0  ;;  %1880 = vmatpush1.msra.mxu0 %v1624_v1  ;;  %v8071_v0 = vsel %vm1234_vm3, 1.0, %v10884_v17  ;;  %v8047_v1 = vadd.s32 4294967294, %v1156_v58 }
 0x256   :  { %9246 = vmatmul.mubr.msk.f32.gmra.mxu1 %vm1267_vm6, %v8053_v2  ;;  %9311 = vmatmul.mubr.msk.f32.gmra.mxu0 %vm1267_vm6, %v8066_v3  ;;  %v1223_v2 = vadd.s32 2, %v1156_v58  ;;  %v1157_v3 = vadd.s32 72, %v12269_v32  ;;  %v2010_v58 = vld [vmem:[%s13345_s3 + $0x120] sm:$0xff] }
 0x257   :  { %9248 = vmatprep.mubr.msk.f32.mxu1 %vm10885_vm1, %v10884_v17  ;;  %9313 = vmatprep.mubr.msk.f32.mxu0 %vm10885_vm1, %v10884_v17  ;;  %vm1184_vm7 = vcmp.eq.s32.totalorder %v12283_v39, %v8047_v1 }
 0x258   :  { %1699 = vmatprep.subr.mxu1 %v1639_v7  ;;  %1881 = vmatprep.subr.mxu0 %v1623_v8  ;;  %v1612_v7 = vld [vmem:[%s13345_s3 + $0x10] sm:$0xff]  ;;  %v8059_v8 = vsel %vm1183_vm4, 1.0, %v10884_v17  ;;  %vm1236_vm8 = vcmp.eq.s32.totalorder %v12283_v39, %v1223_v2 }
 0x259   :  { %1700 = vmatpush1.msra.mxu1 %v1638_v9  ;;  %1882 = vmatpush1.msra.mxu0 %v1622_v10  ;;  %v8072_v9 = vsel %vm1235_vm5, 1.0, %v10884_v17  ;;  %v1158_v10 = vadd.s32 80, %v12269_v32 }
 0x25a   :  { %9249 = vmatmul.mubr.msk.f32.gmra.mxu1 %vm1267_vm6, %v8054_v11  ;;  %9314 = vmatmul.mubr.msk.f32.gmra.mxu0 %vm1267_vm6, %v8067_v13  ;;  %v8048_v11 = vadd.s32 4294967294, %v1157_v3  ;;  %v1224_v13 = vadd.s32 2, %v1157_v3 }
 0x25b   :  { %9251 = vmatprep.mubr.msk.f32.mxu1 %vm10885_vm1, %v10884_v17  ;;  %9316 = vmatprep.mubr.msk.f32.mxu0 %vm10885_vm1, %v10884_v17 }
 0x25c   :  { %1701 = vmatprep.subr.mxu1 %v1637_v20  ;;  %1883 = vmatprep.subr.mxu0 %v1621_v21  ;;  %v8060_v20 = vsel %vm1184_vm7, 1.0, %v10884_v17  ;;  %v8073_v21 = vsel %vm1236_vm8, 1.0, %v10884_v17  ;;  %vm1185_vm9 = vcmp.eq.s32.totalorder %v12283_v39, %v8048_v11  ;;  %vm1237_vm10 = vcmp.eq.s32.totalorder %v12283_v39, %v1224_v13 }
 0x25d   :  { %1702 = vmatpush1.msra.mxu1 %v1636_v23  ;;  %1884 = vmatpush1.msra.mxu0 %v1620_v24  ;;  %v8049_v23 = vadd.s32 4294967294, %v1158_v10  ;;  %v1225_v24 = vadd.s32 2, %v1158_v10  ;;  %v8061_v28 = vsel %vm1185_vm9, 1.0, %v10884_v17  ;;  %v8074_v30 = vsel %vm1237_vm10, 1.0, %v10884_v17 }
 0x25e   :  { %9252 = vmatmul.mubr.msk.f32.gmra.mxu1 %vm1267_vm6, %v8055_v26  ;;  %9317 = vmatmul.mubr.msk.f32.gmra.mxu0 %vm1267_vm6, %v8068_v27  ;;  %v1159_v26 = vadd.s32 88, %v12269_v32  ;;  %v2021_v27 = vld [vmem:[%s13345_s3 + $0x178] sm:$0xff] }
 0x25f   :  { %9254 = vmatprep.mubr.msk.f32.mxu1 %vm10885_vm1, %v10884_v17  ;;  %9319 = vmatprep.mubr.msk.f32.mxu0 %vm10885_vm1, %v10884_v17  ;;  %vm1186_vm11 = vcmp.eq.s32.totalorder %v12283_v39, %v8049_v23  ;;  %vm1238_vm12 = vcmp.eq.s32.totalorder %v12283_v39, %v1225_v24 }
 0x260   :  { %1703 = vmatprep.subr.mxu1 %v1635_v34  ;;  %1885 = vmatprep.subr.mxu0 %v1619_v35  ;;  %v8050_v33 = vadd.s32 4294967294, %v1159_v26  ;;  %v1226_v34 = vadd.s32 2, %v1159_v26  ;;  %v1160_v35 = vadd.s32 96, %v12269_v32 }
 0x261   :  { %1704 = vmatpush1.msra.mxu1 %v1634_v37  ;;  %1886 = vmatpush1.msra.mxu0 %v1618_v40  ;;  %v8062_v37 = vsel %vm1186_vm11, 1.0, %v10884_v17  ;;  %v8075_v40 = vsel %vm1238_vm12, 1.0, %v10884_v17 }
 0x262   :  { %9255 = vmatmul.mubr.msk.f32.gmra.mxu1 %vm1267_vm6, %v8056_v41  ;;  %9320 = vmatmul.mubr.msk.f32.gmra.mxu0 %vm1267_vm6, %v8069_v42  ;;  %vm1187_vm13 = vcmp.eq.s32.totalorder %v12283_v39, %v8050_v33  ;;  %vm1239_vm14 = vcmp.eq.s32.totalorder %v12283_v39, %v1226_v34  ;;  %v8051_v41 = vadd.s32 4294967294, %v1160_v35  ;;  %v1227_v42 = vadd.s32 2, %v1160_v35 }
 0x263   :  { %9257 = vmatprep.mubr.msk.f32.mxu1 %vm10885_vm1, %v10884_v17  ;;  %9322 = vmatprep.mubr.msk.f32.mxu0 %vm10885_vm1, %v10884_v17  ;;  %v8063_v43 = vsel %vm1187_vm13, 1.0, %v10884_v17  ;;  %v8076_v44 = vsel %vm1239_vm14, 1.0, %v10884_v17 }
 0x264   :  { %1705 = vmatprep.subr.mxu1 %v1633_v47  ;;  %1887 = vmatprep.subr.mxu0 %v1617_v49  ;;  %vm1188_vm15 = vcmp.eq.s32.totalorder %v12283_v39, %v8051_v41  ;;  %vm1240_vm0 = vcmp.eq.s32.totalorder %v12283_v39, %v1227_v42  ;;  %v2020_v39 = vld [vmem:[%s13345_s3 + $0x170] sm:$0xff]  ;;  %v2019_v49 = vld [vmem:[%s13345_s3 + $0x168] sm:$0xff] }
 0x265   :  { %1706 = vmatpush1.msra.mxu1 %v1632_v50  ;;  %1888 = vmatpush1.msra.mxu0 %v1616_v51  ;;  %v8064_v46 = vsel %vm1188_vm15, 1.0, %v10884_v17  ;;  %v8077_v47 = vsel %vm1240_vm0, 1.0, %v10884_v17  ;;  %v2018_v50 = vld [vmem:[%s13345_s3 + $0x160] sm:$0xff]  ;;  %v2017_v51 = vld [vmem:[%s13345_s3 + $0x158] sm:$0xff] }
 0x266   :  { %9258 = vmatmul.mubr.msk.f32.gmra.mxu1 %vm1267_vm6, %v8057_v52  ;;  %9323 = vmatmul.mubr.msk.f32.gmra.mxu0 %vm1267_vm6, %v8070_v53  ;;  %v2016_v52 = vld [vmem:[%s13345_s3 + $0x150] sm:$0xff]  ;;  %v2014_v53 = vld [vmem:[%s13345_s3 + $0x140] sm:$0xff] }
 0x267   :  { %9260 = vmatprep.mubr.msk.f32.mxu1 %vm10885_vm1, %v10884_v17  ;;  %9325 = vmatprep.mubr.msk.f32.mxu0 %vm10885_vm1, %v10884_v17 }
 0x268   :  { %1707 = vmatprep.subr.mxu1 %v1631_v59  ;;  %1889 = vmatprep.subr.mxu0 %v1615_v60  ;;  %v2009_v59 = vld [vmem:[%s13345_s3 + $0x118] sm:$0xff]  ;;  %v1610_v60 = vld [vmem:[%s13345_s3] sm:$0xff] }
 0x269   :  { %1708 = vmatpush1.msra.mxu1 %v1630_v61  ;;  %1890 = vmatpush1.msra.mxu0 %v1614_v62  ;;  %v2007_v61 = vld [vmem:[%s13345_s3 + $0x108] sm:$0xff]  ;;  %v2006_v62 = vld [vmem:[%s13345_s3 + $0x100] sm:$0xff] }
 0x26a   :  { %9261 = vmatmul.mubr.msk.f32.gmra.mxu1 %vm1267_vm6, %v8058_v63  ;;  %9326 = vmatmul.mubr.msk.f32.gmra.mxu0 %vm1267_vm6, %v8071_v0 }
 0x26b   :  { %9263 = vmatprep.mubr.msk.f32.mxu1 %vm10885_vm1, %v10884_v17  ;;  %9328 = vmatprep.mubr.msk.f32.mxu0 %vm10885_vm1, %v10884_v17 }
 0x26c   :  { %1709 = vmatprep.subr.mxu1 %v1629_v4  ;;  %1891 = vmatprep.subr.mxu0 %v1613_v5 }
 0x26d   :  { %1710 = vmatpush1.msra.mxu1 %v1628_v6  ;;  %1892 = vmatpush1.msra.mxu0 %v1612_v7 }
 0x26e   :  { %9264 = vmatmul.mubr.msk.f32.gmra.mxu1 %vm1267_vm6, %v8059_v8  ;;  %9329 = vmatmul.mubr.msk.f32.gmra.mxu0 %vm1267_vm6, %v8072_v9 }
 0x26f   :  { %9266 = vmatprep.mubr.msk.f32.mxu1 %vm10885_vm1, %v10884_v17  ;;  %9331 = vmatprep.mubr.msk.f32.mxu0 %vm10885_vm1, %v10884_v17 }
 0x270   :  { %1711 = vmatprep.subr.mxu1 %v1627_v14  ;;  %1893 = vmatprep.subr.mxu0 %v1611_v15 }
 0x271   :  { %1712 = vmatpush1.msra.mxu1 %v1626_v18  ;;  %1894 = vmatpush1.msra.mxu0 %v1610_v60 }
 0x272   :  { %9267 = vmatmul.mubr.msk.f32.gmra.mxu1 %vm1267_vm6, %v8060_v20  ;;  %9332 = vmatmul.mubr.msk.f32.gmra.mxu0 %vm1267_vm6, %v8073_v21 }
 0x273   :  { %9269 = vmatprep.mubr.msk.f32.mxu1 %vm10885_vm1, %v10884_v17  ;;  %9334 = vmatprep.mubr.msk.f32.mxu0 %vm10885_vm1, %v10884_v17 }
 0x274   :  { %2077 = vmatprep.subr.mxu1 %v2021_v27 }
 0x276   :  { %9270 = vmatmul.mubr.msk.f32.gmra.mxu1 %vm1267_vm6, %v8061_v28  ;;  %9335 = vmatmul.mubr.msk.f32.gmra.mxu0 %vm1267_vm6, %v8074_v30 }
 0x277   :  { %9272 = vmatprep.mubr.msk.f32.mxu1 %vm10885_vm1, %v10884_v17  ;;  %9337 = vmatprep.mubr.msk.f32.mxu0 %vm10885_vm1, %v10884_v17 }
 0x27a   :  { %9273 = vmatmul.mubr.msk.f32.gmra.mxu1 %vm1267_vm6, %v8062_v37  ;;  %9338 = vmatmul.mubr.msk.f32.gmra.mxu0 %vm1267_vm6, %v8075_v40 }
 0x27b   :  { %9275 = vmatprep.mubr.msk.f32.mxu1 %vm10885_vm1, %v10884_v17  ;;  %9340 = vmatprep.mubr.msk.f32.mxu0 %vm10885_vm1, %v10884_v17 }
 0x27e   :  { %9276 = vmatmul.mubr.msk.f32.gmra.mxu1 %vm1267_vm6, %v8063_v43  ;;  %9341 = vmatmul.mubr.msk.f32.gmra.mxu0 %vm1267_vm6, %v8076_v44 }
 0x27f   :  { %9278 = vmatprep.mubr.msk.f32.mxu1 %vm10885_vm1, %v10884_v17  ;;  %9343 = vmatprep.mubr.msk.f32.mxu0 %vm10885_vm1, %v10884_v17 }
 0x282   :  { %9279 = vmatmul.mubr.msk.f32.gmra.mxu1 %vm1267_vm6, %v8064_v46  ;;  %9344 = vmatmul.mubr.msk.f32.gmra.mxu0 %vm1267_vm6, %v8077_v47 }
 0x283   :  { %1745 = vmatprep.mubr.f32.mxu1 %v10884_v17  ;;  %1927 = vmatprep.mubr.f32.mxu0 %v10884_v17 }
 0x286   :  { %8106 = vmatmul.mubr.msk.f32.vlgmr.msra.gmra.mxu1 %vm1642_vm2, %v12312_v57  ;;  %v2015_v57 = vld [vmem:[%s13345_s3 + $0x148] sm:$0xff] }
 0x287   :  { %1751 = vmatprep.mubr.f32.mxu1 %v10884_v17  ;;  %2078 = vmatpush1.msra.mxu1 %v2020_v39 }
 0x288   :  { %2079 = vmatprep.subr.mxu1 %v2019_v49 }
 0x289   :  { %2080 = vmatpush1.msra.mxu1 %v2018_v50 }
 0x28a   :  { %8107 = vmatmul.mubr.msk.f32.gmra.mxu1 %vm1642_vm2, %v12305_v54  ;;  %2081 = vmatprep.subr.mxu1 %v2017_v51  ;;  %v2011_v54 = vld [vmem:[%s13345_s3 + $0x128] sm:$0xff] }
 0x28b   :  { %1757 = vmatprep.mubr.f32.mxu1 %v10884_v17  ;;  %2082 = vmatpush1.msra.mxu1 %v2016_v52 }
 0x28c   :  { %2083 = vmatprep.subr.mxu1 %v2015_v57 }
 0x28d   :  { %2084 = vmatpush1.msra.mxu1 %v2014_v53 }
 0x28e   :  { %8108 = vmatmul.mubr.msk.f32.gmra.mxu1 %vm1642_vm2, %v12296_v48  ;;  %2085 = vmatprep.subr.mxu1 %v2013_v55  ;;  %v2008_v48 = vld [vmem:[%s13345_s3 + $0x110] sm:$0xff] }
 0x28f   :  { %1763 = vmatprep.mubr.f32.mxu1 %v10884_v17  ;;  %2086 = vmatpush1.msra.mxu1 %v2012_v56 }
 0x290   :  { %2087 = vmatprep.subr.mxu1 %v2011_v54 }
 0x291   :  { %2088 = vmatpush1.msra.mxu1 %v2010_v58 }
 0x292   :  { %8109 = vmatmul.mubr.msk.f32.gmra.mxu1 %vm1642_vm2, %v12290_v45  ;;  %2089 = vmatprep.subr.mxu1 %v2009_v59 }
 0x293   :  { %1769 = vmatprep.mubr.f32.mxu1 %v10884_v17  ;;  %2090 = vmatpush1.msra.mxu1 %v2008_v48 }
 0x294   :  { %2091 = vmatprep.subr.mxu1 %v2007_v61 }
 0x295   :  { %2092 = vmatpush1.msra.mxu1 %v2006_v62 }
 0x296   :  { %8110 = vmatmul.mubr.msk.f32.gmra.mxu1 %vm1642_vm2, %v12279_v38 }
 0x297   :  { %1775 = vmatprep.mubr.f32.mxu1 %v10884_v17 }
 0x29a   :  { %8111 = vmatmul.mubr.msk.f32.gmra.mxu1 %vm1642_vm2, %v12273_v36 }
 0x29b   :  { %1781 = vmatprep.mubr.f32.mxu1 %v10884_v17 }
 0x29e   :  { %8112 = vmatmul.mubr.msk.f32.gmra.mxu1 %vm1642_vm2, %v12265_v31 }
 0x29f   :  { %1787 = vmatprep.mubr.f32.mxu1 %v10884_v17 }
 0x2a2   :  { %8113 = vmatmul.mubr.msk.f32.gmra.mxu1 %vm1642_vm2, %v12259_v29 }
 0x2a3   :  { %1793 = vmatprep.mubr.f32.mxu1 %v10884_v17 }
 0x2a6   :  { %8114 = vmatmul.mubr.msk.f32.gmra.mxu1 %vm1642_vm2, %v12253_v25 }
 0x2a7   :  { %1799 = vmatprep.mubr.f32.mxu1 %v10884_v17 }
 0x2aa   :  { %8115 = vmatmul.mubr.msk.f32.gmra.mxu1 %vm1642_vm2, %v12247_v22 }
 0x2ab   :  { %1805 = vmatprep.mubr.f32.mxu1 %v10884_v17 }
 0x2ae   :  { %8116 = vmatmul.mubr.msk.f32.gmra.mxu1 %vm1642_vm2, %v12241_v19 }
 0x2af   :  { %1811 = vmatprep.mubr.f32.mxu1 %v10884_v17 }
 0x2b2   :  { %8117 = vmatmul.mubr.msk.f32.gmra.mxu1 %vm1642_vm2, %v12239_v16 }
 0x2b3   :  { %1817 = vmatprep.mubr.f32.mxu1 %v10884_v17 }
 0x2b6   :  { %8118 = vmatmul.mubr.msk.f32.gmra.mxu1 %vm1642_vm2, %v12233_v12 }
 0x2b7   :  { %2125 = vmatprep.mubr.f32.mxu1 %v10884_v17 }
 0x312   :  { %v1377_v25 = vpop.f32.mrf.mxu1  ;;  %v1546_v29 = vpop.f32.mrf.mxu0 }
 0x313   :  { %8119 = vmatmul.mubr.msk.f32.vlgmr.msra.gmra.mxu0 %vm1642_vm2, %v1377_v25  ;;  %8132 = vmatmul.mubr.msk.f32.vlgmr.msra.gmra.mxu1 %vm1642_vm2, %v1546_v29 }
 0x314   :  { %v9244_v22 = vpop.f32.mrf.mxu1  ;;  %v9309_v19 = vpop.f32.mrf.mxu0  ;;  %1933 = vmatprep.mubr.f32.mxu0 %v10884_v17  ;;  %2131 = vmatprep.mubr.f32.mxu1 %v10884_v17 }
 0x316   :  { %v1382_v16 = vpop.f32.mrf.mxu1  ;;  %v1551_v31 = vpop.f32.mrf.mxu0 }
 0x317   :  { %8120 = vmatmul.mubr.msk.f32.gmra.mxu0 %vm1642_vm2, %v1382_v16  ;;  %8133 = vmatmul.mubr.msk.f32.gmra.mxu1 %vm1642_vm2, %v1551_v31 }
 0x318   :  { %v9247_v12 = vpop.f32.mrf.mxu1  ;;  %v9312_v36 = vpop.f32.mrf.mxu0  ;;  %1939 = vmatprep.mubr.f32.mxu0 %v10884_v17  ;;  %2137 = vmatprep.mubr.f32.mxu1 %v10884_v17 }
 0x31a   :  { %v1387_v38 = vpop.f32.mrf.mxu1  ;;  %v1556_v45 = vpop.f32.mrf.mxu0 }
 0x31b   :  { %8121 = vmatmul.mubr.msk.f32.gmra.mxu0 %vm1642_vm2, %v1387_v38  ;;  %8134 = vmatmul.mubr.msk.f32.gmra.mxu1 %vm1642_vm2, %v1556_v45 }
 0x31c   :  { %v9250_v63 = vpop.f32.mrf.mxu1  ;;  %v9315_v0 = vpop.f32.mrf.mxu0  ;;  %1945 = vmatprep.mubr.f32.mxu0 %v10884_v17  ;;  %2143 = vmatprep.mubr.f32.mxu1 %v10884_v17 }
 0x31e   :  { %v1392_v1 = vpop.f32.mrf.mxu1  ;;  %v1561_v2 = vpop.f32.mrf.mxu0 }
 0x31f   :  { %8122 = vmatmul.mubr.msk.f32.gmra.mxu0 %vm1642_vm2, %v1392_v1  ;;  %8135 = vmatmul.mubr.msk.f32.gmra.mxu1 %vm1642_vm2, %v1561_v2 }
 0x320   :  { %v9253_v3 = vpop.f32.mrf.mxu1  ;;  %v9318_v4 = vpop.f32.mrf.mxu0  ;;  %1951 = vmatprep.mubr.f32.mxu0 %v10884_v17  ;;  %2149 = vmatprep.mubr.f32.mxu1 %v10884_v17 }
 0x321   :  { %v2234_v4 = vsub.s32 0, %v12269_v32 }
 0x322   :  { %v1397_v5 = vpop.f32.mrf.mxu1  ;;  %v1566_v6 = vpop.f32.mrf.mxu0 }
 0x323   :  { %8123 = vmatmul.mubr.msk.f32.gmra.mxu0 %vm1642_vm2, %v1397_v5  ;;  %8136 = vmatmul.mubr.msk.f32.gmra.mxu1 %vm1642_vm2, %v1566_v6  ;;  %v2230_v6 = vld [vmem:[%s13346_s4] sm:$0x3] }
 0x324   :  { %v9256_v7 = vpop.f32.mrf.mxu1  ;;  %v9321_v8 = vpop.f32.mrf.mxu0  ;;  %1957 = vmatprep.mubr.f32.mxu0 %v10884_v17  ;;  %2155 = vmatprep.mubr.f32.mxu1 %v10884_v17 }
 0x326   :  { %v1402_v9 = vpop.f32.mrf.mxu1  ;;  %v1571_v10 = vpop.f32.mrf.mxu0 }
 0x327   :  { %8124 = vmatmul.mubr.msk.f32.gmra.mxu0 %vm1642_vm2, %v1402_v9  ;;  %8137 = vmatmul.mubr.msk.f32.gmra.mxu1 %vm1642_vm2, %v1571_v10  ;;  %v12748_v10 = vrot.slane %v2230_v6, %v2234_v4 }
 0x328   :  { %v9259_v11 = vpop.f32.mrf.mxu1  ;;  %v9324_v13 = vpop.f32.mrf.mxu0  ;;  %1963 = vmatprep.mubr.f32.mxu0 %v10884_v17  ;;  %2161 = vmatprep.mubr.f32.mxu1 %v10884_v17 }
 0x32a   :  { %v1407_v14 = vpop.f32.mrf.mxu1  ;;  %v1576_v15 = vpop.f32.mrf.mxu0 }
 0x32b   :  { %8125 = vmatmul.mubr.msk.f32.gmra.mxu0 %vm1642_vm2, %v1407_v14  ;;  %8138 = vmatmul.mubr.msk.f32.gmra.mxu1 %vm1642_vm2, %v1576_v15 }
 0x32c   :  { %v9262_v18 = vpop.f32.mrf.mxu1  ;;  %v9327_v20 = vpop.f32.mrf.mxu0  ;;  %1969 = vmatprep.mubr.f32.mxu0 %v10884_v17  ;;  %2167 = vmatprep.mubr.f32.mxu1 %v10884_v17 }
 0x32e   :  { %v1412_v21 = vpop.f32.mrf.mxu1  ;;  %v1581_v23 = vpop.f32.mrf.mxu0 }
 0x32f   :  { %8126 = vmatmul.mubr.msk.f32.gmra.mxu0 %vm1642_vm2, %v1412_v21  ;;  %8139 = vmatmul.mubr.msk.f32.gmra.mxu1 %vm1642_vm2, %v1581_v23 }
 0x330   :  { %v9265_v24 = vpop.f32.mrf.mxu1  ;;  %v9330_v26 = vpop.f32.mrf.mxu0  ;;  %1975 = vmatprep.mubr.f32.mxu0 %v10884_v17  ;;  %2173 = vmatprep.mubr.f32.mxu1 %v10884_v17 }
 0x332   :  { %v1417_v27 = vpop.f32.mrf.mxu1  ;;  %v1586_v28 = vpop.f32.mrf.mxu0 }
 0x333   :  { %8127 = vmatmul.mubr.msk.f32.gmra.mxu0 %vm1642_vm2, %v1417_v27  ;;  %8140 = vmatmul.mubr.msk.f32.gmra.mxu1 %vm1642_vm2, %v1586_v28 }
 0x334   :  { %v9268_v30 = vpop.f32.mrf.mxu1  ;;  %v9333_v33 = vpop.f32.mrf.mxu0  ;;  %1981 = vmatprep.mubr.f32.mxu0 %v10884_v17  ;;  %2179 = vmatprep.mubr.f32.mxu1 %v10884_v17 }
 0x336   :  { %v1422_v34 = vpop.f32.mrf.mxu1  ;;  %v1591_v35 = vpop.f32.mrf.mxu0 }
 0x337   :  { %8128 = vmatmul.mubr.msk.f32.gmra.mxu0 %vm1642_vm2, %v1422_v34  ;;  %8141 = vmatmul.mubr.msk.f32.gmra.mxu1 %vm1642_vm2, %v1591_v35 }
 0x338   :  { %v9271_v37 = vpop.f32.mrf.mxu1  ;;  %v9336_v40 = vpop.f32.mrf.mxu0  ;;  %1987 = vmatprep.mubr.f32.mxu0 %v10884_v17  ;;  %2185 = vmatprep.mubr.f32.mxu1 %v10884_v17 }
 0x33a   :  { %v1427_v41 = vpop.f32.mrf.mxu1  ;;  %v1596_v42 = vpop.f32.mrf.mxu0 }
 0x33b   :  { %8129 = vmatmul.mubr.msk.f32.gmra.mxu0 %vm1642_vm2, %v1427_v41  ;;  %8142 = vmatmul.mubr.msk.f32.gmra.mxu1 %vm1642_vm2, %v1596_v42 }
 0x33c   :  { %v9274_v43 = vpop.f32.mrf.mxu1  ;;  %v9339_v44 = vpop.f32.mrf.mxu0  ;;  %1993 = vmatprep.mubr.f32.mxu0 %v10884_v17  ;;  %2191 = vmatprep.mubr.f32.mxu1 %v10884_v17 }
 0x33e   :  { %v1432_v46 = vpop.f32.mrf.mxu1  ;;  %v1601_v47 = vpop.f32.mrf.mxu0 }
 0x33f   :  { %8130 = vmatmul.mubr.msk.f32.gmra.mxu0 %vm1642_vm2, %v1432_v46  ;;  %8143 = vmatmul.mubr.msk.f32.gmra.mxu1 %vm1642_vm2, %v1601_v47  ;;  %v2238_v46 = vsub.s32 1, %v12269_v32 }
 0x340   :  { %v9277_v39 = vpop.f32.mrf.mxu1  ;;  %v9342_v49 = vpop.f32.mrf.mxu0  ;;  %1999 = vmatprep.mubr.f32.mxu0 %v10884_v17  ;;  %2197 = vmatprep.mubr.f32.mxu1 %v10884_v17 }
 0x342   :  { %v1437_v50 = vpop.f32.mrf.mxu1  ;;  %v1606_v51 = vpop.f32.mrf.mxu0 }
 0x343   :  { %8131 = vmatmul.mubr.msk.f32.gmra.mxu0 %vm1642_vm2, %v1437_v50  ;;  %8144 = vmatmul.mubr.msk.f32.gmra.mxu1 %vm1642_vm2, %v1606_v51 }
 0x344   :  { %v9280_v52 = vpop.f32.mrf.mxu1  ;;  %v9345_v57 = vpop.f32.mrf.mxu0 }
 0x346   :  { %v1747_v53 = vpop.f32.mrf.mxu1 }
 0x348   :  { %v1749_v55 = vpop.f32.mrf.mxu1 }
 0x34a   :  { %v1753_v56 = vpop.f32.mrf.mxu1 }
 0x34c   :  { %v1755_v54 = vpop.f32.mrf.mxu1 }
 0x34e   :  { %v1759_v58 = vpop.f32.mrf.mxu1 }
 0x350   :  { %v12706_v59 = vpop.f32.mrf.mxu1 }
 0x352   :  { %v1765_v60 = vpop.f32.mrf.mxu1 }
 0x354   :  { %v12708_v48 = vpop.f32.mrf.mxu1 }
 0x356   :  { %v1771_v61 = vpop.f32.mrf.mxu1 }
 0x358   :  { %v12710_v62 = vpop.f32.mrf.mxu1 }
 0x35a   :  { %v12712_v25 = vpop.f32.mrf.mxu1 }
 0x35c   :  { %v12714_v29 = vpop.f32.mrf.mxu1 }
 0x35e   :  { %v12716_v22 = vpop.f32.mrf.mxu1 }
 0x360   :  { %v12718_v19 = vpop.f32.mrf.mxu1 }
 0x362   :  { %v12720_v16 = vpop.f32.mrf.mxu1 }
 0x364   :  { %v12722_v31 = vpop.f32.mrf.mxu1 }
 0x366   :  { %v12724_v12 = vpop.f32.mrf.mxu1 }
 0x368   :  { %v12726_v36 = vpop.f32.mrf.mxu1 }
 0x36a   :  { %v12728_v38 = vpop.f32.mrf.mxu1 }
 0x36c   :  { %v12730_v45 = vpop.f32.mrf.mxu1 }
 0x36e   :  { %v12732_v63 = vpop.f32.mrf.mxu1 }
 0x370   :  { %v12734_v0 = vpop.f32.mrf.mxu1 }
 0x372   :  { %v12736_v1 = vpop.f32.mrf.mxu1 }
 0x374   :  { %v12738_v2 = vpop.f32.mrf.mxu1 }
 0x376   :  { %v12740_v3 = vpop.f32.mrf.mxu1 }
 0x378   :  { %v12743_v5 = vpop.f32.mrf.mxu1 }
 0x3d3   :  { %v1929_v7 = vpop.f32.mrf.mxu0  ;;  %v2127_v8 = vpop.f32.mrf.mxu1 }
 0x3d4   :  { %v1930_v9 = vadd.f32 %v1929_v7, %v1747_v53 }
 0x3d5   :  { %v1931_v11 = vpop.f32.mrf.mxu0  ;;  %v2129_v13 = vpop.f32.mrf.mxu1 }
 0x3d6   :  { %v2204_v14 = vadd.f32 %v2127_v8, %v1930_v9  ;;  %v1932_v44 = vadd.f32 %v1931_v11, %v1749_v55 }
 0x3d7   :  { %v1935_v15 = vpop.f32.mrf.mxu0  ;;  %v2133_v18 = vpop.f32.mrf.mxu1 }
 0x3d8   :  { %v2242_v20 = vadd.f32 %v12748_v10, %v2204_v14  ;;  %v1936_v21 = vadd.f32 %v1935_v15, %v1753_v56  ;;  %v2205_v56 = vadd.f32 %v2129_v13, %v1932_v44 }
 0x3d9   :  { %v1937_v23 = vpop.f32.mrf.mxu0  ;;  %v2135_v24 = vpop.f32.mrf.mxu1 }
 0x3da   :  { %v2206_v26 = vadd.f32 %v2133_v18, %v1936_v21  ;;  %10395 = vtanh.f32 %v2242_v20  ;;  %v1938_v49 = vadd.f32 %v1937_v23, %v1755_v54 }
 0x3db   :  { %v1941_v27 = vpop.f32.mrf.mxu0  ;;  %v2139_v28 = vpop.f32.mrf.mxu1 }
 0x3dc   :  { %v2244_v30 = vadd.f32 %v12748_v10, %v2206_v26  ;;  %v1942_v33 = vadd.f32 %v1941_v27, %v1759_v58  ;;  %v12755_v58 = vrot.slane %v2230_v6, %v2238_v46  ;;  %v2207_v8 = vadd.f32 %v2135_v24, %v1938_v49 }
 0x3dd   :  { %v1943_v34 = vpop.f32.mrf.mxu0  ;;  %v2141_v35 = vpop.f32.mrf.mxu1 }
 0x3de   :  { %10397 = vtanh.f32 %v2244_v30  ;;  %v2208_v37 = vadd.f32 %v2139_v28, %v1942_v33  ;;  %v2243_v14 = vadd.f32 %v12755_v58, %v2205_v56  ;;  %v1944_v6 = vadd.f32 %v1943_v34, %v12706_v59 }
 0x3df   :  { %v1947_v40 = vpop.f32.mrf.mxu0  ;;  %v2145_v41 = vpop.f32.mrf.mxu1 }
 0x3e0   :  { %v2246_v42 = vadd.f32 %v12748_v10, %v2208_v37  ;;  %v1948_v43 = vadd.f32 %v1947_v40, %v1765_v60  ;;  %v2209_v40 = vadd.f32 %v2141_v35, %v1944_v6 }
 0x3e1   :  { %v1949_v47 = vpop.f32.mrf.mxu0  ;;  %v2147_v39 = vpop.f32.mrf.mxu1 }
 0x3e2   :  { %v2210_v50 = vadd.f32 %v2145_v41, %v1948_v43  ;;  %10399 = vtanh.f32 %v2246_v42  ;;  %v1950_v13 = vadd.f32 %v1949_v47, %v12708_v48 }
 0x3e3   :  { %v1953_v51 = vpop.f32.mrf.mxu0  ;;  %v2151_v52 = vpop.f32.mrf.mxu1 }
 0x3e4   :  { %v2248_v57 = vadd.f32 %v12748_v10, %v2210_v50  ;;  %v1954_v53 = vadd.f32 %v1953_v51, %v1771_v61  ;;  %v2245_v61 = vadd.f32 %v12755_v58, %v2207_v8  ;;  %v2211_v41 = vadd.f32 %v2147_v39, %v1950_v13 }
 0x3e5   :  { %v1955_v4 = vpop.f32.mrf.mxu0  ;;  %v2153_v7 = vpop.f32.mrf.mxu1 }
 0x3e6   :  { %10401 = vtanh.f32 %v2248_v57  ;;  %v2212_v55 = vadd.f32 %v2151_v52, %v1954_v53  ;;  %v1956_v44 = vadd.f32 %v1955_v4, %v12710_v62  ;;  %v2249_v50 = vadd.f32 %v12755_v58, %v2211_v41 }
 0x3e7   :  { %v1959_v60 = vpop.f32.mrf.mxu0  ;;  %v2157_v32 = vpop.f32.mrf.mxu1 }
 0x3e8   :  { %v2250_v9 = vadd.f32 %v12748_v10, %v2212_v55  ;;  %v1960_v54 = vadd.f32 %v1959_v60, %v12712_v25  ;;  %v10396_v11 = vpop.eup %10395  ;;  %v2213_v4 = vadd.f32 %v2153_v7, %v1956_v44 }
 0x3e9   :  { %v1961_v15 = vpop.f32.mrf.mxu0  ;;  %v2159_v18 = vpop.f32.mrf.mxu1  ;;  %v2281_v26 = vadd.f32 %v10396_v11, %v2243_v14 }
 0x3ea   :  { %v2214_v20 = vadd.f32 %v2157_v32, %v1960_v54  ;;  %10403 = vtanh.f32 %v2250_v9  ;;  %v1962_v35 = vadd.f32 %v1961_v15, %v12714_v29  ;;  %v2251_v15 = vadd.f32 %v12755_v58, %v2213_v4 }
 0x3eb   :  { %v10398_v21 = vpop.eup %10397  ;;  %v1965_v23 = vpop.f32.mrf.mxu0 }
 0x3ec   :  { %v2163_v24 = vpop.f32.mrf.mxu1  ;;  %v2282_v27 = vadd.f32 %v10398_v21, %v2245_v61  ;;  %v2252_v25 = vadd.f32 %v12748_v10, %v2214_v20  ;;  %v1966_v28 = vadd.f32 %v1965_v23, %v12716_v22  ;;  %v2247_v22 = vadd.f32 %v12755_v58, %v2209_v40 }
 0x3ed   :  { %v1967_v30 = vpop.f32.mrf.mxu0  ;;  %v2215_v32 = vadd.f32 %v2159_v18, %v1962_v35 }
 0x3ee   :  { %v2165_v33 = vpop.f32.mrf.mxu1  ;;  %v8615_v37 = vpack.c.bf16 %v2282_v27, %v2281_v26  ;;  %10405 = vtanh.f32 %v2252_v25  ;;  %v2216_v59 = vadd.f32 %v2163_v24, %v1966_v28  ;;  %v1968_v61 = vadd.f32 %v1967_v30, %v12718_v19 }
 0x3ef   :  { %v1971_v34 = vpop.f32.mrf.mxu0  ;;  %v10400_v43 = vpop.eup %10399  ;;  %v2253_v13 = vadd.f32 %v12755_v58, %v2215_v32 }
 0x3f0   :  { %v2169_v48 = vpop.f32.mrf.mxu1  ;;  %8616 = vst [vmem:[#allocation3] sm:$0xff] %v8615_v37   ;;  %v1972_v42 = vadd.f32 %v1971_v34, %v12720_v16  ;;  %v2254_v46 = vadd.f32 %v12748_v10, %v2216_v59  ;;  %v2283_v53 = vadd.f32 %v10400_v43, %v2247_v22  ;;  %v2217_v19 = vadd.f32 %v2165_v33, %v1968_v61 }
 0x3f1   :  { %v1973_v47 = vpop.f32.mrf.mxu0 }
 0x3f2   :  { %v2171_v49 = vpop.f32.mrf.mxu1  ;;  %v2218_v39 = vadd.f32 %v2169_v48, %v1972_v42  ;;  %10407 = vtanh.f32 %v2254_v46  ;;  %v1974_v18 = vadd.f32 %v1973_v47, %v12722_v31  ;;  %v2255_v42 = vadd.f32 %v12755_v58, %v2217_v19 }
 0x3f3   :  { %v10402_v51 = vpop.eup %10401  ;;  %v1977_v52 = vpop.f32.mrf.mxu0 }
 0x3f4   :  { %v2175_v57 = vpop.f32.mrf.mxu1  ;;  %v2284_v16 = vadd.f32 %v10402_v51, %v2249_v50  ;;  %v2256_v56 = vadd.f32 %v12748_v10, %v2218_v39  ;;  %v1978_v62 = vadd.f32 %v1977_v52, %v12724_v12  ;;  %v2219_v40 = vadd.f32 %v2171_v49, %v1974_v18 }
 0x3f5   :  { %v1979_v8 = vpop.f32.mrf.mxu0 }
 0x3f6   :  { %v2177_v55 = vpop.f32.mrf.mxu1  ;;  %v8620_v60 = vpack.c.bf16 %v2284_v16, %v2283_v53  ;;  %10409 = vtanh.f32 %v2256_v56  ;;  %v2220_v9 = vadd.f32 %v2175_v57, %v1978_v62  ;;  %v1980_v33 = vadd.f32 %v1979_v8, %v12726_v36 }
 0x3f7   :  { %v1983_v54 = vpop.f32.mrf.mxu0  ;;  %v10404_v11 = vpop.eup %10403 }
 0x3f8   :  { %v2181_v29 = vpop.f32.mrf.mxu1  ;;  %8642 = vst [vmem:[#allocation3 + $0x8] sm:$0xff] %v8620_v60   ;;  %v1984_v14 = vadd.f32 %v1983_v54, %v12728_v38  ;;  %v2258_v6 = vadd.f32 %v12748_v10, %v2220_v9  ;;  %v2285_v23 = vadd.f32 %v10404_v11, %v2251_v15  ;;  %v2221_v57 = vadd.f32 %v2177_v55, %v1980_v33 }
 0x3f9   :  { %v1985_v12 = vpop.f32.mrf.mxu0 }
 0x3fa   :  { %v2183_v7 = vpop.f32.mrf.mxu1  ;;  %v2222_v20 = vadd.f32 %v2181_v29, %v1984_v14  ;;  %10411 = vtanh.f32 %v2258_v6  ;;  %v1986_v46 = vadd.f32 %v1985_v12, %v12730_v45  ;;  %v2259_v62 = vadd.f32 %v12755_v58, %v2221_v57 }
 0x3fb   :  { %v10406_v21 = vpop.eup %10405  ;;  %v1989_v24 = vpop.f32.mrf.mxu0 }
 0x3fc   :  { %v2187_v26 = vpop.f32.mrf.mxu1  ;;  %v2286_v27 = vadd.f32 %v10406_v21, %v2253_v13  ;;  %v2260_v38 = vadd.f32 %v12748_v10, %v2222_v20  ;;  %v1990_v25 = vadd.f32 %v1989_v24, %v12732_v63  ;;  %v2257_v63 = vadd.f32 %v12755_v58, %v2219_v40 }
 0x3fd   :  { %v1991_v28 = vpop.f32.mrf.mxu0  ;;  %v2223_v53 = vadd.f32 %v2183_v7, %v1986_v46 }
 0x3fe   :  { %v2189_v30 = vpop.f32.mrf.mxu1  ;;  %v8625_v37 = vpack.c.bf16 %v2286_v27, %v2285_v23  ;;  %10413 = vtanh.f32 %v2260_v38  ;;  %v2224_v41 = vadd.f32 %v2187_v26, %v1990_v25  ;;  %v1992_v8 = vadd.f32 %v1991_v28, %v12734_v0 }
 0x3ff   :  { %v1995_v59 = vpop.f32.mrf.mxu0  ;;  %v10408_v34 = vpop.eup %10407  ;;  %v2261_v4 = vadd.f32 %v12755_v58, %v2223_v53 }
 0x400   :  { %v2193_v31 = vpop.f32.mrf.mxu1  ;;  %8643 = vst [vmem:[#allocation3 + $0x10] sm:$0xff] %v8625_v37   ;;  %v1996_v48 = vadd.f32 %v1995_v59, %v12736_v1  ;;  %v2262_v43 = vadd.f32 %v12748_v10, %v2224_v41  ;;  %v2287_v50 = vadd.f32 %v10408_v34, %v2255_v42  ;;  %v2225_v29 = vadd.f32 %v2189_v30, %v1992_v8 }
 0x401   :  { %v1997_v44 = vpop.f32.mrf.mxu0 }
 0x402   :  { %v2226_v47 = vadd.f32 %v2193_v31, %v1996_v48  ;;  %v2195_v49 = vpop.f32.mrf.mxu1  ;;  %10415 = vtanh.f32 %v2262_v43  ;;  %v1998_v60 = vadd.f32 %v1997_v44, %v12738_v2  ;;  %v2263_v15 = vadd.f32 %v12755_v58, %v2225_v29 }
 0x403   :  { %v10410_v22 = vpop.eup %10409  ;;  %v2001_v35 = vpop.f32.mrf.mxu0 }
 0x404   :  { %v2288_v39 = vadd.f32 %v10410_v22, %v2257_v63  ;;  %v2264_v1 = vadd.f32 %v12748_v10, %v2226_v47  ;;  %v2002_v51 = vadd.f32 %v2001_v35, %v12740_v3  ;;  %v2199_v16 = vpop.f32.mrf.mxu1  ;;  %v2227_v11 = vadd.f32 %v2195_v49, %v1998_v60 }
 0x405   :  { %v2003_v9 = vpop.f32.mrf.mxu0 }
 0x406   :  { %v8630_v52 = vpack.c.bf16 %v2288_v39, %v2287_v50  ;;  %10417 = vtanh.f32 %v2264_v1  ;;  %v2228_v56 = vadd.f32 %v2199_v16, %v2002_v51  ;;  %v2004_v14 = vadd.f32 %v2003_v9, %v12743_v5  ;;  %v2201_v6 = vpop.f32.mrf.mxu1 }
 0x407   :  { %v10412_v36 = vpop.eup %10411  ;;  %v2265_v61 = vadd.f32 %v12755_v58, %v2227_v11 }
 0x408   :  { %8644 = vst [vmem:[#allocation3 + $0x18] sm:$0xff] %v8630_v52   ;;  %v2266_v45 = vadd.f32 %v12748_v10, %v2228_v56  ;;  %v2289_v3 = vadd.f32 %v10412_v36, %v2259_v62  ;;  %v2229_v12 = vadd.f32 %v2201_v6, %v2004_v14 }
 0x40a   :  { %10419 = vtanh.f32 %v2266_v45  ;;  %v2267_v18 = vadd.f32 %v12755_v58, %v2229_v12 }
 0x40b   :  { %v10414_v32 = vpop.eup %10413 }
 0x40c   :  { %v2290_v55 = vadd.f32 %v10414_v32, %v2261_v4 }
 0x40e   :  { %v8635_v54 = vpack.c.bf16 %v2290_v55, %v2289_v3 }
 0x40f   :  { %v10416_v10 = vpop.eup %10415 }
 0x410   :  { %8645 = vst [vmem:[#allocation3 + $0x20] sm:$0xff] %v8635_v54   ;;  %v2291_v2 = vadd.f32 %v10416_v10, %v2263_v15 }
 0x413   :  { %v10418_v0 = vpop.eup %10417 }
 0x414   :  { %v2292_v7 = vadd.f32 %v10418_v0, %v2265_v61 }
 0x416   :  { %v8640_v13 = vpack.c.bf16 %v2292_v7, %v2291_v2 }
 0x417   :  { %v10420_v20 = vpop.eup %10419 }
 0x418   :  { %8646 = vst [vmem:[#allocation3 + $0x28] sm:$0xff] %v8640_v13   ;;  %v2293_v21 = vadd.f32 %v10420_v20, %v2267_v18 }
 0x41a   :  { %v8611_v23 = vpack.c.bf16 %v2293_v21, %v2293_v21 }
 0x41c   :  { %2359 = vst [vmem:[#allocation3 + $0x30] sm:$0x3] %v8611_v23 }
 0x41d   :  { %10880 = dma.done.wait [#allocation4], 51200 }
 0x41e   :  { %10881 = vsyncadd [#allocation4], 4294916096  ;;  %9346 = vmatprep.subr.bf16.mxu0 %v10884_v17  ;;  %9366 = vmatprep.subr.bf16.mxu1 %v10884_v17  ;;  %v10421_v5 = vld [vmem:[#allocation2 + $0x78] sm:$0xff]   ;;  %v10423_v58 = vld [vmem:[#allocation2 + $0x70] sm:$0xff]   ;;  %s10887_s11 = smov [#allocation5]  }
 0x41f   :  { %9362 = vmatprep.mubr.msk.bf16.mxu0 %vm10885_vm1, %v10884_v17  ;;  %9382 = vmatprep.mubr.msk.bf16.mxu1 %vm10885_vm1, %v10884_v17  ;;  %v10422_v24 = vld [vmem:[#allocation2 + $0x38] sm:$0xff]   ;;  %v10424_v26 = vld [vmem:[#allocation2 + $0x30] sm:$0xff]   ;;  %v10425_v27 = vld [vmem:[#allocation2 + $0x68] sm:$0xff]   ;;  %s8002_s12 = sshll.u32 %s10887_s11, 4  ;;  %s8003_s12 = int_to_ptr.vmem [resolvable:$true] %s8002_s12 }
 0x420   :  { %9347 = vmatpush3.bf16.msra.mxu0 %v10421_v5  ;;  %9367 = vmatpush3.bf16.msra.mxu1 %v10422_v24  ;;  %v10426_v38 = vld [vmem:[#allocation2 + $0x28] sm:$0xff]   ;;  %v10427_v25 = vld [vmem:[#allocation2 + $0x60] sm:$0xff]   ;;  %v10429_v28 = vld [vmem:[#allocation2 + $0x58] sm:$0xff]   ;;  %p10865_p1 = scmp.lt.s32.totalorder %s8003_s12, %s8003_s12 }
 0x421   :  { %9348 = vmatprep.subr.bf16.mxu0 %v10884_v17  ;;  %9368 = vmatprep.subr.bf16.mxu1 %v10884_v17  ;;  %v10428_v19 = vld [vmem:[#allocation2 + $0x20] sm:$0xff]   ;;  %v10430_v30 = vld [vmem:[#allocation2 + $0x18] sm:$0xff]   ;;  %v10431_v37 = vld [vmem:[#allocation2 + $0x50] sm:$0xff]  }
 0x422   :  { %v10432_v40 = vld [vmem:[#allocation2 + $0x10] sm:$0xff]   ;;  %v10433_v41 = vld [vmem:[#allocation2 + $0x48] sm:$0xff]   ;;  %v10437_v31 = vld [vmem:[#allocation3] ss:$0 sps:$4 sm:$0x22]  }
 0x423   :  { %v10434_v59 = vld [vmem:[#allocation2 + $0x8] sm:$0xff]   ;;  %v10435_v34 = vld [vmem:[#allocation2 + $0x40] sm:$0xff]   ;;  %v2403_v42 = vrot.slane %v10437_v31, 1  ;;  %v10438_v43 = vld [vmem:[#allocation2 + $0xb8] sm:$0xff]  }
 0x424   :  { %9349 = vmatpush3.bf16.msra.mxu0 %v10423_v58  ;;  %9369 = vmatpush3.bf16.msra.mxu1 %v10424_v26  ;;  %v10436_v48 = vld [vmem:[#allocation2] sm:$0xff]   ;;  %v10439_v63 = vld [vmem:[#allocation2 + $0xf8] sm:$0xff]   ;;  %v10440_v33 = vld [vmem:[#allocation2 + $0xb0] sm:$0xff]  }
 0x425   :  { %9350 = vmatprep.subr.bf16.mxu0 %v10884_v17  ;;  %9370 = vmatprep.subr.bf16.mxu1 %v10884_v17  ;;  %v2365_v44 = vld [vmem:[#allocation3] sm:$0x1]  ;;  %v10441_v46 = vld [vmem:[#allocation2 + $0xf0] sm:$0xff]   ;;  %v10442_v47 = vld [vmem:[#allocation2 + $0xa8] sm:$0xff]  }
 0x426   :  { %v10443_v49 = vld [vmem:[#allocation2 + $0xe8] sm:$0xff]   ;;  %v10444_v22 = vld [vmem:[#allocation2 + $0xa0] sm:$0xff]   ;;  %v10446_v35 = vld [vmem:[#allocation2 + $0x98] sm:$0xff]  }
 0x427   :  { %v10445_v50 = vld [vmem:[#allocation2 + $0xe0] sm:$0xff]   ;;  %v10447_v39 = vld [vmem:[#allocation2 + $0xd8] sm:$0xff]   ;;  %v10448_v1 = vld [vmem:[#allocation2 + $0x90] sm:$0xff]  }
 0x428   :  { %9351 = vmatpush3.bf16.msra.mxu0 %v10425_v27  ;;  %9371 = vmatpush3.bf16.msra.mxu1 %v10426_v38  ;;  %v10449_v51 = vld [vmem:[#allocation2 + $0xd0] sm:$0xff]   ;;  %v10450_v52 = vld [vmem:[#allocation2 + $0x88] sm:$0xff]   ;;  %v10454_v53 = vld [vmem:[#allocation3] ss:$0 sps:$4 sm:$0x44]  }
 0x429   :  { %9352 = vmatprep.subr.bf16.mxu0 %v10884_v17  ;;  %9372 = vmatprep.subr.bf16.mxu1 %v10884_v17  ;;  %v10451_v57 = vld [vmem:[#allocation2 + $0xc8] sm:$0xff]   ;;  %v10455_v16 = vld [vmem:[#allocation3] ss:$0 sps:$4 sm:$0x88]   ;;  %v2602_v45 = vrot.slane %v10454_v53, 2  ;;  %v10456_v4 = vld [vmem:[#allocation2 + $0x138] sm:$0xff]  }
 0x42a   :  { %v10452_v56 = vld [vmem:[#allocation2 + $0x80] sm:$0xff]   ;;  %v2714_v62 = vrot.slane %v10455_v16, 3  ;;  %v10457_v8 = vld [vmem:[#allocation2 + $0x178] sm:$0xff]   ;;  %v10458_v60 = vld [vmem:[#allocation2 + $0x130] sm:$0xff]  }
 0x42b   :  { %v10453_v36 = vld [vmem:[#allocation2 + $0xc0] sm:$0xff]   ;;  %v10459_v32 = vld [vmem:[#allocation2 + $0x170] sm:$0xff]   ;;  %v10460_v3 = vld [vmem:[#allocation2 + $0x128] sm:$0xff]  }
 0x42c   :  { %9353 = vmatpush3.bf16.msra.mxu0 %v10427_v25  ;;  %9373 = vmatpush3.bf16.msra.mxu1 %v10428_v19  ;;  %v10461_v55 = vld [vmem:[#allocation2 + $0x168] sm:$0xff]   ;;  %v10462_v9 = vld [vmem:[#allocation2 + $0x120] sm:$0xff]   ;;  %v10464_v29 = vld [vmem:[#allocation2 + $0x118] sm:$0xff]  }
 0x42d   :  { %9354 = vmatprep.subr.bf16.mxu0 %v10884_v17  ;;  %9374 = vmatprep.subr.bf16.mxu1 %v10884_v17  ;;  %v10463_v54 = vld [vmem:[#allocation2 + $0x160] sm:$0xff]   ;;  %v10465_v11 = vld [vmem:[#allocation2 + $0x158] sm:$0xff]   ;;  %v10466_v14 = vld [vmem:[#allocation2 + $0x110] sm:$0xff]  }
 0x42e   :  { %v10467_v10 = vld [vmem:[#allocation2 + $0x150] sm:$0xff]   ;;  %v10468_v15 = vld [vmem:[#allocation2 + $0x108] sm:$0xff]   ;;  %v10472_v6 = vld [vmem:[#allocation3 + $0x4] ss:$0 sps:$4 sm:$0x22]  }
 0x42f   :  { %v10469_v61 = vld [vmem:[#allocation2 + $0x148] sm:$0xff]   ;;  %v10470_v0 = vld [vmem:[#allocation2 + $0x100] sm:$0xff]   ;;  %v2933_v7 = vrot.slane %v10472_v6, 1  ;;  %v10473_v13 = vld [vmem:[#allocation2 + $0x1b8] sm:$0xff]  }
 0x430   :  { %9355 = vmatpush3.bf16.msra.mxu0 %v10429_v28  ;;  %9375 = vmatpush3.bf16.msra.mxu1 %v10430_v30  ;;  %v10471_v12 = vld [vmem:[#allocation2 + $0x140] sm:$0xff]   ;;  %v10474_v18 = vld [vmem:[#allocation2 + $0x1f8] sm:$0xff]   ;;  %v10475_v20 = vld [vmem:[#allocation2 + $0x1b0] sm:$0xff]  }
 0x431   :  { %9356 = vmatprep.subr.bf16.mxu0 %v10884_v17  ;;  %9376 = vmatprep.subr.bf16.mxu1 %v10884_v17  ;;  %v2805_v2 = vld [vmem:[#allocation3 + $0x4] sm:$0x1]  ;;  %v10476_v21 = vld [vmem:[#allocation2 + $0x1f0] sm:$0xff]   ;;  %v10477_v23 = vld [vmem:[#allocation2 + $0x1a8] sm:$0xff]  }
 0x432   :  { %v10478_v5 = vld [vmem:[#allocation2 + $0x1e8] sm:$0xff]   ;;  %v10479_v24 = vld [vmem:[#allocation2 + $0x1a0] sm:$0xff]   ;;  %v10481_v26 = vld [vmem:[#allocation2 + $0x198] sm:$0xff]  }
 0x433   :  { %v10480_v58 = vld [vmem:[#allocation2 + $0x1e0] sm:$0xff]   ;;  %v10482_v27 = vld [vmem:[#allocation2 + $0x1d8] sm:$0xff]   ;;  %v10483_v38 = vld [vmem:[#allocation2 + $0x190] sm:$0xff]  }
 0x434   :  { %9357 = vmatpush3.bf16.msra.mxu0 %v10431_v37  ;;  %9377 = vmatpush3.bf16.msra.mxu1 %v10432_v40  ;;  %v10484_v25 = vld [vmem:[#allocation2 + $0x1d0] sm:$0xff]   ;;  %v10485_v19 = vld [vmem:[#allocation2 + $0x188] sm:$0xff]   ;;  %v10489_v30 = vld [vmem:[#allocation3 + $0x4] ss:$0 sps:$4 sm:$0x44]  }
 0x435   :  { %9358 = vmatprep.subr.bf16.mxu0 %v10884_v17  ;;  %9378 = vmatprep.subr.bf16.mxu1 %v10884_v17  ;;  %v10486_v28 = vld [vmem:[#allocation2 + $0x1c8] sm:$0xff]   ;;  %v10490_v37 = vld [vmem:[#allocation3 + $0x4] ss:$0 sps:$4 sm:$0x88]   ;;  %v10508_v16 = vld [vmem:[#allocation2 + $0x2b8] sm:$0xff]  }
 0x436   :  { %v10487_v40 = vld [vmem:[#allocation2 + $0x180] sm:$0xff]   ;;  %v3157_v31 = vrot.slane %v10490_v37, 3  ;;  %v10543_v37 = vld [vmem:[#allocation2 + $0x3b8] sm:$0xff]  }
 0x438   :  { %9359 = vmatpush3.bf16.msra.mxu0 %v10433_v41  ;;  %9379 = vmatpush3.bf16.msra.mxu1 %v10434_v59  ;;  %v10488_v41 = vld [vmem:[#allocation2 + $0x1c0] sm:$0xff]   ;;  %v3045_v59 = vrot.slane %v10489_v30, 2 }
 0x439   :  { %9360 = vmatprep.subr.bf16.mxu0 %v10884_v17  ;;  %9380 = vmatprep.subr.bf16.mxu1 %v10884_v17 }
 0x43c   :  { %9361 = vmatpush3.bf16.msra.mxu0 %v10435_v34  ;;  %9381 = vmatpush3.bf16.msra.mxu1 %v10436_v48  ;;  %v10491_v34 = vld [vmem:[#allocation2 + $0x238] sm:$0xff]  }
 0x43d   :  { %9386 = vmatprep.subr.bf16.mxu0 %v10884_v17  ;;  %9406 = vmatprep.subr.bf16.mxu1 %v10884_v17  ;;  %v10492_v48 = vld [vmem:[#allocation2 + $0x278] sm:$0xff]  }
 0x43f   :  { %9363 = vmatmul.mubr.bf16.vlgmr.msra.gmra.mxu0 %v2403_v42  ;;  %9383 = vmatmul.mubr.bf16.vlgmr.msra.gmra.mxu1 %v2365_v44  ;;  %v10493_v42 = vld [vmem:[#allocation2 + $0x230] sm:$0xff]   ;;  %v10495_v44 = vld [vmem:[#allocation2 + $0x228] sm:$0xff]  }
 0x440   :  { %9387 = vmatpush3.bf16.msra.mxu0 %v10438_v43  ;;  %9407 = vmatpush3.bf16.msra.mxu1 %v10439_v63  ;;  %v10494_v43 = vld [vmem:[#allocation2 + $0x270] sm:$0xff]   ;;  %v10496_v63 = vld [vmem:[#allocation2 + $0x268] sm:$0xff]  }
 0x441   :  { %9388 = vmatprep.subr.bf16.mxu0 %v10884_v17  ;;  %9408 = vmatprep.subr.bf16.mxu1 %v10884_v17 }
 0x442   :  { %9402 = vmatprep.mubr.msk.bf16.mxu0 %vm10885_vm1, %v10884_v17  ;;  %9422 = vmatprep.mubr.msk.bf16.mxu1 %vm10885_vm1, %v10884_v17 }
 0x444   :  { %9389 = vmatpush3.bf16.msra.mxu0 %v10440_v33  ;;  %9409 = vmatpush3.bf16.msra.mxu1 %v10441_v46  ;;  %v10497_v33 = vld [vmem:[#allocation2 + $0x220] sm:$0xff]  }
 0x445   :  { %9390 = vmatprep.subr.bf16.mxu0 %v10884_v17  ;;  %9410 = vmatprep.subr.bf16.mxu1 %v10884_v17  ;;  %v10498_v46 = vld [vmem:[#allocation2 + $0x260] sm:$0xff]  }
 0x448   :  { %9391 = vmatpush3.bf16.msra.mxu0 %v10442_v47  ;;  %9411 = vmatpush3.bf16.msra.mxu1 %v10443_v49  ;;  %v10499_v47 = vld [vmem:[#allocation2 + $0x218] sm:$0xff]  }
 0x449   :  { %9392 = vmatprep.subr.bf16.mxu0 %v10884_v17  ;;  %9412 = vmatprep.subr.bf16.mxu1 %v10884_v17  ;;  %v10500_v49 = vld [vmem:[#allocation2 + $0x258] sm:$0xff]  }
 0x44c   :  { %9393 = vmatpush3.bf16.msra.mxu0 %v10444_v22  ;;  %9413 = vmatpush3.bf16.msra.mxu1 %v10445_v50  ;;  %v10501_v22 = vld [vmem:[#allocation2 + $0x210] sm:$0xff]  }
 0x44d   :  { %9394 = vmatprep.subr.bf16.mxu0 %v10884_v17  ;;  %9414 = vmatprep.subr.bf16.mxu1 %v10884_v17  ;;  %v10502_v50 = vld [vmem:[#allocation2 + $0x250] sm:$0xff]  }
 0x450   :  { %9395 = vmatpush3.bf16.msra.mxu0 %v10446_v35  ;;  %9415 = vmatpush3.bf16.msra.mxu1 %v10447_v39  ;;  %v10503_v35 = vld [vmem:[#allocation2 + $0x208] sm:$0xff]  }
 0x451   :  { %9396 = vmatprep.subr.bf16.mxu0 %v10884_v17  ;;  %9416 = vmatprep.subr.bf16.mxu1 %v10884_v17  ;;  %v10504_v39 = vld [vmem:[#allocation2 + $0x248] sm:$0xff]  }
 0x454   :  { %9397 = vmatpush3.bf16.msra.mxu0 %v10448_v1  ;;  %9417 = vmatpush3.bf16.msra.mxu1 %v10449_v51  ;;  %v10505_v1 = vld [vmem:[#allocation2 + $0x200] sm:$0xff]   ;;  %v10507_v51 = vld [vmem:[#allocation3 + $0x8] ss:$0 sps:$4 sm:$0x22]  }
 0x455   :  { %9398 = vmatprep.subr.bf16.mxu0 %v10884_v17  ;;  %9418 = vmatprep.subr.bf16.mxu1 %v10884_v17  ;;  %v3376_v53 = vrot.slane %v10507_v51, 1  ;;  %v10554_v51 = vld [vmem:[#allocation2 + $0x3d0] sm:$0xff]  }
 0x458   :  { %9399 = vmatpush3.bf16.msra.mxu0 %v10450_v52  ;;  %9419 = vmatpush3.bf16.msra.mxu1 %v10451_v57  ;;  %v10506_v52 = vld [vmem:[#allocation2 + $0x240] sm:$0xff]   ;;  %v3248_v57 = vld [vmem:[#allocation3 + $0x8] sm:$0x1] }
 0x459   :  { %9400 = vmatprep.subr.bf16.mxu0 %v10884_v17  ;;  %9420 = vmatprep.subr.bf16.mxu1 %v10884_v17 }
 0x45c   :  { %9401 = vmatpush3.bf16.msra.mxu0 %v10452_v56  ;;  %9421 = vmatpush3.bf16.msra.mxu1 %v10453_v36  ;;  %v10509_v56 = vld [vmem:[#allocation2 + $0x2f8] sm:$0xff]   ;;  %v10510_v36 = vld [vmem:[#allocation2 + $0x2b0] sm:$0xff]  }
 0x45d   :  { %9426 = vmatprep.subr.bf16.mxu0 %v10884_v17  ;;  %9446 = vmatprep.subr.bf16.mxu1 %v10884_v17 }
 0x45f   :  { %9403 = vmatmul.mubr.bf16.vlgmr.msra.gmra.mxu0 %v2602_v45  ;;  %9423 = vmatmul.mubr.bf16.vlgmr.msra.gmra.mxu1 %v2714_v62  ;;  %v10511_v45 = vld [vmem:[#allocation2 + $0x2f0] sm:$0xff]   ;;  %v10512_v62 = vld [vmem:[#allocation2 + $0x2a8] sm:$0xff]  }
 0x460   :  { %9427 = vmatpush3.bf16.msra.mxu0 %v10456_v4  ;;  %9447 = vmatpush3.bf16.msra.mxu1 %v10457_v8  ;;  %v10513_v4 = vld [vmem:[#allocation2 + $0x2e8] sm:$0xff]   ;;  %v10514_v8 = vld [vmem:[#allocation2 + $0x2a0] sm:$0xff]  }
 0x461   :  { %9428 = vmatprep.subr.bf16.mxu0 %v10884_v17  ;;  %9448 = vmatprep.subr.bf16.mxu1 %v10884_v17 }
 0x462   :  { %9442 = vmatprep.mubr.msk.bf16.mxu0 %vm10885_vm1, %v10884_v17  ;;  %9462 = vmatprep.mubr.msk.bf16.mxu1 %vm10885_vm1, %v10884_v17 }
 0x464   :  { %9429 = vmatpush3.bf16.msra.mxu0 %v10458_v60  ;;  %9449 = vmatpush3.bf16.msra.mxu1 %v10459_v32  ;;  %v10515_v60 = vld [vmem:[#allocation2 + $0x2e0] sm:$0xff]   ;;  %v10516_v32 = vld [vmem:[#allocation2 + $0x298] sm:$0xff]  }
 0x465   :  { %9430 = vmatprep.subr.bf16.mxu0 %v10884_v17  ;;  %9450 = vmatprep.subr.bf16.mxu1 %v10884_v17 }
 0x468   :  { %9431 = vmatpush3.bf16.msra.mxu0 %v10460_v3  ;;  %9451 = vmatpush3.bf16.msra.mxu1 %v10461_v55  ;;  %v10517_v3 = vld [vmem:[#allocation2 + $0x2d8] sm:$0xff]   ;;  %v10518_v55 = vld [vmem:[#allocation2 + $0x290] sm:$0xff]  }
 0x469   :  { %9432 = vmatprep.subr.bf16.mxu0 %v10884_v17  ;;  %9452 = vmatprep.subr.bf16.mxu1 %v10884_v17 }
 0x46c   :  { %9433 = vmatpush3.bf16.msra.mxu0 %v10462_v9  ;;  %9453 = vmatpush3.bf16.msra.mxu1 %v10463_v54  ;;  %v10519_v9 = vld [vmem:[#allocation2 + $0x2d0] sm:$0xff]   ;;  %v10520_v54 = vld [vmem:[#allocation2 + $0x288] sm:$0xff]  }
 0x46d   :  { %9434 = vmatprep.subr.bf16.mxu0 %v10884_v17  ;;  %9454 = vmatprep.subr.bf16.mxu1 %v10884_v17 }
 0x470   :  { %9435 = vmatpush3.bf16.msra.mxu0 %v10464_v29  ;;  %9455 = vmatpush3.bf16.msra.mxu1 %v10465_v11  ;;  %v10521_v29 = vld [vmem:[#allocation2 + $0x2c8] sm:$0xff]  }
 0x471   :  { %9436 = vmatprep.subr.bf16.mxu0 %v10884_v17  ;;  %9456 = vmatprep.subr.bf16.mxu1 %v10884_v17  ;;  %v10524_v11 = vld [vmem:[#allocation3 + $0x8] ss:$0 sps:$4 sm:$0x44]  }
 0x474   :  { %9437 = vmatpush3.bf16.msra.mxu0 %v10466_v14  ;;  %9457 = vmatpush3.bf16.msra.mxu1 %v10467_v10  ;;  %v10522_v14 = vld [vmem:[#allocation2 + $0x280] sm:$0xff]   ;;  %v10525_v10 = vld [vmem:[#allocation3 + $0x8] ss:$0 sps:$4 sm:$0x88]  }
 0x475   :  { %9438 = vmatprep.subr.bf16.mxu0 %v10884_v17  ;;  %9458 = vmatprep.subr.bf16.mxu1 %v10884_v17  ;;  %v3600_v6 = vrot.slane %v10525_v10, 3  ;;  %v10565_v10 = vld [vmem:[#allocation2 + $0x428] sm:$0xff]  }
 0x478   :  { %9439 = vmatpush3.bf16.msra.mxu0 %v10468_v15  ;;  %9459 = vmatpush3.bf16.msra.mxu1 %v10469_v61  ;;  %v10523_v15 = vld [vmem:[#allocation2 + $0x2c0] sm:$0xff]   ;;  %v3488_v61 = vrot.slane %v10524_v11, 2 }
 0x479   :  { %9440 = vmatprep.subr.bf16.mxu0 %v10884_v17  ;;  %9460 = vmatprep.subr.bf16.mxu1 %v10884_v17 }
 0x47c   :  { %9441 = vmatpush3.bf16.msra.mxu0 %v10470_v0  ;;  %9461 = vmatpush3.bf16.msra.mxu1 %v10471_v12  ;;  %v10526_v0 = vld [vmem:[#allocation2 + $0x338] sm:$0xff]  }
 0x47d   :  { %9466 = vmatprep.subr.bf16.mxu0 %v10884_v17  ;;  %9486 = vmatprep.subr.bf16.mxu1 %v10884_v17  ;;  %v10527_v12 = vld [vmem:[#allocation2 + $0x378] sm:$0xff]  }
 0x47f   :  { %9443 = vmatmul.mubr.bf16.vlgmr.msra.gmra.mxu0 %v2805_v2  ;;  %9463 = vmatmul.mubr.bf16.vlgmr.msra.gmra.mxu1 %v2933_v7  ;;  %v10528_v2 = vld [vmem:[#allocation2 + $0x330] sm:$0xff]  }
 0x480   :  { %9467 = vmatpush3.bf16.msra.mxu0 %v10473_v13  ;;  %9487 = vmatpush3.bf16.msra.mxu1 %v10474_v18  ;;  %v10529_v7 = vld [vmem:[#allocation2 + $0x370] sm:$0xff]   ;;  %v10530_v13 = vld [vmem:[#allocation2 + $0x328] sm:$0xff]  }
 0x481   :  { %9468 = vmatprep.subr.bf16.mxu0 %v10884_v17  ;;  %9488 = vmatprep.subr.bf16.mxu1 %v10884_v17  ;;  %v10531_v18 = vld [vmem:[#allocation2 + $0x368] sm:$0xff]  }
 0x482   :  { %9482 = vmatprep.mubr.msk.bf16.mxu0 %vm10885_vm1, %v10884_v17  ;;  %9502 = vmatprep.mubr.msk.bf16.mxu1 %vm10885_vm1, %v10884_v17 }
 0x484   :  { %9469 = vmatpush3.bf16.msra.mxu0 %v10475_v20  ;;  %9489 = vmatpush3.bf16.msra.mxu1 %v10476_v21  ;;  %v10532_v20 = vld [vmem:[#allocation2 + $0x320] sm:$0xff]  }
 0x485   :  { %9470 = vmatprep.subr.bf16.mxu0 %v10884_v17  ;;  %9490 = vmatprep.subr.bf16.mxu1 %v10884_v17  ;;  %v10533_v21 = vld [vmem:[#allocation2 + $0x360] sm:$0xff]  }
 0x488   :  { %9471 = vmatpush3.bf16.msra.mxu0 %v10477_v23  ;;  %9491 = vmatpush3.bf16.msra.mxu1 %v10478_v5  ;;  %v10534_v23 = vld [vmem:[#allocation2 + $0x318] sm:$0xff]  }
 0x489   :  { %9472 = vmatprep.subr.bf16.mxu0 %v10884_v17  ;;  %9492 = vmatprep.subr.bf16.mxu1 %v10884_v17  ;;  %v10535_v5 = vld [vmem:[#allocation2 + $0x358] sm:$0xff]  }
 0x48c   :  { %9473 = vmatpush3.bf16.msra.mxu0 %v10479_v24  ;;  %9493 = vmatpush3.bf16.msra.mxu1 %v10480_v58  ;;  %v10536_v24 = vld [vmem:[#allocation2 + $0x310] sm:$0xff]  }
 0x48d   :  { %9474 = vmatprep.subr.bf16.mxu0 %v10884_v17  ;;  %9494 = vmatprep.subr.bf16.mxu1 %v10884_v17  ;;  %v10537_v58 = vld [vmem:[#allocation2 + $0x350] sm:$0xff]  }
 0x490   :  { %9475 = vmatpush3.bf16.msra.mxu0 %v10481_v26  ;;  %9495 = vmatpush3.bf16.msra.mxu1 %v10482_v27  ;;  %v10538_v26 = vld [vmem:[#allocation2 + $0x308] sm:$0xff]  }
 0x491   :  { %9476 = vmatprep.subr.bf16.mxu0 %v10884_v17  ;;  %9496 = vmatprep.subr.bf16.mxu1 %v10884_v17  ;;  %v10539_v27 = vld [vmem:[#allocation2 + $0x348] sm:$0xff]  }
 0x494   :  { %9477 = vmatpush3.bf16.msra.mxu0 %v10483_v38  ;;  %9497 = vmatpush3.bf16.msra.mxu1 %v10484_v25  ;;  %v10540_v38 = vld [vmem:[#allocation2 + $0x300] sm:$0xff]   ;;  %v10542_v25 = vld [vmem:[#allocation3 + $0xc] ss:$0 sps:$4 sm:$0x22]  }
 0x495   :  { %9478 = vmatprep.subr.bf16.mxu0 %v10884_v17  ;;  %9498 = vmatprep.subr.bf16.mxu1 %v10884_v17  ;;  %v3819_v30 = vrot.slane %v10542_v25, 1  ;;  %v10579_v25 = vld [vmem:[#allocation2 + $0x4f8] sm:$0xff]  }
 0x498   :  { %9479 = vmatpush3.bf16.msra.mxu0 %v10485_v19  ;;  %9499 = vmatpush3.bf16.msra.mxu1 %v10486_v28  ;;  %v10541_v19 = vld [vmem:[#allocation2 + $0x340] sm:$0xff]   ;;  %v3691_v28 = vld [vmem:[#allocation3 + $0xc] sm:$0x1] }
 0x499   :  { %9480 = vmatprep.subr.bf16.mxu0 %v10884_v17  ;;  %9500 = vmatprep.subr.bf16.mxu1 %v10884_v17 }
 0x49c   :  { %9481 = vmatpush3.bf16.msra.mxu0 %v10487_v40  ;;  %9501 = vmatpush3.bf16.msra.mxu1 %v10488_v41  ;;  %v10544_v40 = vld [vmem:[#allocation2 + $0x3f8] sm:$0xff]  }
 0x49d   :  { %9506 = vmatprep.subr.bf16.mxu0 %v10884_v17  ;;  %9526 = vmatprep.subr.bf16.mxu1 %v10884_v17 }
 0x49f   :  { %9483 = vmatmul.mubr.bf16.vlgmr.msra.gmra.mxu0 %v3045_v59  ;;  %9503 = vmatmul.mubr.bf16.vlgmr.msra.gmra.mxu1 %v3157_v31  ;;  %v10545_v59 = vld [vmem:[#allocation2 + $0x3b0] sm:$0xff]  }
 0x4a0   :  { %9507 = vmatpush3.bf16.msra.mxu0 %v10491_v34  ;;  %9527 = vmatpush3.bf16.msra.mxu1 %v10492_v48  ;;  %v10546_v31 = vld [vmem:[#allocation2 + $0x3f0] sm:$0xff]  }
 0x4a1   :  { %9508 = vmatprep.subr.bf16.mxu0 %v10884_v17  ;;  %9528 = vmatprep.subr.bf16.mxu1 %v10884_v17 }
 0x4a2   :  { %9522 = vmatprep.mubr.msk.bf16.mxu0 %vm10885_vm1, %v10884_v17  ;;  %9542 = vmatprep.mubr.msk.bf16.mxu1 %vm10885_vm1, %v10884_v17 }
 0x4a4   :  { %9509 = vmatpush3.bf16.msra.mxu0 %v10493_v42  ;;  %9529 = vmatpush3.bf16.msra.mxu1 %v10494_v43 }
 0x4a5   :  { %9510 = vmatprep.subr.bf16.mxu0 %v10884_v17  ;;  %9530 = vmatprep.subr.bf16.mxu1 %v10884_v17 }
 0x4a8   :  { %9511 = vmatpush3.bf16.msra.mxu0 %v10495_v44  ;;  %9531 = vmatpush3.bf16.msra.mxu1 %v10496_v63  ;;  %v10547_v63 = vld [vmem:[#allocation2 + $0x3a8] sm:$0xff]  }
 0x4a9   :  { %9512 = vmatprep.subr.bf16.mxu0 %v10884_v17  ;;  %9532 = vmatprep.subr.bf16.mxu1 %v10884_v17 }
 0x4ac   :  { %9513 = vmatpush3.bf16.msra.mxu0 %v10497_v33  ;;  %9533 = vmatpush3.bf16.msra.mxu1 %v10498_v46  ;;  %v10548_v33 = vld [vmem:[#allocation2 + $0x3e8] sm:$0xff]  }
 0x4ad   :  { %9514 = vmatprep.subr.bf16.mxu0 %v10884_v17  ;;  %9534 = vmatprep.subr.bf16.mxu1 %v10884_v17 }
 0x4b0   :  { %9515 = vmatpush3.bf16.msra.mxu0 %v10499_v47  ;;  %9535 = vmatpush3.bf16.msra.mxu1 %v10500_v49 }
 0x4b1   :  { %9516 = vmatprep.subr.bf16.mxu0 %v10884_v17  ;;  %9536 = vmatprep.subr.bf16.mxu1 %v10884_v17 }
 0x4b4   :  { %9517 = vmatpush3.bf16.msra.mxu0 %v10501_v22  ;;  %9537 = vmatpush3.bf16.msra.mxu1 %v10502_v50  ;;  %v10549_v22 = vld [vmem:[#allocation2 + $0x3a0] sm:$0xff]  }
 0x4b5   :  { %9518 = vmatprep.subr.bf16.mxu0 %v10884_v17  ;;  %9538 = vmatprep.subr.bf16.mxu1 %v10884_v17  ;;  %v10550_v50 = vld [vmem:[#allocation2 + $0x3e0] sm:$0xff]  }
 0x4b8   :  { %9519 = vmatpush3.bf16.msra.mxu0 %v10503_v35  ;;  %9539 = vmatpush3.bf16.msra.mxu1 %v10504_v39  ;;  %v10551_v35 = vld [vmem:[#allocation2 + $0x398] sm:$0xff]  }
 0x4b9   :  { %9520 = vmatprep.subr.bf16.mxu0 %v10884_v17  ;;  %9540 = vmatprep.subr.bf16.mxu1 %v10884_v17  ;;  %v10552_v39 = vld [vmem:[#allocation2 + $0x3d8] sm:$0xff]  }
 0x4bc   :  { %9521 = vmatpush3.bf16.msra.mxu0 %v10505_v1  ;;  %9541 = vmatpush3.bf16.msra.mxu1 %v10506_v52  ;;  %v10553_v1 = vld [vmem:[#allocation2 + $0x390] sm:$0xff]   ;;  %v10555_v52 = vld [vmem:[#allocation2 + $0x388] sm:$0xff]  }
 0x4bd   :  { %9546 = vmatprep.subr.bf16.mxu0 %v10884_v17  ;;  %9566 = vmatprep.subr.bf16.mxu1 %v10884_v17 }
 0x4bf   :  { %9523 = vmatmul.mubr.bf16.vlgmr.msra.gmra.mxu0 %v3248_v57  ;;  %9543 = vmatmul.mubr.bf16.vlgmr.msra.gmra.mxu1 %v3376_v53  ;;  %v10556_v57 = vld [vmem:[#allocation2 + $0x3c8] sm:$0xff]  }
 0x4c0   :  { %9547 = vmatpush3.bf16.msra.mxu0 %v10508_v16  ;;  %9567 = vmatpush3.bf16.msra.mxu1 %v10509_v56  ;;  %v10559_v53 = vld [vmem:[#allocation3 + $0xc] ss:$0 sps:$4 sm:$0x44]   ;;  %v10557_v16 = vld [vmem:[#allocation2 + $0x380] sm:$0xff]  }
 0x4c1   :  { %9548 = vmatprep.subr.bf16.mxu0 %v10884_v17  ;;  %9568 = vmatprep.subr.bf16.mxu1 %v10884_v17  ;;  %v10560_v56 = vld [vmem:[#allocation3 + $0xc] ss:$0 sps:$4 sm:$0x88]  }
 0x4c2   :  { %9562 = vmatprep.mubr.msk.bf16.mxu0 %vm10885_vm1, %v10884_v17  ;;  %9582 = vmatprep.mubr.msk.bf16.mxu1 %vm10885_vm1, %v10884_v17 }
 0x4c4   :  { %9549 = vmatpush3.bf16.msra.mxu0 %v10510_v36  ;;  %9569 = vmatpush3.bf16.msra.mxu1 %v10511_v45  ;;  %v10558_v36 = vld [vmem:[#allocation2 + $0x3c0] sm:$0xff]   ;;  %v3931_v45 = vrot.slane %v10559_v53, 2 }
 0x4c5   :  { %9550 = vmatprep.subr.bf16.mxu0 %v10884_v17  ;;  %9570 = vmatprep.subr.bf16.mxu1 %v10884_v17 }
 0x4c8   :  { %9551 = vmatpush3.bf16.msra.mxu0 %v10512_v62  ;;  %9571 = vmatpush3.bf16.msra.mxu1 %v10513_v4  ;;  %v4043_v62 = vrot.slane %v10560_v56, 3  ;;  %v10561_v4 = vld [vmem:[#allocation2 + $0x438] sm:$0xff]  }
 0x4c9   :  { %9552 = vmatprep.subr.bf16.mxu0 %v10884_v17  ;;  %9572 = vmatprep.subr.bf16.mxu1 %v10884_v17  ;;  %v10596_v56 = vld [vmem:[#allocation2 + $0x538] sm:$0xff]  }
 0x4cc   :  { %9553 = vmatpush3.bf16.msra.mxu0 %v10514_v8  ;;  %9573 = vmatpush3.bf16.msra.mxu1 %v10515_v60  ;;  %v10562_v8 = vld [vmem:[#allocation2 + $0x478] sm:$0xff]  }
 0x4cd   :  { %9554 = vmatprep.subr.bf16.mxu0 %v10884_v17  ;;  %9574 = vmatprep.subr.bf16.mxu1 %v10884_v17 }
 0x4d0   :  { %9555 = vmatpush3.bf16.msra.mxu0 %v10516_v32  ;;  %9575 = vmatpush3.bf16.msra.mxu1 %v10517_v3  ;;  %v10563_v32 = vld [vmem:[#allocation2 + $0x430] sm:$0xff]  }
 0x4d1   :  { %9556 = vmatprep.subr.bf16.mxu0 %v10884_v17  ;;  %9576 = vmatprep.subr.bf16.mxu1 %v10884_v17  ;;  %v10564_v3 = vld [vmem:[#allocation2 + $0x470] sm:$0xff]  }
 0x4d4   :  { %9557 = vmatpush3.bf16.msra.mxu0 %v10518_v55  ;;  %9577 = vmatpush3.bf16.msra.mxu1 %v10519_v9 }
 0x4d5   :  { %9558 = vmatprep.subr.bf16.mxu0 %v10884_v17  ;;  %9578 = vmatprep.subr.bf16.mxu1 %v10884_v17 }
 0x4d8   :  { %9559 = vmatpush3.bf16.msra.mxu0 %v10520_v54  ;;  %9579 = vmatpush3.bf16.msra.mxu1 %v10521_v29 }
 0x4d9   :  { %9560 = vmatprep.subr.bf16.mxu0 %v10884_v17  ;;  %9580 = vmatprep.subr.bf16.mxu1 %v10884_v17 }
 0x4dc   :  { %9561 = vmatpush3.bf16.msra.mxu0 %v10522_v14  ;;  %9581 = vmatpush3.bf16.msra.mxu1 %v10523_v15  ;;  %v10566_v15 = vld [vmem:[#allocation2 + $0x468] sm:$0xff]  }
 0x4dd   :  { %9586 = vmatprep.subr.bf16.mxu0 %v10884_v17  ;;  %9606 = vmatprep.subr.bf16.mxu1 %v10884_v17 }
 0x4df   :  { %9563 = vmatmul.mubr.bf16.vlgmr.msra.gmra.mxu0 %v3488_v61  ;;  %9583 = vmatmul.mubr.bf16.vlgmr.msra.gmra.mxu1 %v3600_v6 }
 0x4e0   :  { %9587 = vmatpush3.bf16.msra.mxu0 %v10526_v0  ;;  %9607 = vmatpush3.bf16.msra.mxu1 %v10527_v12  ;;  %v10567_v12 = vld [vmem:[#allocation2 + $0x420] sm:$0xff]  }
 0x4e1   :  { %9588 = vmatprep.subr.bf16.mxu0 %v10884_v17  ;;  %9608 = vmatprep.subr.bf16.mxu1 %v10884_v17 }
 0x4e2   :  { %9602 = vmatprep.mubr.msk.bf16.mxu0 %vm10885_vm1, %v10884_v17  ;;  %9622 = vmatprep.mubr.msk.bf16.mxu1 %vm10885_vm1, %v10884_v17 }
 0x4e4   :  { %9589 = vmatpush3.bf16.msra.mxu0 %v10528_v2  ;;  %9609 = vmatpush3.bf16.msra.mxu1 %v10529_v7  ;;  %v10568_v2 = vld [vmem:[#allocation2 + $0x460] sm:$0xff]   ;;  %v10569_v7 = vld [vmem:[#allocation2 + $0x418] sm:$0xff]  }
 0x4e5   :  { %9590 = vmatprep.subr.bf16.mxu0 %v10884_v17  ;;  %9610 = vmatprep.subr.bf16.mxu1 %v10884_v17 }
 0x4e8   :  { %9591 = vmatpush3.bf16.msra.mxu0 %v10530_v13  ;;  %9611 = vmatpush3.bf16.msra.mxu1 %v10531_v18  ;;  %v10570_v13 = vld [vmem:[#allocation2 + $0x458] sm:$0xff]   ;;  %v10571_v18 = vld [vmem:[#allocation2 + $0x410] sm:$0xff]  }
 0x4e9   :  { %9592 = vmatprep.subr.bf16.mxu0 %v10884_v17  ;;  %9612 = vmatprep.subr.bf16.mxu1 %v10884_v17 }
 0x4ec   :  { %9593 = vmatpush3.bf16.msra.mxu0 %v10532_v20  ;;  %9613 = vmatpush3.bf16.msra.mxu1 %v10533_v21  ;;  %v10572_v20 = vld [vmem:[#allocation2 + $0x450] sm:$0xff]   ;;  %v10573_v21 = vld [vmem:[#allocation2 + $0x408] sm:$0xff]  }
 0x4ed   :  { %9594 = vmatprep.subr.bf16.mxu0 %v10884_v17  ;;  %9614 = vmatprep.subr.bf16.mxu1 %v10884_v17 }
 0x4f0   :  { %9595 = vmatpush3.bf16.msra.mxu0 %v10534_v23  ;;  %9615 = vmatpush3.bf16.msra.mxu1 %v10535_v5  ;;  %v10574_v23 = vld [vmem:[#allocation2 + $0x448] sm:$0xff]   ;;  %v10575_v5 = vld [vmem:[#allocation2 + $0x400] sm:$0xff]  }
 0x4f1   :  { %9596 = vmatprep.subr.bf16.mxu0 %v10884_v17  ;;  %9616 = vmatprep.subr.bf16.mxu1 %v10884_v17 }
 0x4f4   :  { %9597 = vmatpush3.bf16.msra.mxu0 %v10536_v24  ;;  %9617 = vmatpush3.bf16.msra.mxu1 %v10537_v58  ;;  %v10577_v24 = vld [vmem:[#allocation3 + $0x10] ss:$0 sps:$4 sm:$0x22]   ;;  %v10576_v58 = vld [vmem:[#allocation2 + $0x440] sm:$0xff]  }
 0x4f5   :  { %9598 = vmatprep.subr.bf16.mxu0 %v10884_v17  ;;  %9618 = vmatprep.subr.bf16.mxu1 %v10884_v17 }
 0x4f8   :  { %9599 = vmatpush3.bf16.msra.mxu0 %v10538_v26  ;;  %9619 = vmatpush3.bf16.msra.mxu1 %v10539_v27  ;;  %v4134_v26 = vld [vmem:[#allocation3 + $0x10] sm:$0x1]  ;;  %v4262_v27 = vrot.slane %v10577_v24, 1  ;;  %v10613_v24 = vld [vmem:[#allocation2 + $0x5b8] sm:$0xff]  }
 0x4f9   :  { %9600 = vmatprep.subr.bf16.mxu0 %v10884_v17  ;;  %9620 = vmatprep.subr.bf16.mxu1 %v10884_v17 }
 0x4fc   :  { %9601 = vmatpush3.bf16.msra.mxu0 %v10540_v38  ;;  %9621 = vmatpush3.bf16.msra.mxu1 %v10541_v19  ;;  %v10578_v38 = vld [vmem:[#allocation2 + $0x4b8] sm:$0xff]  }
 0x4fd   :  { %9626 = vmatprep.subr.bf16.mxu0 %v10884_v17  ;;  %9646 = vmatprep.subr.bf16.mxu1 %v10884_v17 }
 0x4ff   :  { %v2487_v41 = vpop.f32.mrf.mxu0  ;;  %9603 = vmatmul.mubr.bf16.vlgmr.msra.gmra.mxu0 %v3691_v28  ;;  %v2575_v34 = vpop.f32.mrf.mxu1  ;;  %9623 = vmatmul.mubr.bf16.vlgmr.msra.gmra.mxu1 %v3819_v30  ;;  %v10580_v28 = vld [vmem:[#allocation2 + $0x4b0] sm:$0xff]  }
 0x500   :  { %9627 = vmatpush3.bf16.msra.mxu0 %v10543_v37  ;;  %v2576_v48 = vadd.f32 %v2575_v34, %v2487_v41  ;;  %9647 = vmatpush3.bf16.msra.mxu1 %v10544_v40  ;;  %v10581_v30 = vld [vmem:[#allocation2 + $0x4f0] sm:$0xff]  }
 0x501   :  { %v9364_v42 = vpop.f32.mrf.mxu0  ;;  %9628 = vmatprep.subr.bf16.mxu0 %v10884_v17  ;;  %v9384_v43 = vpop.f32.mrf.mxu1  ;;  %9648 = vmatprep.subr.bf16.mxu1 %v10884_v17 }
 0x502   :  { %9642 = vmatprep.mubr.msk.bf16.mxu0 %vm10885_vm1, %v10884_v17  ;;  %9662 = vmatprep.mubr.msk.bf16.mxu1 %vm10885_vm1, %v10884_v17  ;;  %v10583_v42 = vld [vmem:[#allocation2 + $0x4e8] sm:$0xff]  }
 0x503   :  { %v2490_v44 = vpop.f32.mrf.mxu0  ;;  %v2578_v46 = vpop.f32.mrf.mxu1 }
 0x504   :  { %9629 = vmatpush3.bf16.msra.mxu0 %v10545_v59  ;;  %9649 = vmatpush3.bf16.msra.mxu1 %v10546_v31  ;;  %v10585_v46 = vld [vmem:[#allocation2 + $0x4e0] sm:$0xff]  }
 0x505   :  { %v9365_v47 = vpop.f32.mrf.mxu0  ;;  %9630 = vmatprep.subr.bf16.mxu0 %v10884_v17  ;;  %v9385_v49 = vpop.f32.mrf.mxu1  ;;  %9650 = vmatprep.subr.bf16.mxu1 %v10884_v17 }
 0x506   :  { %v10586_v47 = vld [vmem:[#allocation2 + $0x498] sm:$0xff]  }
 0x507   :  { %v10587_v49 = vld [vmem:[#allocation2 + $0x4d8] sm:$0xff]  }
 0x508   :  { %9631 = vmatpush3.bf16.msra.mxu0 %v10547_v63  ;;  %9651 = vmatpush3.bf16.msra.mxu1 %v10548_v33  ;;  %v10584_v33 = vld [vmem:[#allocation2 + $0x4a0] sm:$0xff]  }
 0x509   :  { %9632 = vmatprep.subr.bf16.mxu0 %v10884_v17  ;;  %9652 = vmatprep.subr.bf16.mxu1 %v10884_v17 }
 0x50c   :  { %9633 = vmatpush3.bf16.msra.mxu0 %v10549_v22  ;;  %9653 = vmatpush3.bf16.msra.mxu1 %v10550_v50  ;;  %v10588_v22 = vld [vmem:[#allocation2 + $0x490] sm:$0xff]  }
 0x50d   :  { %9634 = vmatprep.subr.bf16.mxu0 %v10884_v17  ;;  %9654 = vmatprep.subr.bf16.mxu1 %v10884_v17  ;;  %v10589_v50 = vld [vmem:[#allocation2 + $0x4d0] sm:$0xff]  }
 0x510   :  { %9635 = vmatpush3.bf16.msra.mxu0 %v10551_v35  ;;  %9655 = vmatpush3.bf16.msra.mxu1 %v10552_v39  ;;  %v10590_v35 = vld [vmem:[#allocation2 + $0x488] sm:$0xff]  }
 0x511   :  { %9636 = vmatprep.subr.bf16.mxu0 %v10884_v17  ;;  %9656 = vmatprep.subr.bf16.mxu1 %v10884_v17  ;;  %v10591_v39 = vld [vmem:[#allocation2 + $0x4c8] sm:$0xff]  }
 0x514   :  { %9637 = vmatpush3.bf16.msra.mxu0 %v10553_v1  ;;  %9657 = vmatpush3.bf16.msra.mxu1 %v10554_v51  ;;  %v10594_v1 = vld [vmem:[#allocation3 + $0x10] ss:$0 sps:$4 sm:$0x44]   ;;  %v10592_v51 = vld [vmem:[#allocation2 + $0x480] sm:$0xff]  }
 0x515   :  { %9638 = vmatprep.subr.bf16.mxu0 %v10884_v17  ;;  %9658 = vmatprep.subr.bf16.mxu1 %v10884_v17  ;;  %v4374_v53 = vrot.slane %v10594_v1, 2 }
 0x518   :  { %9639 = vmatpush3.bf16.msra.mxu0 %v10555_v52  ;;  %9659 = vmatpush3.bf16.msra.mxu1 %v10556_v57  ;;  %v10595_v52 = vld [vmem:[#allocation3 + $0x10] ss:$0 sps:$4 sm:$0x88]   ;;  %v10593_v57 = vld [vmem:[#allocation2 + $0x4c0] sm:$0xff]  }
 0x519   :  { %9640 = vmatprep.subr.bf16.mxu0 %v10884_v17  ;;  %9660 = vmatprep.subr.bf16.mxu1 %v10884_v17 }
 0x51c   :  { %9641 = vmatpush3.bf16.msra.mxu0 %v10557_v16  ;;  %9661 = vmatpush3.bf16.msra.mxu1 %v10558_v36  ;;  %v4486_v16 = vrot.slane %v10595_v52, 3  ;;  %v10597_v36 = vld [vmem:[#allocation2 + $0x578] sm:$0xff]  }
 0x51d   :  { %9666 = vmatprep.subr.bf16.mxu0 %v10884_v17  ;;  %9686 = vmatprep.subr.bf16.mxu1 %v10884_v17  ;;  %v10631_v52 = vld [vmem:[#allocation2 + $0x638] sm:$0xff]  }
 0x51f   :  { %v2686_v60 = vpop.f32.mrf.mxu0  ;;  %9643 = vmatmul.mubr.bf16.vlgmr.msra.gmra.mxu0 %v3931_v45  ;;  %v2798_v9 = vpop.f32.mrf.mxu1  ;;  %9663 = vmatmul.mubr.bf16.vlgmr.msra.gmra.mxu1 %v4043_v62  ;;  %v10598_v62 = vld [vmem:[#allocation2 + $0x530] sm:$0xff]  }
 0x520   :  { %v2692_v55 = vadd.f32 %v2686_v60, %v2576_v48  ;;  %9667 = vmatpush3.bf16.msra.mxu0 %v10561_v4  ;;  %9687 = vmatpush3.bf16.msra.mxu1 %v10562_v8  ;;  %v10582_v48 = vld [vmem:[#allocation2 + $0x4a8] sm:$0xff]   ;;  %v10599_v4 = vld [vmem:[#allocation2 + $0x570] sm:$0xff]  }
 0x521   :  { %v9404_v54 = vpop.f32.mrf.mxu0  ;;  %9668 = vmatprep.subr.bf16.mxu0 %v10884_v17  ;;  %v9424_v11 = vpop.f32.mrf.mxu1  ;;  %9688 = vmatprep.subr.bf16.mxu1 %v10884_v17 }
 0x522   :  { %v2804_v29 = vadd.f32 %v2798_v9, %v2692_v55  ;;  %9682 = vmatprep.mubr.msk.bf16.mxu0 %vm10885_vm1, %v10884_v17  ;;  %9702 = vmatprep.mubr.msk.bf16.mxu1 %vm10885_vm1, %v10884_v17  ;;  %v10600_v54 = vld [vmem:[#allocation2 + $0x528] sm:$0xff]  }
 0x523   :  { %v2689_v14 = vpop.f32.mrf.mxu0  ;;  %v2801_v61 = vpop.f32.mrf.mxu1 }
 0x524   :  { %9669 = vmatpush3.bf16.msra.mxu0 %v10563_v32  ;;  %9689 = vmatpush3.bf16.msra.mxu1 %v10564_v3  ;;  %v10603_v61 = vld [vmem:[#allocation2 + $0x560] sm:$0xff]  }
 0x525   :  { %v9405_v6 = vpop.f32.mrf.mxu0  ;;  %9670 = vmatprep.subr.bf16.mxu0 %v10884_v17  ;;  %v9425_v0 = vpop.f32.mrf.mxu1  ;;  %9690 = vmatprep.subr.bf16.mxu1 %v10884_v17 }
 0x526   :  { %v10604_v6 = vld [vmem:[#allocation2 + $0x518] sm:$0xff]  }
 0x527   :  { %v10605_v0 = vld [vmem:[#allocation2 + $0x558] sm:$0xff]  }
 0x528   :  { %9671 = vmatpush3.bf16.msra.mxu0 %v10565_v10  ;;  %9691 = vmatpush3.bf16.msra.mxu1 %v10566_v15  ;;  %v10602_v15 = vld [vmem:[#allocation2 + $0x520] sm:$0xff]  }
 0x529   :  { %9672 = vmatprep.subr.bf16.mxu0 %v10884_v17  ;;  %9692 = vmatprep.subr.bf16.mxu1 %v10884_v17 }
 0x52c   :  { %9673 = vmatpush3.bf16.msra.mxu0 %v10567_v12  ;;  %9693 = vmatpush3.bf16.msra.mxu1 %v10568_v2  ;;  %v10606_v12 = vld [vmem:[#allocation2 + $0x510] sm:$0xff]  }
 0x52d   :  { %9674 = vmatprep.subr.bf16.mxu0 %v10884_v17  ;;  %9694 = vmatprep.subr.bf16.mxu1 %v10884_v17  ;;  %v10607_v2 = vld [vmem:[#allocation2 + $0x550] sm:$0xff]  }
 0x530   :  { %9675 = vmatpush3.bf16.msra.mxu0 %v10569_v7  ;;  %9695 = vmatpush3.bf16.msra.mxu1 %v10570_v13  ;;  %v10608_v7 = vld [vmem:[#allocation2 + $0x508] sm:$0xff]  }
 0x531   :  { %9676 = vmatprep.subr.bf16.mxu0 %v10884_v17  ;;  %9696 = vmatprep.subr.bf16.mxu1 %v10884_v17  ;;  %v10609_v13 = vld [vmem:[#allocation2 + $0x548] sm:$0xff]  }
 0x534   :  { %9677 = vmatpush3.bf16.msra.mxu0 %v10571_v18  ;;  %9697 = vmatpush3.bf16.msra.mxu1 %v10572_v20  ;;  %v10610_v18 = vld [vmem:[#allocation2 + $0x500] sm:$0xff]   ;;  %v10612_v20 = vld [vmem:[#allocation3 + $0x14] ss:$0 sps:$4 sm:$0x22]  }
 0x535   :  { %9678 = vmatprep.subr.bf16.mxu0 %v10884_v17  ;;  %9698 = vmatprep.subr.bf16.mxu1 %v10884_v17 }
 0x538   :  { %9679 = vmatpush3.bf16.msra.mxu0 %v10573_v21  ;;  %9699 = vmatpush3.bf16.msra.mxu1 %v10574_v23  ;;  %v10611_v21 = vld [vmem:[#allocation2 + $0x540] sm:$0xff]   ;;  %v4577_v23 = vld [vmem:[#allocation3 + $0x14] sm:$0x1] }
 0x539   :  { %9680 = vmatprep.subr.bf16.mxu0 %v10884_v17  ;;  %9700 = vmatprep.subr.bf16.mxu1 %v10884_v17 }
 0x53c   :  { %9681 = vmatpush3.bf16.msra.mxu0 %v10575_v5  ;;  %9701 = vmatpush3.bf16.msra.mxu1 %v10576_v58  ;;  %v4705_v5 = vrot.slane %v10612_v20, 1  ;;  %v10614_v58 = vld [vmem:[#allocation2 + $0x5f8] sm:$0xff]  }
 0x53d   :  { %9706 = vmatprep.subr.bf16.mxu0 %v10884_v17  ;;  %9726 = vmatprep.subr.bf16.mxu1 %v10884_v17  ;;  %v10648_v20 = vld [vmem:[#allocation2 + $0x6b8] sm:$0xff]  }
 0x53f   :  { %v2905_v19 = vpop.f32.mrf.mxu0  ;;  %9683 = vmatmul.mubr.bf16.vlgmr.msra.gmra.mxu0 %v4134_v26  ;;  %v3017_v40 = vpop.f32.mrf.mxu1  ;;  %9703 = vmatmul.mubr.bf16.vlgmr.msra.gmra.mxu1 %v4262_v27  ;;  %v10615_v27 = vld [vmem:[#allocation2 + $0x5b0] sm:$0xff]  }
 0x540   :  { %v2911_v37 = vadd.f32 %v2905_v19, %v2804_v29  ;;  %9707 = vmatpush3.bf16.msra.mxu0 %v10578_v38  ;;  %9727 = vmatpush3.bf16.msra.mxu1 %v10579_v25  ;;  %v10601_v29 = vld [vmem:[#allocation2 + $0x568] sm:$0xff]   ;;  %v10616_v38 = vld [vmem:[#allocation2 + $0x5f0] sm:$0xff]  }
 0x541   :  { %v9444_v41 = vpop.f32.mrf.mxu0  ;;  %9708 = vmatprep.subr.bf16.mxu0 %v10884_v17  ;;  %v9464_v31 = vpop.f32.mrf.mxu1  ;;  %9728 = vmatprep.subr.bf16.mxu1 %v10884_v17 }
 0x542   :  { %v3023_v59 = vadd.f32 %v3017_v40, %v2911_v37  ;;  %9722 = vmatprep.mubr.msk.bf16.mxu0 %vm10885_vm1, %v10884_v17  ;;  %9742 = vmatprep.mubr.msk.bf16.mxu1 %vm10885_vm1, %v10884_v17  ;;  %v10617_v41 = vld [vmem:[#allocation2 + $0x5a8] sm:$0xff]  }
 0x543   :  { %v2908_v34 = vpop.f32.mrf.mxu0  ;;  %v3020_v43 = vpop.f32.mrf.mxu1 }
 0x544   :  { %9709 = vmatpush3.bf16.msra.mxu0 %v10580_v28  ;;  %9729 = vmatpush3.bf16.msra.mxu1 %v10581_v30  ;;  %v10620_v43 = vld [vmem:[#allocation2 + $0x5e0] sm:$0xff]  }
 0x545   :  { %v9445_v44 = vpop.f32.mrf.mxu0  ;;  %9710 = vmatprep.subr.bf16.mxu0 %v10884_v17  ;;  %v9465_v63 = vpop.f32.mrf.mxu1  ;;  %9730 = vmatprep.subr.bf16.mxu1 %v10884_v17 }
 0x546   :  { %v10621_v44 = vld [vmem:[#allocation2 + $0x598] sm:$0xff]  }
 0x547   :  { %v10622_v63 = vld [vmem:[#allocation2 + $0x5d8] sm:$0xff]  }
 0x548   :  { %9711 = vmatpush3.bf16.msra.mxu0 %v10582_v48  ;;  %9731 = vmatpush3.bf16.msra.mxu1 %v10583_v42  ;;  %v10619_v42 = vld [vmem:[#allocation2 + $0x5a0] sm:$0xff]  }
 0x549   :  { %9712 = vmatprep.subr.bf16.mxu0 %v10884_v17  ;;  %9732 = vmatprep.subr.bf16.mxu1 %v10884_v17 }
 0x54c   :  { %9713 = vmatpush3.bf16.msra.mxu0 %v10584_v33  ;;  %9733 = vmatpush3.bf16.msra.mxu1 %v10585_v46  ;;  %v10623_v33 = vld [vmem:[#allocation2 + $0x590] sm:$0xff]  }
 0x54d   :  { %9714 = vmatprep.subr.bf16.mxu0 %v10884_v17  ;;  %9734 = vmatprep.subr.bf16.mxu1 %v10884_v17  ;;  %v10624_v46 = vld [vmem:[#allocation2 + $0x5d0] sm:$0xff]  }
 0x550   :  { %9715 = vmatpush3.bf16.msra.mxu0 %v10586_v47  ;;  %9735 = vmatpush3.bf16.msra.mxu1 %v10587_v49  ;;  %v10625_v47 = vld [vmem:[#allocation2 + $0x588] sm:$0xff]  }
 0x551   :  { %9716 = vmatprep.subr.bf16.mxu0 %v10884_v17  ;;  %9736 = vmatprep.subr.bf16.mxu1 %v10884_v17  ;;  %v10626_v49 = vld [vmem:[#allocation2 + $0x5c8] sm:$0xff]  }
 0x554   :  { %9717 = vmatpush3.bf16.msra.mxu0 %v10588_v22  ;;  %9737 = vmatpush3.bf16.msra.mxu1 %v10589_v50  ;;  %v10629_v22 = vld [vmem:[#allocation3 + $0x14] ss:$0 sps:$4 sm:$0x44]   ;;  %v10627_v50 = vld [vmem:[#allocation2 + $0x580] sm:$0xff]  }
 0x555   :  { %9718 = vmatprep.subr.bf16.mxu0 %v10884_v17  ;;  %9738 = vmatprep.subr.bf16.mxu1 %v10884_v17  ;;  %v4817_v1 = vrot.slane %v10629_v22, 2 }
 0x558   :  { %9719 = vmatpush3.bf16.msra.mxu0 %v10590_v35  ;;  %9739 = vmatpush3.bf16.msra.mxu1 %v10591_v39  ;;  %v10630_v35 = vld [vmem:[#allocation3 + $0x14] ss:$0 sps:$4 sm:$0x88]   ;;  %v10628_v39 = vld [vmem:[#allocation2 + $0x5c0] sm:$0xff]  }
 0x559   :  { %9720 = vmatprep.subr.bf16.mxu0 %v10884_v17  ;;  %9740 = vmatprep.subr.bf16.mxu1 %v10884_v17 }
 0x55c   :  { %9721 = vmatpush3.bf16.msra.mxu0 %v10592_v51  ;;  %9741 = vmatpush3.bf16.msra.mxu1 %v10593_v57  ;;  %v4929_v51 = vrot.slane %v10630_v35, 3  ;;  %v10632_v57 = vld [vmem:[#allocation2 + $0x678] sm:$0xff]  }
 0x55d   :  { %9746 = vmatprep.subr.bf16.mxu0 %v10884_v17  ;;  %9766 = vmatprep.subr.bf16.mxu1 %v10884_v17  ;;  %v10666_v35 = vld [vmem:[#allocation2 + $0x738] sm:$0xff]  }
 0x55f   :  { %v3129_v45 = vpop.f32.mrf.mxu0  ;;  %9723 = vmatmul.mubr.bf16.vlgmr.msra.gmra.mxu0 %v4374_v53  ;;  %v3241_v60 = vpop.f32.mrf.mxu1  ;;  %9743 = vmatmul.mubr.bf16.vlgmr.msra.gmra.mxu1 %v4486_v16 }
 0x560   :  { %v3135_v8 = vadd.f32 %v3129_v45, %v3023_v59  ;;  %9747 = vmatpush3.bf16.msra.mxu0 %v10596_v56  ;;  %9767 = vmatpush3.bf16.msra.mxu1 %v10597_v36  ;;  %v10618_v59 = vld [vmem:[#allocation2 + $0x5e8] sm:$0xff]   ;;  %v10633_v36 = vld [vmem:[#allocation2 + $0x630] sm:$0xff]  }
 0x561   :  { %v9484_v32 = vpop.f32.mrf.mxu0  ;;  %9748 = vmatprep.subr.bf16.mxu0 %v10884_v17  ;;  %v9504_v55 = vpop.f32.mrf.mxu1  ;;  %9768 = vmatprep.subr.bf16.mxu1 %v10884_v17 }
 0x562   :  { %v3247_v3 = vadd.f32 %v3241_v60, %v3135_v8  ;;  %9762 = vmatprep.mubr.msk.bf16.mxu0 %vm10885_vm1, %v10884_v17  ;;  %9782 = vmatprep.mubr.msk.bf16.mxu1 %vm10885_vm1, %v10884_v17 }
 0x563   :  { %v3132_v9 = vpop.f32.mrf.mxu0  ;;  %v3244_v11 = vpop.f32.mrf.mxu1 }
 0x564   :  { %9749 = vmatpush3.bf16.msra.mxu0 %v10598_v62  ;;  %9769 = vmatpush3.bf16.msra.mxu1 %v10599_v4  ;;  %v10634_v62 = vld [vmem:[#allocation2 + $0x670] sm:$0xff]   ;;  %v10636_v9 = vld [vmem:[#allocation2 + $0x668] sm:$0xff]   ;;  %v10638_v11 = vld [vmem:[#allocation2 + $0x660] sm:$0xff]  }
 0x565   :  { %v9485_v14 = vpop.f32.mrf.mxu0  ;;  %9750 = vmatprep.subr.bf16.mxu0 %v10884_v17  ;;  %v9505_v10 = vpop.f32.mrf.mxu1  ;;  %9770 = vmatprep.subr.bf16.mxu1 %v10884_v17 }
 0x566   :  { %v10639_v14 = vld [vmem:[#allocation2 + $0x618] sm:$0xff]  }
 0x567   :  { %v10640_v10 = vld [vmem:[#allocation2 + $0x658] sm:$0xff]  }
 0x568   :  { %9751 = vmatpush3.bf16.msra.mxu0 %v10600_v54  ;;  %9771 = vmatpush3.bf16.msra.mxu1 %v10601_v29  ;;  %v10637_v29 = vld [vmem:[#allocation2 + $0x620] sm:$0xff]  }
 0x569   :  { %9752 = vmatprep.subr.bf16.mxu0 %v10884_v17  ;;  %9772 = vmatprep.subr.bf16.mxu1 %v10884_v17 }
 0x56c   :  { %9753 = vmatpush3.bf16.msra.mxu0 %v10602_v15  ;;  %9773 = vmatpush3.bf16.msra.mxu1 %v10603_v61  ;;  %v10641_v15 = vld [vmem:[#allocation2 + $0x610] sm:$0xff]  }
 0x56d   :  { %9754 = vmatprep.subr.bf16.mxu0 %v10884_v17  ;;  %9774 = vmatprep.subr.bf16.mxu1 %v10884_v17  ;;  %v10642_v61 = vld [vmem:[#allocation2 + $0x650] sm:$0xff]  }
 0x570   :  { %9755 = vmatpush3.bf16.msra.mxu0 %v10604_v6  ;;  %9775 = vmatpush3.bf16.msra.mxu1 %v10605_v0  ;;  %v10643_v6 = vld [vmem:[#allocation2 + $0x608] sm:$0xff]  }
 0x571   :  { %9756 = vmatprep.subr.bf16.mxu0 %v10884_v17  ;;  %9776 = vmatprep.subr.bf16.mxu1 %v10884_v17  ;;  %v10644_v0 = vld [vmem:[#allocation2 + $0x648] sm:$0xff]  }
 0x574   :  { %9757 = vmatpush3.bf16.msra.mxu0 %v10606_v12  ;;  %9777 = vmatpush3.bf16.msra.mxu1 %v10607_v2  ;;  %v10645_v12 = vld [vmem:[#allocation2 + $0x600] sm:$0xff]   ;;  %v10647_v2 = vld [vmem:[#allocation3 + $0x18] ss:$0 sps:$4 sm:$0x22]  }
 0x575   :  { %9758 = vmatprep.subr.bf16.mxu0 %v10884_v17  ;;  %9778 = vmatprep.subr.bf16.mxu1 %v10884_v17 }
 0x578   :  { %9759 = vmatpush3.bf16.msra.mxu0 %v10608_v7  ;;  %9779 = vmatpush3.bf16.msra.mxu1 %v10609_v13  ;;  %v10646_v7 = vld [vmem:[#allocation2 + $0x640] sm:$0xff]   ;;  %v5020_v13 = vld [vmem:[#allocation3 + $0x18] sm:$0x1] }
 0x579   :  { %9760 = vmatprep.subr.bf16.mxu0 %v10884_v17  ;;  %9780 = vmatprep.subr.bf16.mxu1 %v10884_v17 }
 0x57c   :  { %9761 = vmatpush3.bf16.msra.mxu0 %v10610_v18  ;;  %9781 = vmatpush3.bf16.msra.mxu1 %v10611_v21  ;;  %v5148_v18 = vrot.slane %v10647_v2, 1  ;;  %v10649_v21 = vld [vmem:[#allocation2 + $0x6f8] sm:$0xff]  }
 0x57d   :  { %9786 = vmatprep.subr.bf16.mxu0 %v10884_v17  ;;  %9806 = vmatprep.subr.bf16.mxu1 %v10884_v17  ;;  %v10683_v2 = vld [vmem:[#allocation2 + $0x7b8] sm:$0xff]  }
 0x57f   :  { %v3348_v26 = vpop.f32.mrf.mxu0  ;;  %9763 = vmatmul.mubr.bf16.vlgmr.msra.gmra.mxu0 %v4577_v23  ;;  %v3460_v19 = vpop.f32.mrf.mxu1  ;;  %9783 = vmatmul.mubr.bf16.vlgmr.msra.gmra.mxu1 %v4705_v5 }
 0x580   :  { %v3354_v25 = vadd.f32 %v3348_v26, %v3247_v3  ;;  %9787 = vmatpush3.bf16.msra.mxu0 %v10613_v24  ;;  %9807 = vmatpush3.bf16.msra.mxu1 %v10614_v58  ;;  %v10635_v3 = vld [vmem:[#allocation2 + $0x628] sm:$0xff]   ;;  %v10650_v58 = vld [vmem:[#allocation2 + $0x6b0] sm:$0xff]  }
 0x581   :  { %v9524_v28 = vpop.f32.mrf.mxu0  ;;  %9788 = vmatprep.subr.bf16.mxu0 %v10884_v17  ;;  %v9544_v37 = vpop.f32.mrf.mxu1  ;;  %9808 = vmatprep.subr.bf16.mxu1 %v10884_v17 }
 0x582   :  { %v3466_v30 = vadd.f32 %v3460_v19, %v3354_v25  ;;  %9802 = vmatprep.mubr.msk.bf16.mxu0 %vm10885_vm1, %v10884_v17  ;;  %9822 = vmatprep.mubr.msk.bf16.mxu1 %vm10885_vm1, %v10884_v17 }
 0x583   :  { %v3351_v40 = vpop.f32.mrf.mxu0  ;;  %v3463_v31 = vpop.f32.mrf.mxu1 }
 0x584   :  { %9789 = vmatpush3.bf16.msra.mxu0 %v10615_v27  ;;  %9809 = vmatpush3.bf16.msra.mxu1 %v10616_v38  ;;  %v10651_v27 = vld [vmem:[#allocation2 + $0x6f0] sm:$0xff]   ;;  %v10653_v40 = vld [vmem:[#allocation2 + $0x6e8] sm:$0xff]   ;;  %v10655_v31 = vld [vmem:[#allocation2 + $0x6e0] sm:$0xff]  }
 0x585   :  { %v9525_v34 = vpop.f32.mrf.mxu0  ;;  %9790 = vmatprep.subr.bf16.mxu0 %v10884_v17  ;;  %v9545_v48 = vpop.f32.mrf.mxu1  ;;  %9810 = vmatprep.subr.bf16.mxu1 %v10884_v17 }
 0x586   :  { %v10656_v34 = vld [vmem:[#allocation2 + $0x698] sm:$0xff]  }
 0x587   :  { %v10657_v48 = vld [vmem:[#allocation2 + $0x6d8] sm:$0xff]  }
 0x588   :  { %9791 = vmatpush3.bf16.msra.mxu0 %v10617_v41  ;;  %9811 = vmatpush3.bf16.msra.mxu1 %v10618_v59  ;;  %v10654_v59 = vld [vmem:[#allocation2 + $0x6a0] sm:$0xff]  }
 0x589   :  { %9792 = vmatprep.subr.bf16.mxu0 %v10884_v17  ;;  %9812 = vmatprep.subr.bf16.mxu1 %v10884_v17 }
 0x58c   :  { %9793 = vmatpush3.bf16.msra.mxu0 %v10619_v42  ;;  %9813 = vmatpush3.bf16.msra.mxu1 %v10620_v43  ;;  %v10658_v42 = vld [vmem:[#allocation2 + $0x690] sm:$0xff]  }
 0x58d   :  { %9794 = vmatprep.subr.bf16.mxu0 %v10884_v17  ;;  %9814 = vmatprep.subr.bf16.mxu1 %v10884_v17  ;;  %v10659_v43 = vld [vmem:[#allocation2 + $0x6d0] sm:$0xff]  }
 0x590   :  { %9795 = vmatpush3.bf16.msra.mxu0 %v10621_v44  ;;  %9815 = vmatpush3.bf16.msra.mxu1 %v10622_v63  ;;  %v10660_v44 = vld [vmem:[#allocation2 + $0x688] sm:$0xff]  }
 0x591   :  { %9796 = vmatprep.subr.bf16.mxu0 %v10884_v17  ;;  %9816 = vmatprep.subr.bf16.mxu1 %v10884_v17  ;;  %v10661_v63 = vld [vmem:[#allocation2 + $0x6c8] sm:$0xff]  }
 0x594   :  { %9797 = vmatpush3.bf16.msra.mxu0 %v10623_v33  ;;  %9817 = vmatpush3.bf16.msra.mxu1 %v10624_v46  ;;  %v10664_v33 = vld [vmem:[#allocation3 + $0x18] ss:$0 sps:$4 sm:$0x44]   ;;  %v10662_v46 = vld [vmem:[#allocation2 + $0x680] sm:$0xff]  }
 0x595   :  { %9798 = vmatprep.subr.bf16.mxu0 %v10884_v17  ;;  %9818 = vmatprep.subr.bf16.mxu1 %v10884_v17  ;;  %v5260_v22 = vrot.slane %v10664_v33, 2 }
 0x598   :  { %9799 = vmatpush3.bf16.msra.mxu0 %v10625_v47  ;;  %9819 = vmatpush3.bf16.msra.mxu1 %v10626_v49  ;;  %v10665_v47 = vld [vmem:[#allocation3 + $0x18] ss:$0 sps:$4 sm:$0x88]   ;;  %v10663_v49 = vld [vmem:[#allocation2 + $0x6c0] sm:$0xff]  }
 0x599   :  { %9800 = vmatprep.subr.bf16.mxu0 %v10884_v17  ;;  %9820 = vmatprep.subr.bf16.mxu1 %v10884_v17 }
 0x59c   :  { %9801 = vmatpush3.bf16.msra.mxu0 %v10627_v50  ;;  %9821 = vmatpush3.bf16.msra.mxu1 %v10628_v39  ;;  %v5372_v50 = vrot.slane %v10665_v47, 3  ;;  %v10667_v39 = vld [vmem:[#allocation2 + $0x778] sm:$0xff]  }
 0x59d   :  { %9826 = vmatprep.subr.bf16.mxu0 %v10884_v17  ;;  %9846 = vmatprep.subr.bf16.mxu1 %v10884_v17  ;;  %v10701_v47 = vld [vmem:[#allocation2 + $0x838] sm:$0xff]  }
 0x59f   :  { %v3572_v53 = vpop.f32.mrf.mxu0  ;;  %9803 = vmatmul.mubr.bf16.vlgmr.msra.gmra.mxu0 %v4817_v1  ;;  %v3684_v56 = vpop.f32.mrf.mxu1  ;;  %9823 = vmatmul.mubr.bf16.vlgmr.msra.gmra.mxu1 %v4929_v51 }
 0x5a0   :  { %v3578_v16 = vadd.f32 %v3572_v53, %v3466_v30  ;;  %9827 = vmatpush3.bf16.msra.mxu0 %v10631_v52  ;;  %9847 = vmatpush3.bf16.msra.mxu1 %v10632_v57  ;;  %v10652_v30 = vld [vmem:[#allocation2 + $0x6a8] sm:$0xff]   ;;  %v10668_v57 = vld [vmem:[#allocation2 + $0x730] sm:$0xff]  }
 0x5a1   :  { %v9564_v45 = vpop.f32.mrf.mxu0  ;;  %9828 = vmatprep.subr.bf16.mxu0 %v10884_v17  ;;  %v9584_v8 = vpop.f32.mrf.mxu1  ;;  %9848 = vmatprep.subr.bf16.mxu1 %v10884_v17 }
 0x5a2   :  { %v3690_v4 = vadd.f32 %v3684_v56, %v3578_v16  ;;  %9842 = vmatprep.mubr.msk.bf16.mxu0 %vm10885_vm1, %v10884_v17  ;;  %9862 = vmatprep.mubr.msk.bf16.mxu1 %vm10885_vm1, %v10884_v17  ;;  %v10669_v16 = vld [vmem:[#allocation2 + $0x770] sm:$0xff]  }
 0x5a3   :  { %v3575_v60 = vpop.f32.mrf.mxu0  ;;  %v3687_v32 = vpop.f32.mrf.mxu1 }
 0x5a4   :  { %9829 = vmatpush3.bf16.msra.mxu0 %v10633_v36  ;;  %9849 = vmatpush3.bf16.msra.mxu1 %v10634_v62  ;;  %v10671_v60 = vld [vmem:[#allocation2 + $0x768] sm:$0xff]  }
 0x5a5   :  { %v9565_v55 = vpop.f32.mrf.mxu0  ;;  %9830 = vmatprep.subr.bf16.mxu0 %v10884_v17  ;;  %v9585_v54 = vpop.f32.mrf.mxu1  ;;  %9850 = vmatprep.subr.bf16.mxu1 %v10884_v17 }
 0x5a6   :  { %v10673_v55 = vld [vmem:[#allocation2 + $0x760] sm:$0xff]   ;;  %v10675_v54 = vld [vmem:[#allocation2 + $0x758] sm:$0xff]  }
 0x5a8   :  { %9831 = vmatpush3.bf16.msra.mxu0 %v10635_v3  ;;  %9851 = vmatpush3.bf16.msra.mxu1 %v10636_v9  ;;  %v10672_v3 = vld [vmem:[#allocation2 + $0x720] sm:$0xff]   ;;  %v10674_v9 = vld [vmem:[#allocation2 + $0x718] sm:$0xff]  }
 0x5a9   :  { %9832 = vmatprep.subr.bf16.mxu0 %v10884_v17  ;;  %9852 = vmatprep.subr.bf16.mxu1 %v10884_v17 }
 0x5ac   :  { %9833 = vmatpush3.bf16.msra.mxu0 %v10637_v29  ;;  %9853 = vmatpush3.bf16.msra.mxu1 %v10638_v11  ;;  %v10676_v29 = vld [vmem:[#allocation2 + $0x710] sm:$0xff]  }
 0x5ad   :  { %9834 = vmatprep.subr.bf16.mxu0 %v10884_v17  ;;  %9854 = vmatprep.subr.bf16.mxu1 %v10884_v17  ;;  %v10677_v11 = vld [vmem:[#allocation2 + $0x750] sm:$0xff]  }
 0x5b0   :  { %9835 = vmatpush3.bf16.msra.mxu0 %v10639_v14  ;;  %9855 = vmatpush3.bf16.msra.mxu1 %v10640_v10  ;;  %v10678_v14 = vld [vmem:[#allocation2 + $0x708] sm:$0xff]  }
 0x5b1   :  { %9836 = vmatprep.subr.bf16.mxu0 %v10884_v17  ;;  %9856 = vmatprep.subr.bf16.mxu1 %v10884_v17  ;;  %v10679_v10 = vld [vmem:[#allocation2 + $0x748] sm:$0xff]  }
 0x5b4   :  { %9837 = vmatpush3.bf16.msra.mxu0 %v10641_v15  ;;  %9857 = vmatpush3.bf16.msra.mxu1 %v10642_v61  ;;  %v10680_v15 = vld [vmem:[#allocation2 + $0x700] sm:$0xff]   ;;  %v10682_v61 = vld [vmem:[#allocation3 + $0x1c] ss:$0 sps:$4 sm:$0x22]  }
 0x5b5   :  { %9838 = vmatprep.subr.bf16.mxu0 %v10884_v17  ;;  %9858 = vmatprep.subr.bf16.mxu1 %v10884_v17 }
 0x5b8   :  { %9839 = vmatpush3.bf16.msra.mxu0 %v10643_v6  ;;  %9859 = vmatpush3.bf16.msra.mxu1 %v10644_v0  ;;  %v10681_v6 = vld [vmem:[#allocation2 + $0x740] sm:$0xff]   ;;  %v5463_v0 = vld [vmem:[#allocation3 + $0x1c] sm:$0x1] }
 0x5b9   :  { %9840 = vmatprep.subr.bf16.mxu0 %v10884_v17  ;;  %9860 = vmatprep.subr.bf16.mxu1 %v10884_v17 }
 0x5bc   :  { %9841 = vmatpush3.bf16.msra.mxu0 %v10645_v12  ;;  %9861 = vmatpush3.bf16.msra.mxu1 %v10646_v7  ;;  %v5591_v12 = vrot.slane %v10682_v61, 1  ;;  %v10684_v7 = vld [vmem:[#allocation2 + $0x7f8] sm:$0xff]  }
 0x5bd   :  { %9866 = vmatprep.subr.bf16.mxu0 %v10884_v17  ;;  %9886 = vmatprep.subr.bf16.mxu1 %v10884_v17  ;;  %v10718_v61 = vld [vmem:[#allocation2 + $0x8b8] sm:$0xff]  }
 0x5bf   :  { %v3791_v23 = vpop.f32.mrf.mxu0  ;;  %9843 = vmatmul.mubr.bf16.vlgmr.msra.gmra.mxu0 %v5020_v13  ;;  %v3903_v24 = vpop.f32.mrf.mxu1  ;;  %9863 = vmatmul.mubr.bf16.vlgmr.msra.gmra.mxu1 %v5148_v18 }
 0x5c0   :  { %v3797_v5 = vadd.f32 %v3791_v23, %v3690_v4  ;;  %9867 = vmatpush3.bf16.msra.mxu0 %v10648_v20  ;;  %9887 = vmatpush3.bf16.msra.mxu1 %v10649_v21  ;;  %v10670_v4 = vld [vmem:[#allocation2 + $0x728] sm:$0xff]   ;;  %v10685_v21 = vld [vmem:[#allocation2 + $0x7b0] sm:$0xff]  }
 0x5c1   :  { %v9604_v26 = vpop.f32.mrf.mxu0  ;;  %9868 = vmatprep.subr.bf16.mxu0 %v10884_v17  ;;  %v9624_v25 = vpop.f32.mrf.mxu1  ;;  %9888 = vmatprep.subr.bf16.mxu1 %v10884_v17 }
 0x5c2   :  { %v3909_v38 = vadd.f32 %v3903_v24, %v3797_v5  ;;  %9882 = vmatprep.mubr.msk.bf16.mxu0 %vm10885_vm1, %v10884_v17  ;;  %9902 = vmatprep.mubr.msk.bf16.mxu1 %vm10885_vm1, %v10884_v17  ;;  %v10686_v5 = vld [vmem:[#allocation2 + $0x7f0] sm:$0xff]  }
 0x5c3   :  { %v3794_v19 = vpop.f32.mrf.mxu0  ;;  %v3906_v28 = vpop.f32.mrf.mxu1 }
 0x5c4   :  { %9869 = vmatpush3.bf16.msra.mxu0 %v10650_v58  ;;  %9889 = vmatpush3.bf16.msra.mxu1 %v10651_v27  ;;  %v10688_v19 = vld [vmem:[#allocation2 + $0x7e8] sm:$0xff]  }
 0x5c5   :  { %v9605_v37 = vpop.f32.mrf.mxu0  ;;  %9870 = vmatprep.subr.bf16.mxu0 %v10884_v17  ;;  %v9625_v41 = vpop.f32.mrf.mxu1  ;;  %9890 = vmatprep.subr.bf16.mxu1 %v10884_v17 }
 0x5c6   :  { %v10690_v37 = vld [vmem:[#allocation2 + $0x7e0] sm:$0xff]   ;;  %v10692_v41 = vld [vmem:[#allocation2 + $0x7d8] sm:$0xff]  }
 0x5c8   :  { %9871 = vmatpush3.bf16.msra.mxu0 %v10652_v30  ;;  %9891 = vmatpush3.bf16.msra.mxu1 %v10653_v40  ;;  %v10689_v30 = vld [vmem:[#allocation2 + $0x7a0] sm:$0xff]   ;;  %v10691_v40 = vld [vmem:[#allocation2 + $0x798] sm:$0xff]  }
 0x5c9   :  { %9872 = vmatprep.subr.bf16.mxu0 %v10884_v17  ;;  %9892 = vmatprep.subr.bf16.mxu1 %v10884_v17 }
 0x5cc   :  { %9873 = vmatpush3.bf16.msra.mxu0 %v10654_v59  ;;  %9893 = vmatpush3.bf16.msra.mxu1 %v10655_v31  ;;  %v10693_v59 = vld [vmem:[#allocation2 + $0x790] sm:$0xff]  }
 0x5cd   :  { %9874 = vmatprep.subr.bf16.mxu0 %v10884_v17  ;;  %9894 = vmatprep.subr.bf16.mxu1 %v10884_v17  ;;  %v10694_v31 = vld [vmem:[#allocation2 + $0x7d0] sm:$0xff]  }
 0x5d0   :  { %9875 = vmatpush3.bf16.msra.mxu0 %v10656_v34  ;;  %9895 = vmatpush3.bf16.msra.mxu1 %v10657_v48  ;;  %v10695_v34 = vld [vmem:[#allocation2 + $0x788] sm:$0xff]  }
 0x5d1   :  { %9876 = vmatprep.subr.bf16.mxu0 %v10884_v17  ;;  %9896 = vmatprep.subr.bf16.mxu1 %v10884_v17  ;;  %v10696_v48 = vld [vmem:[#allocation2 + $0x7c8] sm:$0xff]  }
 0x5d4   :  { %9877 = vmatpush3.bf16.msra.mxu0 %v10658_v42  ;;  %9897 = vmatpush3.bf16.msra.mxu1 %v10659_v43  ;;  %v10699_v42 = vld [vmem:[#allocation3 + $0x1c] ss:$0 sps:$4 sm:$0x44]   ;;  %v10697_v43 = vld [vmem:[#allocation2 + $0x780] sm:$0xff]  }
 0x5d5   :  { %9878 = vmatprep.subr.bf16.mxu0 %v10884_v17  ;;  %9898 = vmatprep.subr.bf16.mxu1 %v10884_v17  ;;  %v5703_v33 = vrot.slane %v10699_v42, 2 }
 0x5d8   :  { %9879 = vmatpush3.bf16.msra.mxu0 %v10660_v44  ;;  %9899 = vmatpush3.bf16.msra.mxu1 %v10661_v63  ;;  %v10700_v44 = vld [vmem:[#allocation3 + $0x1c] ss:$0 sps:$4 sm:$0x88]   ;;  %v10698_v63 = vld [vmem:[#allocation2 + $0x7c0] sm:$0xff]  }
 0x5d9   :  { %9880 = vmatprep.subr.bf16.mxu0 %v10884_v17  ;;  %9900 = vmatprep.subr.bf16.mxu1 %v10884_v17 }
 0x5dc   :  { %9881 = vmatpush3.bf16.msra.mxu0 %v10662_v46  ;;  %9901 = vmatpush3.bf16.msra.mxu1 %v10663_v49  ;;  %v5815_v46 = vrot.slane %v10700_v44, 3  ;;  %v10702_v49 = vld [vmem:[#allocation2 + $0x878] sm:$0xff]  }
 0x5dd   :  { %9906 = vmatprep.subr.bf16.mxu0 %v10884_v17  ;;  %9926 = vmatprep.subr.bf16.mxu1 %v10884_v17  ;;  %v10736_v44 = vld [vmem:[#allocation2 + $0x938] sm:$0xff]  }
 0x5df   :  { %v4015_v1 = vpop.f32.mrf.mxu0  ;;  %9883 = vmatmul.mubr.bf16.vlgmr.msra.gmra.mxu0 %v5260_v22  ;;  %v4127_v52 = vpop.f32.mrf.mxu1  ;;  %9903 = vmatmul.mubr.bf16.vlgmr.msra.gmra.mxu1 %v5372_v50 }
 0x5e0   :  { %v4021_v51 = vadd.f32 %v4015_v1, %v3909_v38  ;;  %9907 = vmatpush3.bf16.msra.mxu0 %v10666_v35  ;;  %9927 = vmatpush3.bf16.msra.mxu1 %v10667_v39  ;;  %v10687_v38 = vld [vmem:[#allocation2 + $0x7a8] sm:$0xff]   ;;  %v10703_v39 = vld [vmem:[#allocation2 + $0x830] sm:$0xff]  }
 0x5e1   :  { %v9644_v53 = vpop.f32.mrf.mxu0  ;;  %9908 = vmatprep.subr.bf16.mxu0 %v10884_v17  ;;  %v9664_v36 = vpop.f32.mrf.mxu1  ;;  %9928 = vmatprep.subr.bf16.mxu1 %v10884_v17 }
 0x5e2   :  { %v4133_v56 = vadd.f32 %v4127_v52, %v4021_v51  ;;  %9922 = vmatprep.mubr.msk.bf16.mxu0 %vm10885_vm1, %v10884_v17  ;;  %9942 = vmatprep.mubr.msk.bf16.mxu1 %vm10885_vm1, %v10884_v17  ;;  %v10704_v51 = vld [vmem:[#allocation2 + $0x870] sm:$0xff]  }
 0x5e3   :  { %v4018_v45 = vpop.f32.mrf.mxu0  ;;  %v4130_v62 = vpop.f32.mrf.mxu1 }
 0x5e4   :  { %9909 = vmatpush3.bf16.msra.mxu0 %v10668_v57  ;;  %9929 = vmatpush3.bf16.msra.mxu1 %v10669_v16  ;;  %v10706_v45 = vld [vmem:[#allocation2 + $0x868] sm:$0xff]  }
 0x5e5   :  { %v9645_v8 = vpop.f32.mrf.mxu0  ;;  %9910 = vmatprep.subr.bf16.mxu0 %v10884_v17  ;;  %v9665_v32 = vpop.f32.mrf.mxu1  ;;  %9930 = vmatprep.subr.bf16.mxu1 %v10884_v17 }
 0x5e6   :  { %v10708_v8 = vld [vmem:[#allocation2 + $0x860] sm:$0xff]   ;;  %v10710_v32 = vld [vmem:[#allocation2 + $0x858] sm:$0xff]  }
 0x5e8   :  { %9911 = vmatpush3.bf16.msra.mxu0 %v10670_v4  ;;  %9931 = vmatpush3.bf16.msra.mxu1 %v10671_v60  ;;  %v10707_v4 = vld [vmem:[#allocation2 + $0x820] sm:$0xff]   ;;  %v10709_v60 = vld [vmem:[#allocation2 + $0x818] sm:$0xff]  }
 0x5e9   :  { %9912 = vmatprep.subr.bf16.mxu0 %v10884_v17  ;;  %9932 = vmatprep.subr.bf16.mxu1 %v10884_v17 }
 0x5ec   :  { %9913 = vmatpush3.bf16.msra.mxu0 %v10672_v3  ;;  %9933 = vmatpush3.bf16.msra.mxu1 %v10673_v55  ;;  %v10711_v3 = vld [vmem:[#allocation2 + $0x810] sm:$0xff]  }
 0x5ed   :  { %9914 = vmatprep.subr.bf16.mxu0 %v10884_v17  ;;  %9934 = vmatprep.subr.bf16.mxu1 %v10884_v17  ;;  %v10712_v55 = vld [vmem:[#allocation2 + $0x850] sm:$0xff]  }
 0x5f0   :  { %9915 = vmatpush3.bf16.msra.mxu0 %v10674_v9  ;;  %9935 = vmatpush3.bf16.msra.mxu1 %v10675_v54  ;;  %v10713_v9 = vld [vmem:[#allocation2 + $0x808] sm:$0xff]  }
 0x5f1   :  { %9916 = vmatprep.subr.bf16.mxu0 %v10884_v17  ;;  %9936 = vmatprep.subr.bf16.mxu1 %v10884_v17  ;;  %v10714_v54 = vld [vmem:[#allocation2 + $0x848] sm:$0xff]  }
 0x5f4   :  { %9917 = vmatpush3.bf16.msra.mxu0 %v10676_v29  ;;  %9937 = vmatpush3.bf16.msra.mxu1 %v10677_v11  ;;  %v10715_v29 = vld [vmem:[#allocation2 + $0x800] sm:$0xff]  }
 0x5f5   :  { %9918 = vmatprep.subr.bf16.mxu0 %v10884_v17  ;;  %9938 = vmatprep.subr.bf16.mxu1 %v10884_v17  ;;  %v10717_v11 = vld [vmem:[#allocation3 + $0x20] ss:$0 sps:$4 sm:$0x22]  }
 0x5f8   :  { %9919 = vmatpush3.bf16.msra.mxu0 %v10678_v14  ;;  %9939 = vmatpush3.bf16.msra.mxu1 %v10679_v10  ;;  %v10716_v14 = vld [vmem:[#allocation2 + $0x840] sm:$0xff]  }
 0x5f9   :  { %9920 = vmatprep.subr.bf16.mxu0 %v10884_v17  ;;  %9940 = vmatprep.subr.bf16.mxu1 %v10884_v17  ;;  %v5906_v10 = vld [vmem:[#allocation3 + $0x20] sm:$0x1] }
 0x5fc   :  { %9921 = vmatpush3.bf16.msra.mxu0 %v10680_v15  ;;  %9941 = vmatpush3.bf16.msra.mxu1 %v10681_v6  ;;  %v6034_v15 = vrot.slane %v10717_v11, 1  ;;  %v10719_v6 = vld [vmem:[#allocation2 + $0x8f8] sm:$0xff]  }
 0x5fd   :  { %9946 = vmatprep.subr.bf16.mxu0 %v10884_v17  ;;  %9966 = vmatprep.subr.bf16.mxu1 %v10884_v17  ;;  %v10753_v11 = vld [vmem:[#allocation2 + $0x9b8] sm:$0xff]  }
 0x5ff   :  { %v4234_v13 = vpop.f32.mrf.mxu0  ;;  %9923 = vmatmul.mubr.bf16.vlgmr.msra.gmra.mxu0 %v5463_v0  ;;  %v4346_v20 = vpop.f32.mrf.mxu1  ;;  %9943 = vmatmul.mubr.bf16.vlgmr.msra.gmra.mxu1 %v5591_v12 }
 0x600   :  { %v4240_v18 = vadd.f32 %v4234_v13, %v4133_v56  ;;  %9947 = vmatpush3.bf16.msra.mxu0 %v10683_v2  ;;  %9967 = vmatpush3.bf16.msra.mxu1 %v10684_v7  ;;  %v10705_v56 = vld [vmem:[#allocation2 + $0x828] sm:$0xff]   ;;  %v10720_v7 = vld [vmem:[#allocation2 + $0x8b0] sm:$0xff]  }
 0x601   :  { %v9684_v23 = vpop.f32.mrf.mxu0  ;;  %9948 = vmatprep.subr.bf16.mxu0 %v10884_v17  ;;  %v9704_v58 = vpop.f32.mrf.mxu1  ;;  %9968 = vmatprep.subr.bf16.mxu1 %v10884_v17 }
 0x602   :  { %v4352_v24 = vadd.f32 %v4346_v20, %v4240_v18  ;;  %9962 = vmatprep.mubr.msk.bf16.mxu0 %vm10885_vm1, %v10884_v17  ;;  %9982 = vmatprep.mubr.msk.bf16.mxu1 %vm10885_vm1, %v10884_v17  ;;  %v10721_v18 = vld [vmem:[#allocation2 + $0x8f0] sm:$0xff]  }
 0x603   :  { %v4237_v26 = vpop.f32.mrf.mxu0  ;;  %v4349_v27 = vpop.f32.mrf.mxu1 }
 0x604   :  { %9949 = vmatpush3.bf16.msra.mxu0 %v10685_v21  ;;  %9969 = vmatpush3.bf16.msra.mxu1 %v10686_v5  ;;  %v10723_v26 = vld [vmem:[#allocation2 + $0x8e8] sm:$0xff]  }
 0x605   :  { %v9685_v25 = vpop.f32.mrf.mxu0  ;;  %9950 = vmatprep.subr.bf16.mxu0 %v10884_v17  ;;  %v9705_v28 = vpop.f32.mrf.mxu1  ;;  %9970 = vmatprep.subr.bf16.mxu1 %v10884_v17 }
 0x606   :  { %v10725_v25 = vld [vmem:[#allocation2 + $0x8e0] sm:$0xff]   ;;  %v10727_v28 = vld [vmem:[#allocation2 + $0x8d8] sm:$0xff]  }
 0x608   :  { %9951 = vmatpush3.bf16.msra.mxu0 %v10687_v38  ;;  %9971 = vmatpush3.bf16.msra.mxu1 %v10688_v19  ;;  %v10724_v38 = vld [vmem:[#allocation2 + $0x8a0] sm:$0xff]   ;;  %v10726_v19 = vld [vmem:[#allocation2 + $0x898] sm:$0xff]  }
 0x609   :  { %9952 = vmatprep.subr.bf16.mxu0 %v10884_v17  ;;  %9972 = vmatprep.subr.bf16.mxu1 %v10884_v17 }
 0x60c   :  { %9953 = vmatpush3.bf16.msra.mxu0 %v10689_v30  ;;  %9973 = vmatpush3.bf16.msra.mxu1 %v10690_v37  ;;  %v10728_v30 = vld [vmem:[#allocation2 + $0x890] sm:$0xff]  }
 0x60d   :  { %9954 = vmatprep.subr.bf16.mxu0 %v10884_v17  ;;  %9974 = vmatprep.subr.bf16.mxu1 %v10884_v17  ;;  %v10729_v37 = vld [vmem:[#allocation2 + $0x8d0] sm:$0xff]  }
 0x610   :  { %9955 = vmatpush3.bf16.msra.mxu0 %v10691_v40  ;;  %9975 = vmatpush3.bf16.msra.mxu1 %v10692_v41  ;;  %v10730_v40 = vld [vmem:[#allocation2 + $0x888] sm:$0xff]  }
 0x611   :  { %9956 = vmatprep.subr.bf16.mxu0 %v10884_v17  ;;  %9976 = vmatprep.subr.bf16.mxu1 %v10884_v17  ;;  %v10731_v41 = vld [vmem:[#allocation2 + $0x8c8] sm:$0xff]  }
 0x614   :  { %9957 = vmatpush3.bf16.msra.mxu0 %v10693_v59  ;;  %9977 = vmatpush3.bf16.msra.mxu1 %v10694_v31  ;;  %v10734_v59 = vld [vmem:[#allocation3 + $0x20] ss:$0 sps:$4 sm:$0x44]  }
 0x615   :  { %9958 = vmatprep.subr.bf16.mxu0 %v10884_v17  ;;  %9978 = vmatprep.subr.bf16.mxu1 %v10884_v17  ;;  %v10732_v31 = vld [vmem:[#allocation2 + $0x880] sm:$0xff]   ;;  %v6146_v42 = vrot.slane %v10734_v59, 2 }
 0x618   :  { %9959 = vmatpush3.bf16.msra.mxu0 %v10695_v34  ;;  %9979 = vmatpush3.bf16.msra.mxu1 %v10696_v48  ;;  %v10735_v34 = vld [vmem:[#allocation3 + $0x20] ss:$0 sps:$4 sm:$0x88]  }
 0x619   :  { %9960 = vmatprep.subr.bf16.mxu0 %v10884_v17  ;;  %9980 = vmatprep.subr.bf16.mxu1 %v10884_v17  ;;  %v10733_v48 = vld [vmem:[#allocation2 + $0x8c0] sm:$0xff]  }
 0x61c   :  { %9961 = vmatpush3.bf16.msra.mxu0 %v10697_v43  ;;  %9981 = vmatpush3.bf16.msra.mxu1 %v10698_v63  ;;  %v6258_v43 = vrot.slane %v10735_v34, 3  ;;  %v10737_v63 = vld [vmem:[#allocation2 + $0x978] sm:$0xff]  }
 0x61d   :  { %9986 = vmatprep.subr.bf16.mxu0 %v10884_v17  ;;  %10006 = vmatprep.subr.bf16.mxu1 %v10884_v17  ;;  %v10771_v34 = vld [vmem:[#allocation2 + $0xa38] sm:$0xff]  }
 0x61f   :  { %v4458_v22 = vpop.f32.mrf.mxu0  ;;  %9963 = vmatmul.mubr.bf16.vlgmr.msra.gmra.mxu0 %v5703_v33  ;;  %v4570_v35 = vpop.f32.mrf.mxu1  ;;  %9983 = vmatmul.mubr.bf16.vlgmr.msra.gmra.mxu1 %v5815_v46 }
 0x620   :  { %v4464_v50 = vadd.f32 %v4458_v22, %v4352_v24  ;;  %9987 = vmatpush3.bf16.msra.mxu0 %v10701_v47  ;;  %10007 = vmatpush3.bf16.msra.mxu1 %v10702_v49  ;;  %v10722_v24 = vld [vmem:[#allocation2 + $0x8a8] sm:$0xff]   ;;  %v10738_v49 = vld [vmem:[#allocation2 + $0x930] sm:$0xff]  }
 0x621   :  { %v9724_v1 = vpop.f32.mrf.mxu0  ;;  %9988 = vmatprep.subr.bf16.mxu0 %v10884_v17  ;;  %v9744_v57 = vpop.f32.mrf.mxu1  ;;  %10008 = vmatprep.subr.bf16.mxu1 %v10884_v17 }
 0x622   :  { %v4576_v52 = vadd.f32 %v4570_v35, %v4464_v50  ;;  %10002 = vmatprep.mubr.msk.bf16.mxu0 %vm10885_vm1, %v10884_v17  ;;  %10022 = vmatprep.mubr.msk.bf16.mxu1 %vm10885_vm1, %v10884_v17  ;;  %v10739_v50 = vld [vmem:[#allocation2 + $0x970] sm:$0xff]  }
 0x623   :  { %v4461_v53 = vpop.f32.mrf.mxu0  ;;  %v4573_v16 = vpop.f32.mrf.mxu1 }
 0x624   :  { %9989 = vmatpush3.bf16.msra.mxu0 %v10703_v39  ;;  %10009 = vmatpush3.bf16.msra.mxu1 %v10704_v51  ;;  %v10741_v53 = vld [vmem:[#allocation2 + $0x968] sm:$0xff]  }
 0x625   :  { %v9725_v36 = vpop.f32.mrf.mxu0  ;;  %9990 = vmatprep.subr.bf16.mxu0 %v10884_v17  ;;  %v9745_v62 = vpop.f32.mrf.mxu1  ;;  %10010 = vmatprep.subr.bf16.mxu1 %v10884_v17 }
 0x626   :  { %v10743_v36 = vld [vmem:[#allocation2 + $0x960] sm:$0xff]   ;;  %v10745_v62 = vld [vmem:[#allocation2 + $0x958] sm:$0xff]  }
 0x628   :  { %9991 = vmatpush3.bf16.msra.mxu0 %v10705_v56  ;;  %10011 = vmatpush3.bf16.msra.mxu1 %v10706_v45  ;;  %v10742_v56 = vld [vmem:[#allocation2 + $0x920] sm:$0xff]   ;;  %v10744_v45 = vld [vmem:[#allocation2 + $0x918] sm:$0xff]  }
 0x629   :  { %9992 = vmatprep.subr.bf16.mxu0 %v10884_v17  ;;  %10012 = vmatprep.subr.bf16.mxu1 %v10884_v17 }
 0x62c   :  { %9993 = vmatpush3.bf16.msra.mxu0 %v10707_v4  ;;  %10013 = vmatpush3.bf16.msra.mxu1 %v10708_v8  ;;  %v10746_v4 = vld [vmem:[#allocation2 + $0x910] sm:$0xff]  }
 0x62d   :  { %9994 = vmatprep.subr.bf16.mxu0 %v10884_v17  ;;  %10014 = vmatprep.subr.bf16.mxu1 %v10884_v17  ;;  %v10747_v8 = vld [vmem:[#allocation2 + $0x950] sm:$0xff]  }
 0x630   :  { %9995 = vmatpush3.bf16.msra.mxu0 %v10709_v60  ;;  %10015 = vmatpush3.bf16.msra.mxu1 %v10710_v32  ;;  %v10748_v60 = vld [vmem:[#allocation2 + $0x908] sm:$0xff]  }
 0x631   :  { %9996 = vmatprep.subr.bf16.mxu0 %v10884_v17  ;;  %10016 = vmatprep.subr.bf16.mxu1 %v10884_v17  ;;  %v10749_v32 = vld [vmem:[#allocation2 + $0x948] sm:$0xff]  }
 0x634   :  { %9997 = vmatpush3.bf16.msra.mxu0 %v10711_v3  ;;  %10017 = vmatpush3.bf16.msra.mxu1 %v10712_v55  ;;  %v10750_v3 = vld [vmem:[#allocation2 + $0x900] sm:$0xff]  }
 0x635   :  { %9998 = vmatprep.subr.bf16.mxu0 %v10884_v17  ;;  %10018 = vmatprep.subr.bf16.mxu1 %v10884_v17  ;;  %v10752_v55 = vld [vmem:[#allocation3 + $0x24] ss:$0 sps:$4 sm:$0x22]  }
 0x638   :  { %9999 = vmatpush3.bf16.msra.mxu0 %v10713_v9  ;;  %10019 = vmatpush3.bf16.msra.mxu1 %v10714_v54  ;;  %v10751_v9 = vld [vmem:[#allocation2 + $0x940] sm:$0xff]  }
 0x639   :  { %10000 = vmatprep.subr.bf16.mxu0 %v10884_v17  ;;  %10020 = vmatprep.subr.bf16.mxu1 %v10884_v17  ;;  %v6349_v54 = vld [vmem:[#allocation3 + $0x24] sm:$0x1] }
 0x63c   :  { %10001 = vmatpush3.bf16.msra.mxu0 %v10715_v29  ;;  %10021 = vmatpush3.bf16.msra.mxu1 %v10716_v14  ;;  %v6477_v29 = vrot.slane %v10752_v55, 1  ;;  %v10754_v14 = vld [vmem:[#allocation2 + $0x9f8] sm:$0xff]  }
 0x63d   :  { %10026 = vmatprep.subr.bf16.mxu0 %v10884_v17  ;;  %10046 = vmatprep.subr.bf16.mxu1 %v10884_v17  ;;  %v10788_v55 = vld [vmem:[#allocation2 + $0xab8] sm:$0xff]  }
 0x63f   :  { %v4677_v0 = vpop.f32.mrf.mxu0  ;;  %10003 = vmatmul.mubr.bf16.vlgmr.msra.gmra.mxu0 %v5906_v10  ;;  %v4789_v2 = vpop.f32.mrf.mxu1  ;;  %10023 = vmatmul.mubr.bf16.vlgmr.msra.gmra.mxu1 %v6034_v15 }
 0x640   :  { %v4683_v12 = vadd.f32 %v4677_v0, %v4576_v52  ;;  %10027 = vmatpush3.bf16.msra.mxu0 %v10718_v61  ;;  %10047 = vmatpush3.bf16.msra.mxu1 %v10719_v6  ;;  %v10740_v52 = vld [vmem:[#allocation2 + $0x928] sm:$0xff]   ;;  %v10755_v6 = vld [vmem:[#allocation2 + $0x9b0] sm:$0xff]  }
 0x641   :  { %v9764_v13 = vpop.f32.mrf.mxu0  ;;  %10028 = vmatprep.subr.bf16.mxu0 %v10884_v17  ;;  %v9784_v21 = vpop.f32.mrf.mxu1  ;;  %10048 = vmatprep.subr.bf16.mxu1 %v10884_v17 }
 0x642   :  { %v4795_v20 = vadd.f32 %v4789_v2, %v4683_v12  ;;  %10042 = vmatprep.mubr.msk.bf16.mxu0 %vm10885_vm1, %v10884_v17  ;;  %10062 = vmatprep.mubr.msk.bf16.mxu1 %vm10885_vm1, %v10884_v17  ;;  %v10756_v12 = vld [vmem:[#allocation2 + $0x9f0] sm:$0xff]  }
 0x643   :  { %v4680_v23 = vpop.f32.mrf.mxu0  ;;  %v4792_v5 = vpop.f32.mrf.mxu1 }
 0x644   :  { %10029 = vmatpush3.bf16.msra.mxu0 %v10720_v7  ;;  %10049 = vmatpush3.bf16.msra.mxu1 %v10721_v18  ;;  %v10758_v23 = vld [vmem:[#allocation2 + $0x9e8] sm:$0xff]  }
 0x645   :  { %v9765_v58 = vpop.f32.mrf.mxu0  ;;  %10030 = vmatprep.subr.bf16.mxu0 %v10884_v17  ;;  %v9785_v27 = vpop.f32.mrf.mxu1  ;;  %10050 = vmatprep.subr.bf16.mxu1 %v10884_v17 }
 0x646   :  { %v10760_v58 = vld [vmem:[#allocation2 + $0x9e0] sm:$0xff]   ;;  %v10762_v27 = vld [vmem:[#allocation2 + $0x9d8] sm:$0xff]  }
 0x648   :  { %10031 = vmatpush3.bf16.msra.mxu0 %v10722_v24  ;;  %10051 = vmatpush3.bf16.msra.mxu1 %v10723_v26  ;;  %v10759_v24 = vld [vmem:[#allocation2 + $0x9a0] sm:$0xff]   ;;  %v10761_v26 = vld [vmem:[#allocation2 + $0x998] sm:$0xff]  }
 0x649   :  { %10032 = vmatprep.subr.bf16.mxu0 %v10884_v17  ;;  %10052 = vmatprep.subr.bf16.mxu1 %v10884_v17 }
 0x64c   :  { %10033 = vmatpush3.bf16.msra.mxu0 %v10724_v38  ;;  %10053 = vmatpush3.bf16.msra.mxu1 %v10725_v25  ;;  %v10763_v38 = vld [vmem:[#allocation2 + $0x990] sm:$0xff]  }
 0x64d   :  { %10034 = vmatprep.subr.bf16.mxu0 %v10884_v17  ;;  %10054 = vmatprep.subr.bf16.mxu1 %v10884_v17  ;;  %v10764_v25 = vld [vmem:[#allocation2 + $0x9d0] sm:$0xff]  }
 0x650   :  { %10035 = vmatpush3.bf16.msra.mxu0 %v10726_v19  ;;  %10055 = vmatpush3.bf16.msra.mxu1 %v10727_v28  ;;  %v10765_v19 = vld [vmem:[#allocation2 + $0x988] sm:$0xff]  }
 0x651   :  { %10036 = vmatprep.subr.bf16.mxu0 %v10884_v17  ;;  %10056 = vmatprep.subr.bf16.mxu1 %v10884_v17  ;;  %v10766_v28 = vld [vmem:[#allocation2 + $0x9c8] sm:$0xff]  }
 0x654   :  { %10037 = vmatpush3.bf16.msra.mxu0 %v10728_v30  ;;  %10057 = vmatpush3.bf16.msra.mxu1 %v10729_v37  ;;  %v10769_v30 = vld [vmem:[#allocation3 + $0x24] ss:$0 sps:$4 sm:$0x44]  }
 0x655   :  { %10038 = vmatprep.subr.bf16.mxu0 %v10884_v17  ;;  %10058 = vmatprep.subr.bf16.mxu1 %v10884_v17  ;;  %v10767_v37 = vld [vmem:[#allocation2 + $0x980] sm:$0xff]   ;;  %v6589_v59 = vrot.slane %v10769_v30, 2 }
 0x658   :  { %10039 = vmatpush3.bf16.msra.mxu0 %v10730_v40  ;;  %10059 = vmatpush3.bf16.msra.mxu1 %v10731_v41  ;;  %v10770_v40 = vld [vmem:[#allocation3 + $0x24] ss:$0 sps:$4 sm:$0x88]  }
 0x659   :  { %10040 = vmatprep.subr.bf16.mxu0 %v10884_v17  ;;  %10060 = vmatprep.subr.bf16.mxu1 %v10884_v17  ;;  %v10768_v41 = vld [vmem:[#allocation2 + $0x9c0] sm:$0xff]  }
 0x65c   :  { %10041 = vmatpush3.bf16.msra.mxu0 %v10732_v31  ;;  %10061 = vmatpush3.bf16.msra.mxu1 %v10733_v48  ;;  %v6701_v31 = vrot.slane %v10770_v40, 3  ;;  %v10772_v48 = vld [vmem:[#allocation2 + $0xa78] sm:$0xff]  }
 0x65d   :  { %10066 = vmatprep.subr.bf16.mxu0 %v10884_v17  ;;  %10086 = vmatprep.subr.bf16.mxu1 %v10884_v17  ;;  %v10806_v40 = vld [vmem:[#allocation2 + $0xb38] sm:$0xff]  }
 0x65f   :  { %v4901_v33 = vpop.f32.mrf.mxu0  ;;  %10043 = vmatmul.mubr.bf16.vlgmr.msra.gmra.mxu0 %v6146_v42  ;;  %v5013_v47 = vpop.f32.mrf.mxu1  ;;  %10063 = vmatmul.mubr.bf16.vlgmr.msra.gmra.mxu1 %v6258_v43 }
 0x660   :  { %v4907_v46 = vadd.f32 %v4901_v33, %v4795_v20  ;;  %10067 = vmatpush3.bf16.msra.mxu0 %v10736_v44  ;;  %10087 = vmatpush3.bf16.msra.mxu1 %v10737_v63  ;;  %v10757_v20 = vld [vmem:[#allocation2 + $0x9a8] sm:$0xff]   ;;  %v10773_v63 = vld [vmem:[#allocation2 + $0xa30] sm:$0xff]  }
 0x661   :  { %v9804_v22 = vpop.f32.mrf.mxu0  ;;  %10068 = vmatprep.subr.bf16.mxu0 %v10884_v17  ;;  %v9824_v39 = vpop.f32.mrf.mxu1  ;;  %10088 = vmatprep.subr.bf16.mxu1 %v10884_v17 }
 0x662   :  { %v5019_v35 = vadd.f32 %v5013_v47, %v4907_v46  ;;  %10082 = vmatprep.mubr.msk.bf16.mxu0 %vm10885_vm1, %v10884_v17  ;;  %10102 = vmatprep.mubr.msk.bf16.mxu1 %vm10885_vm1, %v10884_v17  ;;  %v10774_v46 = vld [vmem:[#allocation2 + $0xa70] sm:$0xff]  }
 0x663   :  { %v4904_v1 = vpop.f32.mrf.mxu0  ;;  %v5016_v51 = vpop.f32.mrf.mxu1 }
 0x664   :  { %10069 = vmatpush3.bf16.msra.mxu0 %v10738_v49  ;;  %10089 = vmatpush3.bf16.msra.mxu1 %v10739_v50  ;;  %v10776_v1 = vld [vmem:[#allocation2 + $0xa68] sm:$0xff]  }
 0x665   :  { %v9805_v57 = vpop.f32.mrf.mxu0  ;;  %10070 = vmatprep.subr.bf16.mxu0 %v10884_v17  ;;  %v9825_v16 = vpop.f32.mrf.mxu1  ;;  %10090 = vmatprep.subr.bf16.mxu1 %v10884_v17 }
 0x666   :  { %v10778_v57 = vld [vmem:[#allocation2 + $0xa60] sm:$0xff]   ;;  %v10780_v16 = vld [vmem:[#allocation2 + $0xa58] sm:$0xff]  }
 0x668   :  { %10071 = vmatpush3.bf16.msra.mxu0 %v10740_v52  ;;  %10091 = vmatpush3.bf16.msra.mxu1 %v10741_v53  ;;  %v10777_v52 = vld [vmem:[#allocation2 + $0xa20] sm:$0xff]   ;;  %v10779_v53 = vld [vmem:[#allocation2 + $0xa18] sm:$0xff]  }
 0x669   :  { %10072 = vmatprep.subr.bf16.mxu0 %v10884_v17  ;;  %10092 = vmatprep.subr.bf16.mxu1 %v10884_v17 }
 0x66c   :  { %10073 = vmatpush3.bf16.msra.mxu0 %v10742_v56  ;;  %10093 = vmatpush3.bf16.msra.mxu1 %v10743_v36  ;;  %v10781_v56 = vld [vmem:[#allocation2 + $0xa10] sm:$0xff]  }
 0x66d   :  { %10074 = vmatprep.subr.bf16.mxu0 %v10884_v17  ;;  %10094 = vmatprep.subr.bf16.mxu1 %v10884_v17  ;;  %v10782_v36 = vld [vmem:[#allocation2 + $0xa50] sm:$0xff]  }
 0x670   :  { %10075 = vmatpush3.bf16.msra.mxu0 %v10744_v45  ;;  %10095 = vmatpush3.bf16.msra.mxu1 %v10745_v62  ;;  %v10783_v45 = vld [vmem:[#allocation2 + $0xa08] sm:$0xff]  }
 0x671   :  { %10076 = vmatprep.subr.bf16.mxu0 %v10884_v17  ;;  %10096 = vmatprep.subr.bf16.mxu1 %v10884_v17  ;;  %v10784_v62 = vld [vmem:[#allocation2 + $0xa48] sm:$0xff]  }
 0x674   :  { %10077 = vmatpush3.bf16.msra.mxu0 %v10746_v4  ;;  %10097 = vmatpush3.bf16.msra.mxu1 %v10747_v8  ;;  %v10785_v4 = vld [vmem:[#allocation2 + $0xa00] sm:$0xff]   ;;  %v10787_v8 = vld [vmem:[#allocation3 + $0x28] ss:$0 sps:$4 sm:$0x22]  }
 0x675   :  { %10078 = vmatprep.subr.bf16.mxu0 %v10884_v17  ;;  %10098 = vmatprep.subr.bf16.mxu1 %v10884_v17 }
 0x678   :  { %10079 = vmatpush3.bf16.msra.mxu0 %v10748_v60  ;;  %10099 = vmatpush3.bf16.msra.mxu1 %v10749_v32  ;;  %v10786_v60 = vld [vmem:[#allocation2 + $0xa40] sm:$0xff]   ;;  %v6792_v32 = vld [vmem:[#allocation3 + $0x28] sm:$0x1] }
 0x679   :  { %10080 = vmatprep.subr.bf16.mxu0 %v10884_v17  ;;  %10100 = vmatprep.subr.bf16.mxu1 %v10884_v17 }
 0x67c   :  { %10081 = vmatpush3.bf16.msra.mxu0 %v10750_v3  ;;  %10101 = vmatpush3.bf16.msra.mxu1 %v10751_v9  ;;  %v6920_v3 = vrot.slane %v10787_v8, 1  ;;  %v10789_v9 = vld [vmem:[#allocation2 + $0xaf8] sm:$0xff]  }
 0x67d   :  { %10106 = vmatprep.subr.bf16.mxu0 %v10884_v17  ;;  %10126 = vmatprep.subr.bf16.mxu1 %v10884_v17  ;;  %v10823_v8 = vld [vmem:[#allocation2 + $0xbb8] sm:$0xff]  }
 0x67f   :  { %v5120_v10 = vpop.f32.mrf.mxu0  ;;  %10083 = vmatmul.mubr.bf16.vlgmr.msra.gmra.mxu0 %v6349_v54  ;;  %v5232_v61 = vpop.f32.mrf.mxu1  ;;  %10103 = vmatmul.mubr.bf16.vlgmr.msra.gmra.mxu1 %v6477_v29 }
 0x680   :  { %v5126_v15 = vadd.f32 %v5120_v10, %v5019_v35  ;;  %10107 = vmatpush3.bf16.msra.mxu0 %v10753_v11  ;;  %10127 = vmatpush3.bf16.msra.mxu1 %v10754_v14  ;;  %v10775_v35 = vld [vmem:[#allocation2 + $0xa28] sm:$0xff]   ;;  %v10790_v14 = vld [vmem:[#allocation2 + $0xab0] sm:$0xff]  }
 0x681   :  { %v9844_v0 = vpop.f32.mrf.mxu0  ;;  %10108 = vmatprep.subr.bf16.mxu0 %v10884_v17  ;;  %v9864_v7 = vpop.f32.mrf.mxu1  ;;  %10128 = vmatprep.subr.bf16.mxu1 %v10884_v17 }
 0x682   :  { %v5238_v2 = vadd.f32 %v5232_v61, %v5126_v15  ;;  %10122 = vmatprep.mubr.msk.bf16.mxu0 %vm10885_vm1, %v10884_v17  ;;  %10142 = vmatprep.mubr.msk.bf16.mxu1 %vm10885_vm1, %v10884_v17  ;;  %v10791_v15 = vld [vmem:[#allocation2 + $0xaf0] sm:$0xff]  }
 0x683   :  { %v5123_v13 = vpop.f32.mrf.mxu0  ;;  %v5235_v18 = vpop.f32.mrf.mxu1 }
 0x684   :  { %10109 = vmatpush3.bf16.msra.mxu0 %v10755_v6  ;;  %10129 = vmatpush3.bf16.msra.mxu1 %v10756_v12  ;;  %v10793_v13 = vld [vmem:[#allocation2 + $0xae8] sm:$0xff]  }
 0x685   :  { %v9845_v21 = vpop.f32.mrf.mxu0  ;;  %10110 = vmatprep.subr.bf16.mxu0 %v10884_v17  ;;  %v9865_v5 = vpop.f32.mrf.mxu1  ;;  %10130 = vmatprep.subr.bf16.mxu1 %v10884_v17 }
 0x686   :  { %v10795_v21 = vld [vmem:[#allocation2 + $0xae0] sm:$0xff]   ;;  %v10797_v5 = vld [vmem:[#allocation2 + $0xad8] sm:$0xff]  }
 0x688   :  { %10111 = vmatpush3.bf16.msra.mxu0 %v10757_v20  ;;  %10131 = vmatpush3.bf16.msra.mxu1 %v10758_v23  ;;  %v10794_v20 = vld [vmem:[#allocation2 + $0xaa0] sm:$0xff]   ;;  %v10796_v23 = vld [vmem:[#allocation2 + $0xa98] sm:$0xff]  }
 0x689   :  { %10112 = vmatprep.subr.bf16.mxu0 %v10884_v17  ;;  %10132 = vmatprep.subr.bf16.mxu1 %v10884_v17 }
 0x68c   :  { %10113 = vmatpush3.bf16.msra.mxu0 %v10759_v24  ;;  %10133 = vmatpush3.bf16.msra.mxu1 %v10760_v58  ;;  %v10798_v24 = vld [vmem:[#allocation2 + $0xa90] sm:$0xff]  }
 0x68d   :  { %10114 = vmatprep.subr.bf16.mxu0 %v10884_v17  ;;  %10134 = vmatprep.subr.bf16.mxu1 %v10884_v17  ;;  %v10799_v58 = vld [vmem:[#allocation2 + $0xad0] sm:$0xff]  }
 0x690   :  { %10115 = vmatpush3.bf16.msra.mxu0 %v10761_v26  ;;  %10135 = vmatpush3.bf16.msra.mxu1 %v10762_v27  ;;  %v10800_v26 = vld [vmem:[#allocation2 + $0xa88] sm:$0xff]  }
 0x691   :  { %10116 = vmatprep.subr.bf16.mxu0 %v10884_v17  ;;  %10136 = vmatprep.subr.bf16.mxu1 %v10884_v17  ;;  %v10801_v27 = vld [vmem:[#allocation2 + $0xac8] sm:$0xff]  }
 0x694   :  { %10117 = vmatpush3.bf16.msra.mxu0 %v10763_v38  ;;  %10137 = vmatpush3.bf16.msra.mxu1 %v10764_v25  ;;  %v10804_v38 = vld [vmem:[#allocation3 + $0x28] ss:$0 sps:$4 sm:$0x44]   ;;  %v10802_v25 = vld [vmem:[#allocation2 + $0xa80] sm:$0xff]  }
 0x695   :  { %10118 = vmatprep.subr.bf16.mxu0 %v10884_v17  ;;  %10138 = vmatprep.subr.bf16.mxu1 %v10884_v17  ;;  %v7032_v30 = vrot.slane %v10804_v38, 2 }
 0x698   :  { %10119 = vmatpush3.bf16.msra.mxu0 %v10765_v19  ;;  %10139 = vmatpush3.bf16.msra.mxu1 %v10766_v28  ;;  %v10805_v19 = vld [vmem:[#allocation3 + $0x28] ss:$0 sps:$4 sm:$0x88]   ;;  %v10803_v28 = vld [vmem:[#allocation2 + $0xac0] sm:$0xff]  }
 0x699   :  { %10120 = vmatprep.subr.bf16.mxu0 %v10884_v17  ;;  %10140 = vmatprep.subr.bf16.mxu1 %v10884_v17 }
 0x69c   :  { %10121 = vmatpush3.bf16.msra.mxu0 %v10767_v37  ;;  %10141 = vmatpush3.bf16.msra.mxu1 %v10768_v41  ;;  %v7144_v37 = vrot.slane %v10805_v19, 3  ;;  %v10807_v41 = vld [vmem:[#allocation2 + $0xb78] sm:$0xff]  }
 0x69d   :  { %10146 = vmatprep.subr.bf16.mxu0 %v10884_v17  ;;  %10166 = vmatprep.subr.bf16.mxu1 %v10884_v17  ;;  %v10841_v19 = vld [vmem:[#allocation2 + $0xc38] sm:$0xff]  }
 0x69f   :  { %v5344_v42 = vpop.f32.mrf.mxu0  ;;  %10123 = vmatmul.mubr.bf16.vlgmr.msra.gmra.mxu0 %v6589_v59  ;;  %v5456_v44 = vpop.f32.mrf.mxu1  ;;  %10143 = vmatmul.mubr.bf16.vlgmr.msra.gmra.mxu1 %v6701_v31 }
 0x6a0   :  { %v5350_v43 = vadd.f32 %v5344_v42, %v5238_v2  ;;  %10147 = vmatpush3.bf16.msra.mxu0 %v10771_v34  ;;  %10167 = vmatpush3.bf16.msra.mxu1 %v10772_v48  ;;  %v10792_v2 = vld [vmem:[#allocation2 + $0xaa8] sm:$0xff]   ;;  %v10808_v48 = vld [vmem:[#allocation2 + $0xb30] sm:$0xff]  }
 0x6a1   :  { %v9884_v33 = vpop.f32.mrf.mxu0  ;;  %10148 = vmatprep.subr.bf16.mxu0 %v10884_v17  ;;  %v9904_v49 = vpop.f32.mrf.mxu1  ;;  %10168 = vmatprep.subr.bf16.mxu1 %v10884_v17 }
 0x6a2   :  { %v5462_v47 = vadd.f32 %v5456_v44, %v5350_v43  ;;  %10162 = vmatprep.mubr.msk.bf16.mxu0 %vm10885_vm1, %v10884_v17  ;;  %10182 = vmatprep.mubr.msk.bf16.mxu1 %vm10885_vm1, %v10884_v17  ;;  %v10809_v43 = vld [vmem:[#allocation2 + $0xb70] sm:$0xff]  }
 0x6a3   :  { %v5347_v22 = vpop.f32.mrf.mxu0  ;;  %v5459_v50 = vpop.f32.mrf.mxu1 }
 0x6a4   :  { %10149 = vmatpush3.bf16.msra.mxu0 %v10773_v63  ;;  %10169 = vmatpush3.bf16.msra.mxu1 %v10774_v46  ;;  %v10811_v22 = vld [vmem:[#allocation2 + $0xb68] sm:$0xff]  }
 0x6a5   :  { %v9885_v39 = vpop.f32.mrf.mxu0  ;;  %10150 = vmatprep.subr.bf16.mxu0 %v10884_v17  ;;  %v9905_v51 = vpop.f32.mrf.mxu1  ;;  %10170 = vmatprep.subr.bf16.mxu1 %v10884_v17 }
 0x6a6   :  { %v10813_v39 = vld [vmem:[#allocation2 + $0xb60] sm:$0xff]   ;;  %v10815_v51 = vld [vmem:[#allocation2 + $0xb58] sm:$0xff]  }
 0x6a8   :  { %10151 = vmatpush3.bf16.msra.mxu0 %v10775_v35  ;;  %10171 = vmatpush3.bf16.msra.mxu1 %v10776_v1  ;;  %v10812_v35 = vld [vmem:[#allocation2 + $0xb20] sm:$0xff]   ;;  %v10814_v1 = vld [vmem:[#allocation2 + $0xb18] sm:$0xff]  }
 0x6a9   :  { %10152 = vmatprep.subr.bf16.mxu0 %v10884_v17  ;;  %10172 = vmatprep.subr.bf16.mxu1 %v10884_v17 }
 0x6ac   :  { %10153 = vmatpush3.bf16.msra.mxu0 %v10777_v52  ;;  %10173 = vmatpush3.bf16.msra.mxu1 %v10778_v57  ;;  %v10816_v52 = vld [vmem:[#allocation2 + $0xb10] sm:$0xff]  }
 0x6ad   :  { %10154 = vmatprep.subr.bf16.mxu0 %v10884_v17  ;;  %10174 = vmatprep.subr.bf16.mxu1 %v10884_v17  ;;  %v10817_v57 = vld [vmem:[#allocation2 + $0xb50] sm:$0xff]  }
 0x6b0   :  { %10155 = vmatpush3.bf16.msra.mxu0 %v10779_v53  ;;  %10175 = vmatpush3.bf16.msra.mxu1 %v10780_v16  ;;  %v10818_v53 = vld [vmem:[#allocation2 + $0xb08] sm:$0xff]  }
 0x6b1   :  { %10156 = vmatprep.subr.bf16.mxu0 %v10884_v17  ;;  %10176 = vmatprep.subr.bf16.mxu1 %v10884_v17  ;;  %v10819_v16 = vld [vmem:[#allocation2 + $0xb48] sm:$0xff]  }
 0x6b4   :  { %10157 = vmatpush3.bf16.msra.mxu0 %v10781_v56  ;;  %10177 = vmatpush3.bf16.msra.mxu1 %v10782_v36  ;;  %v10820_v56 = vld [vmem:[#allocation2 + $0xb00] sm:$0xff]   ;;  %v10822_v36 = vld [vmem:[#allocation3 + $0x2c] ss:$0 sps:$4 sm:$0x22]  }
 0x6b5   :  { %10158 = vmatprep.subr.bf16.mxu0 %v10884_v17  ;;  %10178 = vmatprep.subr.bf16.mxu1 %v10884_v17 }
 0x6b8   :  { %10159 = vmatpush3.bf16.msra.mxu0 %v10783_v45  ;;  %10179 = vmatpush3.bf16.msra.mxu1 %v10784_v62  ;;  %v10821_v45 = vld [vmem:[#allocation2 + $0xb40] sm:$0xff]   ;;  %v7235_v62 = vld [vmem:[#allocation3 + $0x2c] sm:$0x1] }
 0x6b9   :  { %10160 = vmatprep.subr.bf16.mxu0 %v10884_v17  ;;  %10180 = vmatprep.subr.bf16.mxu1 %v10884_v17 }
 0x6bc   :  { %10161 = vmatpush3.bf16.msra.mxu0 %v10785_v4  ;;  %10181 = vmatpush3.bf16.msra.mxu1 %v10786_v60  ;;  %v7363_v4 = vrot.slane %v10822_v36, 1  ;;  %v10824_v60 = vld [vmem:[#allocation2 + $0xbf8] sm:$0xff]  }
 0x6bd   :  { %10186 = vmatprep.subr.bf16.mxu0 %v10884_v17  ;;  %10206 = vmatprep.subr.bf16.mxu1 %v10884_v17 }
 0x6bf   :  { %v5563_v54 = vpop.f32.mrf.mxu0  ;;  %10163 = vmatmul.mubr.bf16.vlgmr.msra.gmra.mxu0 %v6792_v32  ;;  %v5675_v11 = vpop.f32.mrf.mxu1  ;;  %10183 = vmatmul.mubr.bf16.vlgmr.msra.gmra.mxu1 %v6920_v3 }
 0x6c0   :  { %v5569_v29 = vadd.f32 %v5563_v54, %v5462_v47  ;;  %10187 = vmatpush3.bf16.msra.mxu0 %v10788_v55  ;;  %10207 = vmatpush3.bf16.msra.mxu1 %v10789_v9  ;;  %v10810_v47 = vld [vmem:[#allocation2 + $0xb28] sm:$0xff]   ;;  %v10825_v9 = vld [vmem:[#allocation2 + $0xbb0] sm:$0xff]  }
 0x6c1   :  { %v9924_v10 = vpop.f32.mrf.mxu0  ;;  %10188 = vmatprep.subr.bf16.mxu0 %v10884_v17  ;;  %v9944_v6 = vpop.f32.mrf.mxu1  ;;  %10208 = vmatprep.subr.bf16.mxu1 %v10884_v17 }
 0x6c2   :  { %v5681_v61 = vadd.f32 %v5675_v11, %v5569_v29  ;;  %10202 = vmatprep.mubr.msk.bf16.mxu0 %vm10885_vm1, %v10884_v17  ;;  %10222 = vmatprep.mubr.msk.bf16.mxu1 %vm10885_vm1, %v10884_v17  ;;  %v10826_v29 = vld [vmem:[#allocation2 + $0xbf0] sm:$0xff]  }
 0x6c3   :  { %v5566_v0 = vpop.f32.mrf.mxu0  ;;  %v5678_v12 = vpop.f32.mrf.mxu1 }
 0x6c4   :  { %10189 = vmatpush3.bf16.msra.mxu0 %v10790_v14  ;;  %10209 = vmatpush3.bf16.msra.mxu1 %v10791_v15  ;;  %v10828_v0 = vld [vmem:[#allocation2 + $0xbe8] sm:$0xff]  }
 0x6c5   :  { %v9925_v7 = vpop.f32.mrf.mxu0  ;;  %10190 = vmatprep.subr.bf16.mxu0 %v10884_v17  ;;  %v9945_v18 = vpop.f32.mrf.mxu1  ;;  %10210 = vmatprep.subr.bf16.mxu1 %v10884_v17 }
 0x6c6   :  { %v10830_v7 = vld [vmem:[#allocation2 + $0xbe0] sm:$0xff]   ;;  %v10832_v18 = vld [vmem:[#allocation2 + $0xbd8] sm:$0xff]  }
 0x6c8   :  { %10191 = vmatpush3.bf16.msra.mxu0 %v10792_v2  ;;  %10211 = vmatpush3.bf16.msra.mxu1 %v10793_v13  ;;  %v10829_v2 = vld [vmem:[#allocation2 + $0xba0] sm:$0xff]   ;;  %v10831_v13 = vld [vmem:[#allocation2 + $0xb98] sm:$0xff]  }
 0x6c9   :  { %10192 = vmatprep.subr.bf16.mxu0 %v10884_v17  ;;  %10212 = vmatprep.subr.bf16.mxu1 %v10884_v17 }
 0x6cc   :  { %10193 = vmatpush3.bf16.msra.mxu0 %v10794_v20  ;;  %10213 = vmatpush3.bf16.msra.mxu1 %v10795_v21  ;;  %v10833_v20 = vld [vmem:[#allocation2 + $0xb90] sm:$0xff]  }
 0x6cd   :  { %10194 = vmatprep.subr.bf16.mxu0 %v10884_v17  ;;  %10214 = vmatprep.subr.bf16.mxu1 %v10884_v17  ;;  %v10834_v21 = vld [vmem:[#allocation2 + $0xbd0] sm:$0xff]  }
 0x6d0   :  { %10195 = vmatpush3.bf16.msra.mxu0 %v10796_v23  ;;  %10215 = vmatpush3.bf16.msra.mxu1 %v10797_v5  ;;  %v10835_v23 = vld [vmem:[#allocation2 + $0xb88] sm:$0xff]  }
 0x6d1   :  { %10196 = vmatprep.subr.bf16.mxu0 %v10884_v17  ;;  %10216 = vmatprep.subr.bf16.mxu1 %v10884_v17  ;;  %v10836_v5 = vld [vmem:[#allocation2 + $0xbc8] sm:$0xff]  }
 0x6d4   :  { %10197 = vmatpush3.bf16.msra.mxu0 %v10798_v24  ;;  %10217 = vmatpush3.bf16.msra.mxu1 %v10799_v58  ;;  %v10839_v24 = vld [vmem:[#allocation3 + $0x2c] ss:$0 sps:$4 sm:$0x44]   ;;  %v10837_v58 = vld [vmem:[#allocation2 + $0xb80] sm:$0xff]  }
 0x6d5   :  { %10198 = vmatprep.subr.bf16.mxu0 %v10884_v17  ;;  %10218 = vmatprep.subr.bf16.mxu1 %v10884_v17  ;;  %v7475_v38 = vrot.slane %v10839_v24, 2 }
 0x6d8   :  { %10199 = vmatpush3.bf16.msra.mxu0 %v10800_v26  ;;  %10219 = vmatpush3.bf16.msra.mxu1 %v10801_v27  ;;  %v10840_v26 = vld [vmem:[#allocation3 + $0x2c] ss:$0 sps:$4 sm:$0x88]   ;;  %v10838_v27 = vld [vmem:[#allocation2 + $0xbc0] sm:$0xff]  }
 0x6d9   :  { %10200 = vmatprep.subr.bf16.mxu0 %v10884_v17  ;;  %10220 = vmatprep.subr.bf16.mxu1 %v10884_v17 }
 0x6dc   :  { %10201 = vmatpush3.bf16.msra.mxu0 %v10802_v25  ;;  %10221 = vmatpush3.bf16.msra.mxu1 %v10803_v28  ;;  %v7587_v25 = vrot.slane %v10840_v26, 3  ;;  %v10842_v28 = vld [vmem:[#allocation2 + $0xc78] sm:$0xff]  }
 0x6dd   :  { %10226 = vmatprep.subr.bf16.mxu0 %v10884_v17  ;;  %10246 = vmatprep.subr.bf16.mxu1 %v10884_v17 }
 0x6df   :  { %v5787_v59 = vpop.f32.mrf.mxu0  ;;  %10203 = vmatmul.mubr.bf16.vlgmr.msra.gmra.mxu0 %v7032_v30  ;;  %v5899_v34 = vpop.f32.mrf.mxu1  ;;  %10223 = vmatmul.mubr.bf16.vlgmr.msra.gmra.mxu1 %v7144_v37 }
 0x6e0   :  { %v5793_v31 = vadd.f32 %v5787_v59, %v5681_v61  ;;  %10227 = vmatpush3.bf16.msra.mxu0 %v10806_v40  ;;  %10247 = vmatpush3.bf16.msra.mxu1 %v10807_v41  ;;  %v10827_v61 = vld [vmem:[#allocation2 + $0xba8] sm:$0xff]   ;;  %v10843_v41 = vld [vmem:[#allocation2 + $0xc30] sm:$0xff]  }
 0x6e1   :  { %v9964_v42 = vpop.f32.mrf.mxu0  ;;  %10228 = vmatprep.subr.bf16.mxu0 %v10884_v17  ;;  %v9984_v63 = vpop.f32.mrf.mxu1  ;;  %10248 = vmatprep.subr.bf16.mxu1 %v10884_v17 }
 0x6e2   :  { %v5905_v44 = vadd.f32 %v5899_v34, %v5793_v31  ;;  %10242 = vmatprep.mubr.msk.bf16.mxu0 %vm10885_vm1, %v10884_v17  ;;  %10262 = vmatprep.mubr.msk.bf16.mxu1 %vm10885_vm1, %v10884_v17  ;;  %v10844_v31 = vld [vmem:[#allocation2 + $0xc70] sm:$0xff]  }
 0x6e3   :  { %v5790_v33 = vpop.f32.mrf.mxu0  ;;  %v5902_v46 = vpop.f32.mrf.mxu1 }
 0x6e4   :  { %10229 = vmatpush3.bf16.msra.mxu0 %v10808_v48  ;;  %10249 = vmatpush3.bf16.msra.mxu1 %v10809_v43  ;;  %v10846_v33 = vld [vmem:[#allocation2 + $0xc68] sm:$0xff]  }
 0x6e5   :  { %v9965_v49 = vpop.f32.mrf.mxu0  ;;  %10230 = vmatprep.subr.bf16.mxu0 %v10884_v17  ;;  %v9985_v50 = vpop.f32.mrf.mxu1  ;;  %10250 = vmatprep.subr.bf16.mxu1 %v10884_v17 }
 0x6e6   :  { %v10848_v49 = vld [vmem:[#allocation2 + $0xc60] sm:$0xff]   ;;  %v10850_v50 = vld [vmem:[#allocation2 + $0xc58] sm:$0xff]  }
 0x6e8   :  { %10231 = vmatpush3.bf16.msra.mxu0 %v10810_v47  ;;  %10251 = vmatpush3.bf16.msra.mxu1 %v10811_v22  ;;  %v10847_v47 = vld [vmem:[#allocation2 + $0xc20] sm:$0xff]   ;;  %v10849_v22 = vld [vmem:[#allocation2 + $0xc18] sm:$0xff]  }
 0x6e9   :  { %10232 = vmatprep.subr.bf16.mxu0 %v10884_v17  ;;  %10252 = vmatprep.subr.bf16.mxu1 %v10884_v17 }
 0x6ec   :  { %10233 = vmatpush3.bf16.msra.mxu0 %v10812_v35  ;;  %10253 = vmatpush3.bf16.msra.mxu1 %v10813_v39  ;;  %v10851_v35 = vld [vmem:[#allocation2 + $0xc10] sm:$0xff]  }
 0x6ed   :  { %10234 = vmatprep.subr.bf16.mxu0 %v10884_v17  ;;  %10254 = vmatprep.subr.bf16.mxu1 %v10884_v17  ;;  %v10852_v39 = vld [vmem:[#allocation2 + $0xc50] sm:$0xff]  }
 0x6f0   :  { %10235 = vmatpush3.bf16.msra.mxu0 %v10814_v1  ;;  %10255 = vmatpush3.bf16.msra.mxu1 %v10815_v51  ;;  %v10853_v1 = vld [vmem:[#allocation2 + $0xc08] sm:$0xff]  }
 0x6f1   :  { %10236 = vmatprep.subr.bf16.mxu0 %v10884_v17  ;;  %10256 = vmatprep.subr.bf16.mxu1 %v10884_v17  ;;  %v10854_v51 = vld [vmem:[#allocation2 + $0xc48] sm:$0xff]  }
 0x6f4   :  { %10237 = vmatpush3.bf16.msra.mxu0 %v10816_v52  ;;  %10257 = vmatpush3.bf16.msra.mxu1 %v10817_v57  ;;  %v10855_v52 = vld [vmem:[#allocation2 + $0xc00] sm:$0xff]   ;;  %v10857_v57 = vld [vmem:[#allocation3 + $0x30] ss:$0 sps:$4 sm:$0x22]  }
 0x6f5   :  { %10238 = vmatprep.subr.bf16.mxu0 %v10884_v17  ;;  %10258 = vmatprep.subr.bf16.mxu1 %v10884_v17 }
 0x6f8   :  { %10239 = vmatpush3.bf16.msra.mxu0 %v10818_v53  ;;  %10259 = vmatpush3.bf16.msra.mxu1 %v10819_v16  ;;  %v10856_v53 = vld [vmem:[#allocation2 + $0xc40] sm:$0xff]   ;;  %v7678_v16 = vld [vmem:[#allocation3 + $0x30] sm:$0x1] }
 0x6f9   :  { %10240 = vmatprep.subr.bf16.mxu0 %v10884_v17  ;;  %10260 = vmatprep.subr.bf16.mxu1 %v10884_v17 }
 0x6fc   :  { %10241 = vmatpush3.bf16.msra.mxu0 %v10820_v56  ;;  %10261 = vmatpush3.bf16.msra.mxu1 %v10821_v45  ;;  %v7806_v56 = vrot.slane %v10857_v57, 1 }
 0x6fd   :  { %10266 = vmatprep.subr.bf16.mxu0 %v10884_v17  ;;  %10286 = vmatprep.subr.bf16.mxu1 %v10884_v17 }
 0x6ff   :  { %v6006_v32 = vpop.f32.mrf.mxu0  ;;  %10243 = vmatmul.mubr.bf16.vlgmr.msra.gmra.mxu0 %v7235_v62  ;;  %v6118_v55 = vpop.f32.mrf.mxu1  ;;  %10263 = vmatmul.mubr.bf16.vlgmr.msra.gmra.mxu1 %v7363_v4 }
 0x700   :  { %v6012_v3 = vadd.f32 %v6006_v32, %v5905_v44  ;;  %10267 = vmatpush3.bf16.msra.mxu0 %v10823_v8  ;;  %10287 = vmatpush3.bf16.msra.mxu1 %v10824_v60  ;;  %v10845_v44 = vld [vmem:[#allocation2 + $0xc28] sm:$0xff]  }
 0x701   :  { %v10004_v54 = vpop.f32.mrf.mxu0  ;;  %10268 = vmatprep.subr.bf16.mxu0 %v10884_v17  ;;  %v10024_v14 = vpop.f32.mrf.mxu1  ;;  %10288 = vmatprep.subr.bf16.mxu1 %v10884_v17 }
 0x702   :  { %v6124_v11 = vadd.f32 %v6118_v55, %v6012_v3  ;;  %10282 = vmatprep.mubr.msk.bf16.mxu0 %vm10885_vm1, %v10884_v17  ;;  %10302 = vmatprep.mubr.msk.bf16.mxu1 %vm10885_vm1, %v10884_v17 }
 0x703   :  { %v6009_v10 = vpop.f32.mrf.mxu0  ;;  %v6121_v15 = vpop.f32.mrf.mxu1 }
 0x704   :  { %10269 = vmatpush3.bf16.msra.mxu0 %v10825_v9  ;;  %10289 = vmatpush3.bf16.msra.mxu1 %v10826_v29 }
 0x705   :  { %v10005_v6 = vpop.f32.mrf.mxu0  ;;  %10270 = vmatprep.subr.bf16.mxu0 %v10884_v17  ;;  %v10025_v12 = vpop.f32.mrf.mxu1  ;;  %10290 = vmatprep.subr.bf16.mxu1 %v10884_v17 }
 0x708   :  { %10271 = vmatpush3.bf16.msra.mxu0 %v10827_v61  ;;  %10291 = vmatpush3.bf16.msra.mxu1 %v10828_v0 }
 0x709   :  { %10272 = vmatprep.subr.bf16.mxu0 %v10884_v17  ;;  %10292 = vmatprep.subr.bf16.mxu1 %v10884_v17 }
 0x70c   :  { %10273 = vmatpush3.bf16.msra.mxu0 %v10829_v2  ;;  %10293 = vmatpush3.bf16.msra.mxu1 %v10830_v7 }
 0x70d   :  { %10274 = vmatprep.subr.bf16.mxu0 %v10884_v17  ;;  %10294 = vmatprep.subr.bf16.mxu1 %v10884_v17 }
 0x710   :  { %10275 = vmatpush3.bf16.msra.mxu0 %v10831_v13  ;;  %10295 = vmatpush3.bf16.msra.mxu1 %v10832_v18 }
 0x711   :  { %10276 = vmatprep.subr.bf16.mxu0 %v10884_v17  ;;  %10296 = vmatprep.subr.bf16.mxu1 %v10884_v17 }
 0x714   :  { %10277 = vmatpush3.bf16.msra.mxu0 %v10833_v20  ;;  %10297 = vmatpush3.bf16.msra.mxu1 %v10834_v21 }
 0x715   :  { %10278 = vmatprep.subr.bf16.mxu0 %v10884_v17  ;;  %10298 = vmatprep.subr.bf16.mxu1 %v10884_v17 }
 0x718   :  { %10279 = vmatpush3.bf16.msra.mxu0 %v10835_v23  ;;  %10299 = vmatpush3.bf16.msra.mxu1 %v10836_v5 }
 0x719   :  { %10280 = vmatprep.subr.bf16.mxu0 %v10884_v17  ;;  %10300 = vmatprep.subr.bf16.mxu1 %v10884_v17 }
 0x71c   :  { %10281 = vmatpush3.bf16.msra.mxu0 %v10837_v58  ;;  %10301 = vmatpush3.bf16.msra.mxu1 %v10838_v27  ;;  %v7913_v58 = vld [vmem:[%s13349_s7 + $0x38] sm:$0xff]  ;;  %v7912_v27 = vld [vmem:[%s13349_s7 + $0x30] sm:$0xff] }
 0x71d   :  { %10306 = vmatprep.subr.bf16.mxu0 %v10884_v17  ;;  %10326 = vmatprep.subr.bf16.mxu1 %v10884_v17 }
 0x71f   :  { %v6230_v30 = vpop.f32.mrf.mxu0  ;;  %10283 = vmatmul.mubr.bf16.vlgmr.msra.gmra.mxu0 %v7475_v38  ;;  %v6342_v40 = vpop.f32.mrf.mxu1  ;;  %10303 = vmatmul.mubr.bf16.vlgmr.msra.gmra.mxu1 %v7587_v25  ;;  %v7911_v38 = vld [vmem:[%s13349_s7 + $0x28] sm:$0xff]  ;;  %v7910_v25 = vld [vmem:[%s13349_s7 + $0x20] sm:$0xff] }
 0x720   :  { %v6236_v37 = vadd.f32 %v6230_v30, %v6124_v11  ;;  %10307 = vmatpush3.bf16.msra.mxu0 %v10841_v19  ;;  %10327 = vmatpush3.bf16.msra.mxu1 %v10842_v28  ;;  %v7909_v19 = vld [vmem:[%s13349_s7 + $0x18] sm:$0xff]  ;;  %v7908_v28 = vld [vmem:[%s13349_s7 + $0x10] sm:$0xff]  ;;  %v7907_v30 = vld [vmem:[%s13349_s7 + $0x8] sm:$0xff] }
 0x721   :  { %v10044_v59 = vpop.f32.mrf.mxu0  ;;  %10308 = vmatprep.subr.bf16.mxu0 %v10884_v17  ;;  %v10064_v48 = vpop.f32.mrf.mxu1  ;;  %10328 = vmatprep.subr.bf16.mxu1 %v10884_v17 }
 0x722   :  { %v6348_v34 = vadd.f32 %v6342_v40, %v6236_v37  ;;  %10322 = vmatprep.mubr.msk.bf16.mxu0 %vm10885_vm1, %v10884_v17  ;;  %10342 = vmatprep.mubr.msk.bf16.mxu1 %vm10885_vm1, %v10884_v17  ;;  %v7906_v37 = vld [vmem:[%s13349_s7] sm:$0xff] }
 0x723   :  { %v6233_v42 = vpop.f32.mrf.mxu0  ;;  %v6345_v43 = vpop.f32.mrf.mxu1 }
 0x724   :  { %10309 = vmatpush3.bf16.msra.mxu0 %v10843_v41  ;;  %10329 = vmatpush3.bf16.msra.mxu1 %v10844_v31 }
 0x725   :  { %v10045_v63 = vpop.f32.mrf.mxu0  ;;  %10310 = vmatprep.subr.bf16.mxu0 %v10884_v17  ;;  %v10065_v46 = vpop.f32.mrf.mxu1  ;;  %10330 = vmatprep.subr.bf16.mxu1 %v10884_v17 }
 0x728   :  { %10311 = vmatpush3.bf16.msra.mxu0 %v10845_v44  ;;  %10331 = vmatpush3.bf16.msra.mxu1 %v10846_v33 }
 0x729   :  { %10312 = vmatprep.subr.bf16.mxu0 %v10884_v17  ;;  %10332 = vmatprep.subr.bf16.mxu1 %v10884_v17 }
 0x72c   :  { %10313 = vmatpush3.bf16.msra.mxu0 %v10847_v47  ;;  %10333 = vmatpush3.bf16.msra.mxu1 %v10848_v49 }
 0x72d   :  { %10314 = vmatprep.subr.bf16.mxu0 %v10884_v17  ;;  %10334 = vmatprep.subr.bf16.mxu1 %v10884_v17 }
 0x730   :  { %10315 = vmatpush3.bf16.msra.mxu0 %v10849_v22  ;;  %10335 = vmatpush3.bf16.msra.mxu1 %v10850_v50 }
 0x731   :  { %10316 = vmatprep.subr.bf16.mxu0 %v10884_v17  ;;  %10336 = vmatprep.subr.bf16.mxu1 %v10884_v17 }
 0x734   :  { %10317 = vmatpush3.bf16.msra.mxu0 %v10851_v35  ;;  %10337 = vmatpush3.bf16.msra.mxu1 %v10852_v39 }
 0x735   :  { %10318 = vmatprep.subr.bf16.mxu0 %v10884_v17  ;;  %10338 = vmatprep.subr.bf16.mxu1 %v10884_v17 }
 0x738   :  { %10319 = vmatpush3.bf16.msra.mxu0 %v10853_v1  ;;  %10339 = vmatpush3.bf16.msra.mxu1 %v10854_v51 }
 0x739   :  { %10320 = vmatprep.subr.bf16.mxu0 %v10884_v17  ;;  %10340 = vmatprep.subr.bf16.mxu1 %v10884_v17 }
 0x73c   :  { %10321 = vmatpush3.bf16.msra.mxu0 %v10855_v52  ;;  %10341 = vmatpush3.bf16.msra.mxu1 %v10856_v53 }
 0x73d   :  { %10346 = vmatprep.subr.mxu0 %v10884_v17 }
 0x73f   :  { %v6449_v36 = vpop.f32.mrf.mxu0  ;;  %10323 = vmatmul.mubr.bf16.vlgmr.msra.gmra.mxu0 %v7678_v16  ;;  %v6561_v62 = vpop.f32.mrf.mxu1  ;;  %10343 = vmatmul.mubr.bf16.vlgmr.msra.gmra.mxu1 %v7806_v56 }
 0x740   :  { %v6455_v45 = vadd.f32 %v6449_v36, %v6348_v34  ;;  %10362 = vmatprep.mubr.msk.f32.mxu0 %vm10885_vm1, %v10884_v17  ;;  %10347 = vmatpush3.msra.mxu0 %v7913_v58  ;;  %vm7994_vm1 = vcmask 17408  }
 0x741   :  { %v10084_v4 = vpop.f32.mrf.mxu0  ;;  %v10104_v60 = vpop.f32.mrf.mxu1  ;;  %10348 = vmatprep.subr.mxu0 %v10884_v17 }
 0x742   :  { %v6567_v8 = vadd.f32 %v6561_v62, %v6455_v45  ;;  %10349 = vmatpush3.msra.mxu0 %v7912_v27 }
 0x743   :  { %v6452_v32 = vpop.f32.mrf.mxu0  ;;  %v6564_v3 = vpop.f32.mrf.mxu1  ;;  %10350 = vmatprep.subr.mxu0 %v10884_v17 }
 0x744   :  { %10351 = vmatpush3.msra.mxu0 %v7911_v38  ;;  %v8595_v3 = vld [vmem:[%s13348_s6] ss:$0 sm:$0xff]  ;;  %s10860_s6 = scalar_lea.vmem %s8003_s12, 32 }
 0x745   :  { %v10085_v55 = vpop.f32.mrf.mxu0  ;;  %v10105_v9 = vpop.f32.mrf.mxu1  ;;  %10352 = vmatprep.subr.mxu0 %v10884_v17  ;;  %p10861_p0 = scmp.ne.s32.totalorder %s8003_s12, %s10860_s6  ;;  %p10866_p2 = scmp.lt.s32.totalorder %s10860_s6, %s10860_s6 }
 0x746   :  { %10353 = vmatpush3.msra.mxu0 %v7910_v25 }
 0x747   :  { %10354 = vmatprep.subr.mxu0 %v10884_v17  ;;  %p10867_p3 = por %p10866_p2, %p10865_p1 }
 0x748   :  { %10355 = vmatpush3.msra.mxu0 %v7909_v19 }
 0x749   :  { %10356 = vmatprep.subr.mxu0 %v10884_v17  ;;  %p10868_p4 = pnand %p10867_p3, %p10861_p0 }
 0x74a   :  { %10357 = vmatpush3.msra.mxu0 %v7908_v28 }
 0x74b   :  { %10358 = vmatprep.subr.mxu0 %v10884_v17 }
 0x74c   :  { %10359 = vmatpush3.msra.mxu0 %v7907_v30 }
 0x74d   :  { %10360 = vmatprep.subr.mxu0 %v10884_v17 }
 0x74e   :  { %10361 = vmatpush3.msra.mxu0 %v7906_v37 }
 0x75f   :  { %v6673_v54 = vpop.f32.mrf.mxu0  ;;  %v6785_v11 = vpop.f32.mrf.mxu1 }
 0x760   :  { %v6679_v29 = vadd.f32 %v6673_v54, %v6567_v8 }
 0x761   :  { %v10124_v14 = vpop.f32.mrf.mxu0  ;;  %v10144_v15 = vpop.f32.mrf.mxu1 }
 0x762   :  { %v6791_v10 = vadd.f32 %v6785_v11, %v6679_v29 }
 0x763   :  { %v6676_v61 = vpop.f32.mrf.mxu0  ;;  %v6788_v6 = vpop.f32.mrf.mxu1 }
 0x764   :  { %v8596_v6 = vld [vmem:[%s13350_s8] ss:$0 sm:$0xff] }
 0x765   :  { %v10125_v0 = vpop.f32.mrf.mxu0  ;;  %v10145_v12 = vpop.f32.mrf.mxu1 }
 0x77f   :  { %v6892_v2 = vpop.f32.mrf.mxu0  ;;  %v7004_v13 = vpop.f32.mrf.mxu1 }
 0x780   :  { %v6898_v7 = vadd.f32 %v6892_v2, %v6791_v10 }
 0x781   :  { %v10164_v18 = vpop.f32.mrf.mxu0  ;;  %v10184_v21 = vpop.f32.mrf.mxu1 }
 0x782   :  { %v7010_v20 = vadd.f32 %v7004_v13, %v6898_v7 }
 0x783   :  { %v6895_v23 = vpop.f32.mrf.mxu0  ;;  %v7007_v5 = vpop.f32.mrf.mxu1 }
 0x785   :  { %v10165_v24 = vpop.f32.mrf.mxu0  ;;  %v10185_v26 = vpop.f32.mrf.mxu1 }
 0x79f   :  { %v7116_v40 = vpop.f32.mrf.mxu0  ;;  %v7228_v59 = vpop.f32.mrf.mxu1 }
 0x7a0   :  { %v7122_v41 = vadd.f32 %v7116_v40, %v7010_v20 }
 0x7a1   :  { %v10204_v31 = vpop.f32.mrf.mxu0  ;;  %v10224_v48 = vpop.f32.mrf.mxu1 }
 0x7a2   :  { %v7234_v34 = vadd.f32 %v7228_v59, %v7122_v41 }
 0x7a3   :  { %v7119_v42 = vpop.f32.mrf.mxu0  ;;  %v7231_v43 = vpop.f32.mrf.mxu1 }
 0x7a5   :  { %v10205_v44 = vpop.f32.mrf.mxu0  ;;  %v10225_v63 = vpop.f32.mrf.mxu1 }
 0x7bf   :  { %v7335_v33 = vpop.f32.mrf.mxu0  ;;  %v7447_v46 = vpop.f32.mrf.mxu1 }
 0x7c0   :  { %v7341_v36 = vadd.f32 %v7335_v33, %v7234_v34 }
 0x7c1   :  { %v10244_v47 = vpop.f32.mrf.mxu0  ;;  %v10264_v49 = vpop.f32.mrf.mxu1 }
 0x7c2   :  { %v7453_v45 = vadd.f32 %v7447_v46, %v7341_v36 }
 0x7c3   :  { %v7338_v22 = vpop.f32.mrf.mxu0  ;;  %v7450_v50 = vpop.f32.mrf.mxu1 }
 0x7c5   :  { %v10245_v35 = vpop.f32.mrf.mxu0  ;;  %v10265_v39 = vpop.f32.mrf.mxu1 }
 0x7df   :  { %v7559_v17 = vpop.f32.mrf.mxu0  ;;  %v7671_v1 = vpop.f32.mrf.mxu1 }
 0x7e0   :  { %v7565_v62 = vadd.f32 %v7559_v17, %v7453_v45 }
 0x7e1   :  { %v10284_v51 = vpop.f32.mrf.mxu0  ;;  %v10304_v52 = vpop.f32.mrf.mxu1 }
 0x7e2   :  { %v7677_v4 = vadd.f32 %v7671_v1, %v7565_v62 }
 0x7e3   :  { %v7562_v57 = vpop.f32.mrf.mxu0  ;;  %v7674_v53 = vpop.f32.mrf.mxu1 }
 0x7e5   :  { %v10285_v16 = vpop.f32.mrf.mxu0  ;;  %v10305_v56 = vpop.f32.mrf.mxu1 }
 0x7ff   :  { %v7778_v8 = vpop.f32.mrf.mxu0  ;;  %v7890_v32 = vpop.f32.mrf.mxu1 }
 0x800   :  { %v7784_v60 = vadd.f32 %v7778_v8, %v7677_v4 }
 0x801   :  { %v10324_v55 = vpop.f32.mrf.mxu0  ;;  %v10344_v54 = vpop.f32.mrf.mxu1 }
 0x802   :  { %v7896_v9 = vadd.f32 %v7890_v32, %v7784_v60 }
 0x803   :  { %v7781_v29 = vpop.f32.mrf.mxu0  ;;  %v7893_v14 = vpop.f32.mrf.mxu1 }
 0x804   :  { %v7904_v11 = vadd.f32 %v8595_v3, %v7896_v9 }
 0x805   :  { %v10325_v10 = vpop.f32.mrf.mxu0  ;;  %v10345_v15 = vpop.f32.mrf.mxu1 }
 0x806   :  { %10858 = vtanh.f32 %v7904_v11 }
 0x813   :  { %v10859_v61 = vpop.eup %10858 }
 0x814   :  { %10363 = vmatmul.mubr.msk.f32.vlgmr.msra.gmra.mxu0 %vm1642_vm2, %v10859_v61 }
 0x8d4   :  { %v7990_v0 = vpop.f32.mrf.mxu0 }
 0x8d5   :  { %v7991_v12 = vadd.f32 %v8596_v6, %v7990_v0 }
 0x8d6   :  { %v10364_v2 = vpop.f32.mrf.mxu0 }
 0x8d7   :  { %7995 = vst.msk [vmem:[#allocation5] sm:$0x3] %vm7994_vm1, %v7991_v12 }
 0x8d8   :  { %10871 = shalt.err (!%p10868_p4)
}
 0x8d9   :  { %8005 = dma.vmem_to_hbm [thread:$0]  %s8003_s12, 32, %s13351_s9, [#allocation6]  }
 0x8da   :  { %10882 = dma.done.wait [#allocation6], 32  }
 0x8db   :  { %10883 = vsyncadd [#allocation6], 4294967264 }
 0x8dc   :  { %8009 = vsyncpa [#allocation6], 1 }
 0x8dd   :  { %8010 = vsyncmov [#allocation4] }
 0x8e0   :  { %s8011_s8 = vpop.sfrf %8010 }
 0x8e1   :  { %p8598_p5 = scmp.ne.s32.totalorder %s8011_s8, 0 }
 0x8e3   :  { %8015 = shalt.err (%p8598_p5)  }

</bundles_post_ra>
